<compile_context>
chip_gen: v5e
topology: v5e:2x2
jax: 0.10.0
libtpu: 0.0.40
codegen_flags: <defaults>
</compile_context>

<pallas_src>
import math
import jax
import jax.numpy as jnp
from jax import lax
from jax.experimental import pallas as pl
from jax.experimental.pallas import tpu as pltpu

# ---- small T5-v1.1-style encoder config ----
VOCAB = 128
D_MODEL = 32
N_HEADS = 4
D_KV = 8
D_FF = 64
N_LAYERS = 2
SEQLEN = 8
BATCH = 2
NUM_BUCKETS = 32
MAX_DISTANCE = 128
EPS = 1e-6
NEG_INF = -1e9  # additive-mask value (stands in for finfo(float32).min)

HK = N_HEADS * D_KV      # 32
BS = BATCH * SEQLEN      # 16   rows of the folded activation slab
BH = BATCH * N_HEADS     # 8    attention batch (b, h) merged


# ----------------------------- kernel helpers -----------------------------

def _rmsnorm(x, w):
    # T5LayerNorm: no mean subtraction, no bias; stats in f32.
    var = jnp.mean(x * x, axis=-1, keepdims=True)
    return x * lax.rsqrt(var + EPS) * w


def _gelu_new(x):
    # "gelu_new" tanh approximation used by the T5 v1.1 gated FFN (EUP tanh).
    return 0.5 * x * (1.0 + jnp.tanh(
        math.sqrt(2.0 / math.pi) * (x + 0.044715 * x * x * x)))


def _split_heads(a):
    # (B*S, H*dkv) f32 -> (B*H, S, dkv) bf16 (head becomes the batch axis).
    a = a.reshape(BATCH, SEQLEN, N_HEADS, D_KV)
    a = jnp.transpose(a, (0, 2, 1, 3))
    return a.reshape(BH, SEQLEN, D_KV).astype(jnp.bfloat16)


def _merge_heads(a):
    # (B*H, S, dkv) f32 -> (B*S, H*dkv) bf16 for the output projection matmul.
    a = a.reshape(BATCH, N_HEADS, SEQLEN, D_KV)
    a = jnp.transpose(a, (0, 2, 1, 3))
    return a.reshape(BS, HK).astype(jnp.bfloat16)


# ----------------------------- fused encoder kernel -----------------------------

def encoder_kernel(x_ref, bias_ref, ln1_ref, wqkv_ref, wo_ref, ln2_ref,
                   wi_ref, wffo_ref, fln_ref, out_ref):
    """Whole encoder (all layers + final norm) in one invocation.

    x_ref    : (B*S, D)      embedded tokens (f32 residual stream)
    bias_ref : (B*H, S, S)   position bias + additive attention mask (f32)
    ln1/ln2  : (L, D)        pre-attn / pre-FFN RMSNorm weights (f32)
    wqkv     : (L, D, 3*HK)  fused Q|K|V projection, bf16, head-major per group
    wo       : (L, HK, D)    attention output projection, bf16
    wi       : (L, D, 2*FF)  fused gated-FFN input (gelu branch | linear), bf16
    wffo     : (L, FF, D)    FFN output projection, bf16
    fln      : (1, D)        final RMSNorm weight (f32)
    """
    x = x_ref[...]                       # (BS, D) f32 residual stream
    bias = bias_ref[...]                 # (BH, S, S) f32, reused by every layer
    ln1 = ln1_ref[...]                   # (L, D)
    ln2 = ln2_ref[...]

    for l in range(N_LAYERS):            # static unroll: all layer indices constant
        # ---------------- self-attention sublayer ----------------
        xn = _rmsnorm(x, ln1[l:l + 1]).astype(jnp.bfloat16)
        qkv = jnp.dot(xn, wqkv_ref[l],
                      preferred_element_type=jnp.float32)            # (BS, 3*HK)
        q = _split_heads(qkv[:, :HK])                                 # (BH, S, dkv)
        k = _split_heads(qkv[:, HK:2 * HK])
        v = _split_heads(qkv[:, 2 * HK:])
        # T5 attention has NO 1/sqrt(d_kv) scaling; bias = pos_bias + mask.
        s = jnp.einsum('gqd,gkd->gqk', q, k,
                       preferred_element_type=jnp.float32)            # (BH, S, S)
        s = s + bias
        s = s - jnp.max(s, axis=-1, keepdims=True)
        p = jnp.exp(s)
        p = p * pl.reciprocal(jnp.sum(p, axis=-1, keepdims=True), approx=True)
        o = jnp.einsum('gqk,gkd->gqd', p.astype(jnp.bfloat16), v,
                       preferred_element_type=jnp.float32)            # (BH, S, dkv)
        attn = _merge_heads(o)                                        # (BS, HK)
        x = x + jnp.dot(attn, wo_ref[l],
                        preferred_element_type=jnp.float32)           # residual

        # ---------------- gated-GELU FFN sublayer ----------------
        xn2 = _rmsnorm(x, ln2[l:l + 1]).astype(jnp.bfloat16)
        hpre = jnp.dot(xn2, wi_ref[l],
                       preferred_element_type=jnp.float32)            # (BS, 2*FF)
        h_act = _gelu_new(hpre[:, :D_FF]) * hpre[:, D_FF:]            # (BS, FF) f32
        x = x + jnp.dot(h_act.astype(jnp.bfloat16), wffo_ref[l],
                        preferred_element_type=jnp.float32)           # residual

    out_ref[...] = _rmsnorm(x, fln_ref[...])                          # final RMSNorm


def encoder_fused(x2d, bias_g, ln1, wqkv, wo, ln2, wi, wffo, fln):
    # Single grid step: whole problem is one block; weights DMA'd once into VMEM.
    return pl.pallas_call(
        encoder_kernel,
        out_shape=jax.ShapeDtypeStruct(x2d.shape, jnp.float32),
        grid=(1,),
        in_specs=[
            pl.BlockSpec(x2d.shape, lambda i: (0, 0)),
            pl.BlockSpec(bias_g.shape, lambda i: (0, 0, 0)),
            pl.BlockSpec(ln1.shape, lambda i: (0, 0)),
            pl.BlockSpec(wqkv.shape, lambda i: (0, 0, 0)),
            pl.BlockSpec(wo.shape, lambda i: (0, 0, 0)),
            pl.BlockSpec(ln2.shape, lambda i: (0, 0)),
            pl.BlockSpec(wi.shape, lambda i: (0, 0, 0)),
            pl.BlockSpec(wffo.shape, lambda i: (0, 0, 0)),
            pl.BlockSpec(fln.shape, lambda i: (0, 0)),
        ],
        out_specs=pl.BlockSpec(x2d.shape, lambda i: (0, 0)),
        compiler_params=pltpu.CompilerParams(
            dimension_semantics=("arbitrary",)),
    )(x2d, bias_g, ln1, wqkv, wo, ln2, wi, wffo, fln)


# -------------- relative position bias (one-time init glue, mirrors __init__) --------------

def _relative_position_bucket(relative_position, num_buckets, max_distance):
    # bidirectional=True (encoder)
    num_buckets //= 2
    relative_buckets = (relative_position > 0).astype(jnp.int32) * num_buckets
    relative_position = jnp.abs(relative_position)
    max_exact = num_buckets // 2
    is_small = relative_position < max_exact
    safe_rp = jnp.maximum(relative_position, 1)          # avoid log(0) in large branch
    rel_if_large = max_exact + (
        jnp.log(safe_rp.astype(jnp.float32) / max_exact)
        / math.log(max_distance / max_exact)
        * (num_buckets - max_exact)
    ).astype(jnp.int32)
    rel_if_large = jnp.minimum(rel_if_large, num_buckets - 1)
    relative_buckets += jnp.where(is_small, relative_position, rel_if_large)
    return relative_buckets


def compute_bias(rel_attention_bias_table, seqlen):
    """Mirrors T5Attention.compute_bias(seqlen, seqlen): returns (1, H, S, S)."""
    context_position = jnp.arange(seqlen, dtype=jnp.int32)[:, None]
    memory_position = jnp.arange(seqlen, dtype=jnp.int32)[None, :]
    relative_position = memory_position - context_position            # (S, S)
    buckets = _relative_position_bucket(relative_position, NUM_BUCKETS, MAX_DISTANCE)
    values = jnp.take(rel_attention_bias_table, buckets, axis=0)      # (S, S, H)
    return jnp.transpose(values, (2, 0, 1))[None]                     # (1, H, S, S)


# ----------------------------- parameters -----------------------------

def init_params(key):
    def nrm(k, shape, scale=0.02, dtype=jnp.float32):
        return (scale * jax.random.normal(k, shape, dtype=jnp.float32)).astype(dtype)

    k = jax.random.split(key, 6)
    return {
        "embed": nrm(k[0], (VOCAB, D_MODEL), 1.0),
        "rel_bias": nrm(k[1], (NUM_BUCKETS, N_HEADS)),
        "ln1": jnp.ones((N_LAYERS, D_MODEL), jnp.float32),
        # fused Q|K|V projection, head-major within each of the three groups (bf16)
        "wqkv": nrm(k[2], (N_LAYERS, D_MODEL, 3 * HK), dtype=jnp.bfloat16),
        "wo": nrm(k[3], (N_LAYERS, HK, D_MODEL), dtype=jnp.bfloat16),
        "ln2": jnp.ones((N_LAYERS, D_MODEL), jnp.float32),
        # fused gated-FFN input: [:, :, :D_FF] = gelu branch, [:, :, D_FF:] = linear branch
        "wi": nrm(k[4], (N_LAYERS, D_MODEL, 2 * D_FF), dtype=jnp.bfloat16),
        "wffo": nrm(k[5], (N_LAYERS, D_FF, D_MODEL), dtype=jnp.bfloat16),
        "final_ln": jnp.ones((1, D_MODEL), jnp.float32),
    }


# ----------------------------- forward (== TracingT5WrapperTP.forward) -----------------------------

def t5_encoder_forward(params, precomputed_bias, text_input_ids, prompt_attention_mask):
    B, S = text_input_ids.shape
    # token embedding lookup (plain-XLA glue; T5 does not scale encoder embeddings)
    x = jnp.take(params["embed"], text_input_ids, axis=0)              # (B, S, D) f32

    # T5 extended attention mask: (1 - mask) * min -> additive, shape (B,1,1,S)
    ext_mask = (1.0 - prompt_attention_mask.astype(jnp.float32))[:, None, None, :] * NEG_INF
    # position bias computed once (block 0) and reused by every layer
    bias = precomputed_bias + ext_mask                                  # (B, H, S, S)

    out2d = encoder_fused(
        x.reshape(B * S, D_MODEL),                                      # folded batch
        bias.reshape(B * N_HEADS, S, S),                                # head-batched bias
        params["ln1"], params["wqkv"], params["wo"],
        params["ln2"], params["wi"], params["wffo"], params["final_ln"])
    return out2d.reshape(B, S, D_MODEL)                                 # last_hidden_state


if __name__ == "__main__":
    key = jax.random.PRNGKey(0)
    pkey, ikey = jax.random.split(key)
    params = init_params(pkey)

    # mirrors the wrapper __init__: bias precomputed once; TP degree = 1 so
    # get_sharded_data(bias, 1) is the identity.
    precomputed_bias = compute_bias(params["rel_bias"], SEQLEN)        # (1, H, S, S)

    text_input_ids = jax.random.randint(ikey, (BATCH, SEQLEN), 0, VOCAB, dtype=jnp.int32)
    prompt_attention_mask = jnp.ones((BATCH, SEQLEN), dtype=jnp.int32)
    prompt_attention_mask = prompt_attention_mask.at[1, -2:].set(0)    # some padding

    # TODO(synk): torch wrapper returns a BaseModelOutput; we return last_hidden_state only.
    fwd = jax.jit(t5_encoder_forward)
    out = fwd(params, precomputed_bias, text_input_ids, prompt_attention_mask)
    out = jax.block_until_ready(out)
    assert out.shape == (BATCH, SEQLEN, D_MODEL)
    assert bool(jnp.all(jnp.isfinite(out)))
    print("KERNEL_OK")
</pallas_src>

<mosaic_0001>
module attributes {stable_mosaic.version = 11 : i64} {
  func.func @encoder_kernel(%arg0: i32, %arg1: memref<16x32xf32, #tpu.memory_space<vmem>>, %arg2: memref<8x8x8xf32, #tpu.memory_space<vmem>>, %arg3: memref<2x32xf32, #tpu.memory_space<vmem>>, %arg4: memref<2x32x96xbf16, #tpu.memory_space<vmem>>, %arg5: memref<2x32x32xbf16, #tpu.memory_space<vmem>>, %arg6: memref<2x32xf32, #tpu.memory_space<vmem>>, %arg7: memref<2x32x128xbf16, #tpu.memory_space<vmem>>, %arg8: memref<2x64x32xbf16, #tpu.memory_space<vmem>>, %arg9: memref<1x32xf32, #tpu.memory_space<vmem>>, %arg10: memref<16x32xf32, #tpu.memory_space<vmem>>) attributes {dimension_semantics = [#tpu.dimension_semantics<arbitrary>], iteration_bounds = array<i64: 1>, scalar_prefetch = 0 : i64, scratch_operands = 0 : i64, tpu.core_type = #tpu.core_type<tc>, window_params = [{pipeline_mode = #tpu.pipeline_mode<synchronous>, transform_indices = @transform_0, window_bounds = array<i64: 16, 32>}, {pipeline_mode = #tpu.pipeline_mode<synchronous>, transform_indices = @transform_1, window_bounds = array<i64: 8, 8, 8>}, {pipeline_mode = #tpu.pipeline_mode<synchronous>, transform_indices = @transform_2, window_bounds = array<i64: 2, 32>}, {pipeline_mode = #tpu.pipeline_mode<synchronous>, transform_indices = @transform_3, window_bounds = array<i64: 2, 32, 96>}, {pipeline_mode = #tpu.pipeline_mode<synchronous>, transform_indices = @transform_4, window_bounds = array<i64: 2, 32, 32>}, {pipeline_mode = #tpu.pipeline_mode<synchronous>, transform_indices = @transform_5, window_bounds = array<i64: 2, 32>}, {pipeline_mode = #tpu.pipeline_mode<synchronous>, transform_indices = @transform_6, window_bounds = array<i64: 2, 32, 128>}, {pipeline_mode = #tpu.pipeline_mode<synchronous>, transform_indices = @transform_7, window_bounds = array<i64: 2, 64, 32>}, {pipeline_mode = #tpu.pipeline_mode<synchronous>, transform_indices = @transform_8, window_bounds = array<i64: 1, 32>}, {pipeline_mode = #tpu.pipeline_mode<synchronous>, transform_indices = @transform_9, window_bounds = array<i64: 16, 32>}]} {
    %c0 = arith.constant 0 : index
    %c0_0 = arith.constant 0 : index
    %0 = vector.load %arg1[%c0, %c0_0] : memref<16x32xf32, #tpu.memory_space<vmem>>, vector<16x32xf32>
    %c0_1 = arith.constant 0 : index
    %c0_2 = arith.constant 0 : index
    %c0_3 = arith.constant 0 : index
    %1 = vector.load %arg2[%c0_1, %c0_2, %c0_3] : memref<8x8x8xf32, #tpu.memory_space<vmem>>, vector<8x8x8xf32>
    %c0_4 = arith.constant 0 : index
    %c0_5 = arith.constant 0 : index
    %2 = vector.load %arg3[%c0_4, %c0_5] : memref<2x32xf32, #tpu.memory_space<vmem>>, vector<2x32xf32>
    %c0_6 = arith.constant 0 : index
    %c0_7 = arith.constant 0 : index
    %3 = vector.load %arg6[%c0_6, %c0_7] : memref<2x32xf32, #tpu.memory_space<vmem>>, vector<2x32xf32>
    %4 = vector.extract_strided_slice %2 {offsets = [0, 0], sizes = [1, 32], strides = [1, 1]} : vector<2x32xf32> to vector<1x32xf32>
    %5 = arith.mulf %0, %0 : vector<16x32xf32>
    %cst = arith.constant dense<0.000000e+00> : vector<16xf32>
    %6 = vector.multi_reduction <add>, %5, %cst [1] : vector<16x32xf32> to vector<16xf32>
    %7 = vector.shape_cast %6 : vector<16xf32> to vector<16x1xf32>
    %cst_8 = arith.constant 3.200000e+01 : f32
    %8 = vector.broadcast %cst_8 : f32 to vector<16x1xf32>
    %9 = arith.divf %7, %8 : vector<16x1xf32>
    %cst_9 = arith.constant 9.99999997E-7 : f32
    %10 = vector.broadcast %cst_9 : f32 to vector<16x1xf32>
    %11 = arith.addf %9, %10 : vector<16x1xf32>
    %12 = math.rsqrt %11 : vector<16x1xf32>
    %13 = vector.broadcast %12 : vector<16x1xf32> to vector<16x32xf32>
    %14 = arith.mulf %0, %13 : vector<16x32xf32>
    %15 = vector.broadcast %4 : vector<1x32xf32> to vector<16x32xf32>
    %16 = arith.mulf %14, %15 : vector<16x32xf32>
    %17 = arith.truncf %16 : vector<16x32xf32> to vector<16x32xbf16>
    %c0_10 = arith.constant 0 : index
    %c0_11 = arith.constant 0 : index
    %c0_12 = arith.constant 0 : index
    %18 = vector.load %arg4[%c0_10, %c0_11, %c0_12] : memref<2x32x96xbf16, #tpu.memory_space<vmem>>, vector<1x32x96xbf16>
    %19 = vector.shape_cast %18 : vector<1x32x96xbf16> to vector<32x96xbf16>
    %cst_13 = arith.constant dense<0.000000e+00> : vector<16x96xf32>
    %20 = tpu.matmul %17, %19, %cst_13 {dimension_numbers = #tpu.dot_dimension_numbers<[1], [0], [0], [1], [0, 0, 1, 1], [], []>} : vector<16x32xbf16>, vector<32x96xbf16>, vector<16x96xf32> -> vector<16x96xf32>
    %21 = vector.extract_strided_slice %20 {offsets = [0, 0], sizes = [16, 32], strides = [1, 1]} : vector<16x96xf32> to vector<16x32xf32>
    %22 = vector.shape_cast %21 : vector<16x32xf32> to vector<2x8x4x8xf32>
    %23 = tpu.transpose %22, [0, 2, 1, 3] : vector<2x8x4x8xf32> -> vector<2x4x8x8xf32>
    %24 = vector.shape_cast %23 : vector<2x4x8x8xf32> to vector<8x8x8xf32>
    %25 = arith.truncf %24 : vector<8x8x8xf32> to vector<8x8x8xbf16>
    %26 = vector.extract_strided_slice %20 {offsets = [0, 32], sizes = [16, 32], strides = [1, 1]} : vector<16x96xf32> to vector<16x32xf32>
    %27 = vector.shape_cast %26 : vector<16x32xf32> to vector<2x8x4x8xf32>
    %28 = tpu.transpose %27, [0, 2, 1, 3] : vector<2x8x4x8xf32> -> vector<2x4x8x8xf32>
    %29 = vector.shape_cast %28 : vector<2x4x8x8xf32> to vector<8x8x8xf32>
    %30 = arith.truncf %29 : vector<8x8x8xf32> to vector<8x8x8xbf16>
    %31 = vector.extract_strided_slice %20 {offsets = [0, 64], sizes = [16, 32], strides = [1, 1]} : vector<16x96xf32> to vector<16x32xf32>
    %32 = vector.shape_cast %31 : vector<16x32xf32> to vector<2x8x4x8xf32>
    %33 = tpu.transpose %32, [0, 2, 1, 3] : vector<2x8x4x8xf32> -> vector<2x4x8x8xf32>
    %34 = vector.shape_cast %33 : vector<2x4x8x8xf32> to vector<8x8x8xf32>
    %35 = arith.truncf %34 : vector<8x8x8xf32> to vector<8x8x8xbf16>
    "tpu.trace_start"() <{level = 10 : i32, message = "gqd,gkd->gqk"}> : () -> ()
    %cst_14 = arith.constant dense<0.000000e+00> : vector<8x8x8xf32>
    %36 = tpu.matmul %25, %30, %cst_14 {dimension_numbers = #tpu.dot_dimension_numbers<[2], [2], [1], [1], [0, 0, 0, 1, 1, 1], [0], [0]>} : vector<8x8x8xbf16>, vector<8x8x8xbf16>, vector<8x8x8xf32> -> vector<8x8x8xf32>
    "tpu.trace_stop"() : () -> ()
    %37 = arith.addf %36, %1 : vector<8x8x8xf32>
    %cst_15 = arith.constant dense<0xFF800000> : vector<8x8xf32>
    %38 = vector.multi_reduction <maximumf>, %37, %cst_15 [2] : vector<8x8x8xf32> to vector<8x8xf32>
    %39 = vector.shape_cast %38 : vector<8x8xf32> to vector<8x8x1xf32>
    %40 = vector.broadcast %39 : vector<8x8x1xf32> to vector<8x8x8xf32>
    %41 = arith.subf %37, %40 : vector<8x8x8xf32>
    %42 = math.exp %41 : vector<8x8x8xf32>
    %cst_16 = arith.constant dense<0.000000e+00> : vector<8x8xf32>
    %43 = vector.multi_reduction <add>, %42, %cst_16 [2] : vector<8x8x8xf32> to vector<8x8xf32>
    %44 = vector.shape_cast %43 : vector<8x8xf32> to vector<8x8x1xf32>
    %45 = tpu.reciprocal %44 {approx = true} : vector<8x8x1xf32> -> vector<8x8x1xf32>
    %46 = vector.broadcast %45 : vector<8x8x1xf32> to vector<8x8x8xf32>
    %47 = arith.mulf %42, %46 : vector<8x8x8xf32>
    %48 = arith.truncf %47 : vector<8x8x8xf32> to vector<8x8x8xbf16>
    "tpu.trace_start"() <{level = 10 : i32, message = "gqk,gkd->gqd"}> : () -> ()
    %cst_17 = arith.constant dense<0.000000e+00> : vector<8x8x8xf32>
    %49 = tpu.matmul %48, %35, %cst_17 {dimension_numbers = #tpu.dot_dimension_numbers<[2], [1], [1], [2], [0, 0, 0, 1, 1, 2], [0], [0]>} : vector<8x8x8xbf16>, vector<8x8x8xbf16>, vector<8x8x8xf32> -> vector<8x8x8xf32>
    "tpu.trace_stop"() : () -> ()
    %50 = vector.shape_cast %49 : vector<8x8x8xf32> to vector<2x4x8x8xf32>
    %51 = tpu.transpose %50, [0, 2, 1, 3] : vector<2x4x8x8xf32> -> vector<2x8x4x8xf32>
    %52 = vector.shape_cast %51 : vector<2x8x4x8xf32> to vector<16x32xf32>
    %53 = arith.truncf %52 : vector<16x32xf32> to vector<16x32xbf16>
    %c0_18 = arith.constant 0 : index
    %c0_19 = arith.constant 0 : index
    %c0_20 = arith.constant 0 : index
    %54 = vector.load %arg5[%c0_18, %c0_19, %c0_20] : memref<2x32x32xbf16, #tpu.memory_space<vmem>>, vector<1x32x32xbf16>
    %55 = vector.shape_cast %54 : vector<1x32x32xbf16> to vector<32x32xbf16>
    %cst_21 = arith.constant dense<0.000000e+00> : vector<16x32xf32>
    %56 = tpu.matmul %53, %55, %cst_21 {dimension_numbers = #tpu.dot_dimension_numbers<[1], [0], [0], [1], [0, 0, 1, 1], [], []>} : vector<16x32xbf16>, vector<32x32xbf16>, vector<16x32xf32> -> vector<16x32xf32>
    %57 = arith.addf %0, %56 : vector<16x32xf32>
    %58 = vector.extract_strided_slice %3 {offsets = [0, 0], sizes = [1, 32], strides = [1, 1]} : vector<2x32xf32> to vector<1x32xf32>
    %59 = arith.mulf %57, %57 : vector<16x32xf32>
    %cst_22 = arith.constant dense<0.000000e+00> : vector<16xf32>
    %60 = vector.multi_reduction <add>, %59, %cst_22 [1] : vector<16x32xf32> to vector<16xf32>
    %61 = vector.shape_cast %60 : vector<16xf32> to vector<16x1xf32>
    %cst_23 = arith.constant 3.200000e+01 : f32
    %62 = vector.broadcast %cst_23 : f32 to vector<16x1xf32>
    %63 = arith.divf %61, %62 : vector<16x1xf32>
    %cst_24 = arith.constant 9.99999997E-7 : f32
    %64 = vector.broadcast %cst_24 : f32 to vector<16x1xf32>
    %65 = arith.addf %63, %64 : vector<16x1xf32>
    %66 = math.rsqrt %65 : vector<16x1xf32>
    %67 = vector.broadcast %66 : vector<16x1xf32> to vector<16x32xf32>
    %68 = arith.mulf %57, %67 : vector<16x32xf32>
    %69 = vector.broadcast %58 : vector<1x32xf32> to vector<16x32xf32>
    %70 = arith.mulf %68, %69 : vector<16x32xf32>
    %71 = arith.truncf %70 : vector<16x32xf32> to vector<16x32xbf16>
    %c0_25 = arith.constant 0 : index
    %c0_26 = arith.constant 0 : index
    %c0_27 = arith.constant 0 : index
    %72 = vector.load %arg7[%c0_25, %c0_26, %c0_27] : memref<2x32x128xbf16, #tpu.memory_space<vmem>>, vector<1x32x128xbf16>
    %73 = vector.shape_cast %72 : vector<1x32x128xbf16> to vector<32x128xbf16>
    %cst_28 = arith.constant dense<0.000000e+00> : vector<16x128xf32>
    %74 = tpu.matmul %71, %73, %cst_28 {dimension_numbers = #tpu.dot_dimension_numbers<[1], [0], [0], [1], [0, 0, 1, 1], [], []>} : vector<16x32xbf16>, vector<32x128xbf16>, vector<16x128xf32> -> vector<16x128xf32>
    %75 = vector.extract_strided_slice %74 {offsets = [0, 0], sizes = [16, 64], strides = [1, 1]} : vector<16x128xf32> to vector<16x64xf32>
    %cst_29 = arith.constant 5.000000e-01 : f32
    %76 = vector.broadcast %cst_29 : f32 to vector<16x64xf32>
    %77 = arith.mulf %76, %75 : vector<16x64xf32>
    %cst_30 = arith.constant 4.471500e-02 : f32
    %78 = vector.broadcast %cst_30 : f32 to vector<16x64xf32>
    %79 = arith.mulf %78, %75 : vector<16x64xf32>
    %80 = arith.mulf %79, %75 : vector<16x64xf32>
    %81 = arith.mulf %80, %75 : vector<16x64xf32>
    %82 = arith.addf %75, %81 : vector<16x64xf32>
    %cst_31 = arith.constant 0.797884583 : f32
    %83 = vector.broadcast %cst_31 : f32 to vector<16x64xf32>
    %84 = arith.mulf %83, %82 : vector<16x64xf32>
    %85 = math.tanh %84 : vector<16x64xf32>
    %cst_32 = arith.constant 1.000000e+00 : f32
    %86 = vector.broadcast %cst_32 : f32 to vector<16x64xf32>
    %87 = arith.addf %86, %85 : vector<16x64xf32>
    %88 = arith.mulf %77, %87 : vector<16x64xf32>
    %89 = vector.extract_strided_slice %74 {offsets = [0, 64], sizes = [16, 64], strides = [1, 1]} : vector<16x128xf32> to vector<16x64xf32>
    %90 = arith.mulf %88, %89 : vector<16x64xf32>
    %91 = arith.truncf %90 : vector<16x64xf32> to vector<16x64xbf16>
    %c0_33 = arith.constant 0 : index
    %c0_34 = arith.constant 0 : index
    %c0_35 = arith.constant 0 : index
    %92 = vector.load %arg8[%c0_33, %c0_34, %c0_35] : memref<2x64x32xbf16, #tpu.memory_space<vmem>>, vector<1x64x32xbf16>
    %93 = vector.shape_cast %92 : vector<1x64x32xbf16> to vector<64x32xbf16>
    %cst_36 = arith.constant dense<0.000000e+00> : vector<16x32xf32>
    %94 = tpu.matmul %91, %93, %cst_36 {dimension_numbers = #tpu.dot_dimension_numbers<[1], [0], [0], [1], [0, 0, 1, 1], [], []>} : vector<16x64xbf16>, vector<64x32xbf16>, vector<16x32xf32> -> vector<16x32xf32>
    %95 = arith.addf %57, %94 : vector<16x32xf32>
    %96 = vector.extract_strided_slice %2 {offsets = [1, 0], sizes = [1, 32], strides = [1, 1]} : vector<2x32xf32> to vector<1x32xf32>
    %97 = arith.mulf %95, %95 : vector<16x32xf32>
    %cst_37 = arith.constant dense<0.000000e+00> : vector<16xf32>
    %98 = vector.multi_reduction <add>, %97, %cst_37 [1] : vector<16x32xf32> to vector<16xf32>
    %99 = vector.shape_cast %98 : vector<16xf32> to vector<16x1xf32>
    %cst_38 = arith.constant 3.200000e+01 : f32
    %100 = vector.broadcast %cst_38 : f32 to vector<16x1xf32>
    %101 = arith.divf %99, %100 : vector<16x1xf32>
    %cst_39 = arith.constant 9.99999997E-7 : f32
    %102 = vector.broadcast %cst_39 : f32 to vector<16x1xf32>
    %103 = arith.addf %101, %102 : vector<16x1xf32>
    %104 = math.rsqrt %103 : vector<16x1xf32>
    %105 = vector.broadcast %104 : vector<16x1xf32> to vector<16x32xf32>
    %106 = arith.mulf %95, %105 : vector<16x32xf32>
    %107 = vector.broadcast %96 : vector<1x32xf32> to vector<16x32xf32>
    %108 = arith.mulf %106, %107 : vector<16x32xf32>
    %109 = arith.truncf %108 : vector<16x32xf32> to vector<16x32xbf16>
    %c1 = arith.constant 1 : index
    %c0_40 = arith.constant 0 : index
    %c0_41 = arith.constant 0 : index
    %110 = vector.load %arg4[%c1, %c0_40, %c0_41] : memref<2x32x96xbf16, #tpu.memory_space<vmem>>, vector<1x32x96xbf16>
    %111 = vector.shape_cast %110 : vector<1x32x96xbf16> to vector<32x96xbf16>
    %cst_42 = arith.constant dense<0.000000e+00> : vector<16x96xf32>
    %112 = tpu.matmul %109, %111, %cst_42 {dimension_numbers = #tpu.dot_dimension_numbers<[1], [0], [0], [1], [0, 0, 1, 1], [], []>} : vector<16x32xbf16>, vector<32x96xbf16>, vector<16x96xf32> -> vector<16x96xf32>
    %113 = vector.extract_strided_slice %112 {offsets = [0, 0], sizes = [16, 32], strides = [1, 1]} : vector<16x96xf32> to vector<16x32xf32>
    %114 = vector.shape_cast %113 : vector<16x32xf32> to vector<2x8x4x8xf32>
    %115 = tpu.transpose %114, [0, 2, 1, 3] : vector<2x8x4x8xf32> -> vector<2x4x8x8xf32>
    %116 = vector.shape_cast %115 : vector<2x4x8x8xf32> to vector<8x8x8xf32>
    %117 = arith.truncf %116 : vector<8x8x8xf32> to vector<8x8x8xbf16>
    %118 = vector.extract_strided_slice %112 {offsets = [0, 32], sizes = [16, 32], strides = [1, 1]} : vector<16x96xf32> to vector<16x32xf32>
    %119 = vector.shape_cast %118 : vector<16x32xf32> to vector<2x8x4x8xf32>
    %120 = tpu.transpose %119, [0, 2, 1, 3] : vector<2x8x4x8xf32> -> vector<2x4x8x8xf32>
    %121 = vector.shape_cast %120 : vector<2x4x8x8xf32> to vector<8x8x8xf32>
    %122 = arith.truncf %121 : vector<8x8x8xf32> to vector<8x8x8xbf16>
    %123 = vector.extract_strided_slice %112 {offsets = [0, 64], sizes = [16, 32], strides = [1, 1]} : vector<16x96xf32> to vector<16x32xf32>
    %124 = vector.shape_cast %123 : vector<16x32xf32> to vector<2x8x4x8xf32>
    %125 = tpu.transpose %124, [0, 2, 1, 3] : vector<2x8x4x8xf32> -> vector<2x4x8x8xf32>
    %126 = vector.shape_cast %125 : vector<2x4x8x8xf32> to vector<8x8x8xf32>
    %127 = arith.truncf %126 : vector<8x8x8xf32> to vector<8x8x8xbf16>
    "tpu.trace_start"() <{level = 10 : i32, message = "gqd,gkd->gqk"}> : () -> ()
    %cst_43 = arith.constant dense<0.000000e+00> : vector<8x8x8xf32>
    %128 = tpu.matmul %117, %122, %cst_43 {dimension_numbers = #tpu.dot_dimension_numbers<[2], [2], [1], [1], [0, 0, 0, 1, 1, 1], [0], [0]>} : vector<8x8x8xbf16>, vector<8x8x8xbf16>, vector<8x8x8xf32> -> vector<8x8x8xf32>
    "tpu.trace_stop"() : () -> ()
    %129 = arith.addf %128, %1 : vector<8x8x8xf32>
    %cst_44 = arith.constant dense<0xFF800000> : vector<8x8xf32>
    %130 = vector.multi_reduction <maximumf>, %129, %cst_44 [2] : vector<8x8x8xf32> to vector<8x8xf32>
    %131 = vector.shape_cast %130 : vector<8x8xf32> to vector<8x8x1xf32>
    %132 = vector.broadcast %131 : vector<8x8x1xf32> to vector<8x8x8xf32>
    %133 = arith.subf %129, %132 : vector<8x8x8xf32>
    %134 = math.exp %133 : vector<8x8x8xf32>
    %cst_45 = arith.constant dense<0.000000e+00> : vector<8x8xf32>
    %135 = vector.multi_reduction <add>, %134, %cst_45 [2] : vector<8x8x8xf32> to vector<8x8xf32>
    %136 = vector.shape_cast %135 : vector<8x8xf32> to vector<8x8x1xf32>
    %137 = tpu.reciprocal %136 {approx = true} : vector<8x8x1xf32> -> vector<8x8x1xf32>
    %138 = vector.broadcast %137 : vector<8x8x1xf32> to vector<8x8x8xf32>
    %139 = arith.mulf %134, %138 : vector<8x8x8xf32>
    %140 = arith.truncf %139 : vector<8x8x8xf32> to vector<8x8x8xbf16>
    "tpu.trace_start"() <{level = 10 : i32, message = "gqk,gkd->gqd"}> : () -> ()
    %cst_46 = arith.constant dense<0.000000e+00> : vector<8x8x8xf32>
    %141 = tpu.matmul %140, %127, %cst_46 {dimension_numbers = #tpu.dot_dimension_numbers<[2], [1], [1], [2], [0, 0, 0, 1, 1, 2], [0], [0]>} : vector<8x8x8xbf16>, vector<8x8x8xbf16>, vector<8x8x8xf32> -> vector<8x8x8xf32>
    "tpu.trace_stop"() : () -> ()
    %142 = vector.shape_cast %141 : vector<8x8x8xf32> to vector<2x4x8x8xf32>
    %143 = tpu.transpose %142, [0, 2, 1, 3] : vector<2x4x8x8xf32> -> vector<2x8x4x8xf32>
    %144 = vector.shape_cast %143 : vector<2x8x4x8xf32> to vector<16x32xf32>
    %145 = arith.truncf %144 : vector<16x32xf32> to vector<16x32xbf16>
    %c1_47 = arith.constant 1 : index
    %c0_48 = arith.constant 0 : index
    %c0_49 = arith.constant 0 : index
    %146 = vector.load %arg5[%c1_47, %c0_48, %c0_49] : memref<2x32x32xbf16, #tpu.memory_space<vmem>>, vector<1x32x32xbf16>
    %147 = vector.shape_cast %146 : vector<1x32x32xbf16> to vector<32x32xbf16>
    %cst_50 = arith.constant dense<0.000000e+00> : vector<16x32xf32>
    %148 = tpu.matmul %145, %147, %cst_50 {dimension_numbers = #tpu.dot_dimension_numbers<[1], [0], [0], [1], [0, 0, 1, 1], [], []>} : vector<16x32xbf16>, vector<32x32xbf16>, vector<16x32xf32> -> vector<16x32xf32>
    %149 = arith.addf %95, %148 : vector<16x32xf32>
    %150 = vector.extract_strided_slice %3 {offsets = [1, 0], sizes = [1, 32], strides = [1, 1]} : vector<2x32xf32> to vector<1x32xf32>
    %151 = arith.mulf %149, %149 : vector<16x32xf32>
    %cst_51 = arith.constant dense<0.000000e+00> : vector<16xf32>
    %152 = vector.multi_reduction <add>, %151, %cst_51 [1] : vector<16x32xf32> to vector<16xf32>
    %153 = vector.shape_cast %152 : vector<16xf32> to vector<16x1xf32>
    %cst_52 = arith.constant 3.200000e+01 : f32
    %154 = vector.broadcast %cst_52 : f32 to vector<16x1xf32>
    %155 = arith.divf %153, %154 : vector<16x1xf32>
    %cst_53 = arith.constant 9.99999997E-7 : f32
    %156 = vector.broadcast %cst_53 : f32 to vector<16x1xf32>
    %157 = arith.addf %155, %156 : vector<16x1xf32>
    %158 = math.rsqrt %157 : vector<16x1xf32>
    %159 = vector.broadcast %158 : vector<16x1xf32> to vector<16x32xf32>
    %160 = arith.mulf %149, %159 : vector<16x32xf32>
    %161 = vector.broadcast %150 : vector<1x32xf32> to vector<16x32xf32>
    %162 = arith.mulf %160, %161 : vector<16x32xf32>
    %163 = arith.truncf %162 : vector<16x32xf32> to vector<16x32xbf16>
    %c1_54 = arith.constant 1 : index
    %c0_55 = arith.constant 0 : index
    %c0_56 = arith.constant 0 : index
    %164 = vector.load %arg7[%c1_54, %c0_55, %c0_56] : memref<2x32x128xbf16, #tpu.memory_space<vmem>>, vector<1x32x128xbf16>
    %165 = vector.shape_cast %164 : vector<1x32x128xbf16> to vector<32x128xbf16>
    %cst_57 = arith.constant dense<0.000000e+00> : vector<16x128xf32>
    %166 = tpu.matmul %163, %165, %cst_57 {dimension_numbers = #tpu.dot_dimension_numbers<[1], [0], [0], [1], [0, 0, 1, 1], [], []>} : vector<16x32xbf16>, vector<32x128xbf16>, vector<16x128xf32> -> vector<16x128xf32>
    %167 = vector.extract_strided_slice %166 {offsets = [0, 0], sizes = [16, 64], strides = [1, 1]} : vector<16x128xf32> to vector<16x64xf32>
    %cst_58 = arith.constant 5.000000e-01 : f32
    %168 = vector.broadcast %cst_58 : f32 to vector<16x64xf32>
    %169 = arith.mulf %168, %167 : vector<16x64xf32>
    %cst_59 = arith.constant 4.471500e-02 : f32
    %170 = vector.broadcast %cst_59 : f32 to vector<16x64xf32>
    %171 = arith.mulf %170, %167 : vector<16x64xf32>
    %172 = arith.mulf %171, %167 : vector<16x64xf32>
    %173 = arith.mulf %172, %167 : vector<16x64xf32>
    %174 = arith.addf %167, %173 : vector<16x64xf32>
    %cst_60 = arith.constant 0.797884583 : f32
    %175 = vector.broadcast %cst_60 : f32 to vector<16x64xf32>
    %176 = arith.mulf %175, %174 : vector<16x64xf32>
    %177 = math.tanh %176 : vector<16x64xf32>
    %cst_61 = arith.constant 1.000000e+00 : f32
    %178 = vector.broadcast %cst_61 : f32 to vector<16x64xf32>
    %179 = arith.addf %178, %177 : vector<16x64xf32>
    %180 = arith.mulf %169, %179 : vector<16x64xf32>
    %181 = vector.extract_strided_slice %166 {offsets = [0, 64], sizes = [16, 64], strides = [1, 1]} : vector<16x128xf32> to vector<16x64xf32>
    %182 = arith.mulf %180, %181 : vector<16x64xf32>
    %183 = arith.truncf %182 : vector<16x64xf32> to vector<16x64xbf16>
    %c1_62 = arith.constant 1 : index
    %c0_63 = arith.constant 0 : index
    %c0_64 = arith.constant 0 : index
    %184 = vector.load %arg8[%c1_62, %c0_63, %c0_64] : memref<2x64x32xbf16, #tpu.memory_space<vmem>>, vector<1x64x32xbf16>
    %185 = vector.shape_cast %184 : vector<1x64x32xbf16> to vector<64x32xbf16>
    %cst_65 = arith.constant dense<0.000000e+00> : vector<16x32xf32>
    %186 = tpu.matmul %183, %185, %cst_65 {dimension_numbers = #tpu.dot_dimension_numbers<[1], [0], [0], [1], [0, 0, 1, 1], [], []>} : vector<16x64xbf16>, vector<64x32xbf16>, vector<16x32xf32> -> vector<16x32xf32>
    %187 = arith.addf %149, %186 : vector<16x32xf32>
    %c0_66 = arith.constant 0 : index
    %c0_67 = arith.constant 0 : index
    %188 = vector.load %arg9[%c0_66, %c0_67] : memref<1x32xf32, #tpu.memory_space<vmem>>, vector<1x32xf32>
    %189 = arith.mulf %187, %187 : vector<16x32xf32>
    %cst_68 = arith.constant dense<0.000000e+00> : vector<16xf32>
    %190 = vector.multi_reduction <add>, %189, %cst_68 [1] : vector<16x32xf32> to vector<16xf32>
    %191 = vector.shape_cast %190 : vector<16xf32> to vector<16x1xf32>
    %cst_69 = arith.constant 3.200000e+01 : f32
    %192 = vector.broadcast %cst_69 : f32 to vector<16x1xf32>
    %193 = arith.divf %191, %192 : vector<16x1xf32>
    %cst_70 = arith.constant 9.99999997E-7 : f32
    %194 = vector.broadcast %cst_70 : f32 to vector<16x1xf32>
    %195 = arith.addf %193, %194 : vector<16x1xf32>
    %196 = math.rsqrt %195 : vector<16x1xf32>
    %197 = vector.broadcast %196 : vector<16x1xf32> to vector<16x32xf32>
    %198 = arith.mulf %187, %197 : vector<16x32xf32>
    %199 = vector.broadcast %188 : vector<1x32xf32> to vector<16x32xf32>
    %200 = arith.mulf %198, %199 : vector<16x32xf32>
    %c0_71 = arith.constant 0 : index
    %c0_72 = arith.constant 0 : index
    %201 = vector.load %arg10[%c0_71, %c0_72] : memref<16x32xf32, #tpu.memory_space<vmem>>, vector<16x32xf32>
    tpu.vector_store %arg10[%c0_71, %c0_72], %200 {strides = array<i32>} : memref<16x32xf32, #tpu.memory_space<vmem>>, vector<16x32xf32>,
    return
  }
  func.func @transform_0(%arg0: i32) -> (i32, i32) {
    %c0_i32 = arith.constant 0 : i32
    %c0_i32_0 = arith.constant 0 : i32
    %c0_i32_1 = arith.constant 0 : i32
    return %c0_i32, %c0_i32_0 : i32, i32
  }
  func.func @transform_1(%arg0: i32) -> (i32, i32, i32) {
    %c0_i32 = arith.constant 0 : i32
    %c0_i32_0 = arith.constant 0 : i32
    %c0_i32_1 = arith.constant 0 : i32
    %c0_i32_2 = arith.constant 0 : i32
    return %c0_i32, %c0_i32_0, %c0_i32_1 : i32, i32, i32
  }
  func.func @transform_2(%arg0: i32) -> (i32, i32) {
    %c0_i32 = arith.constant 0 : i32
    %c0_i32_0 = arith.constant 0 : i32
    %c0_i32_1 = arith.constant 0 : i32
    return %c0_i32, %c0_i32_0 : i32, i32
  }
  func.func @transform_3(%arg0: i32) -> (i32, i32, i32) {
    %c0_i32 = arith.constant 0 : i32
    %c0_i32_0 = arith.constant 0 : i32
    %c0_i32_1 = arith.constant 0 : i32
    %c0_i32_2 = arith.constant 0 : i32
    return %c0_i32, %c0_i32_0, %c0_i32_1 : i32, i32, i32
  }
  func.func @transform_4(%arg0: i32) -> (i32, i32, i32) {
    %c0_i32 = arith.constant 0 : i32
    %c0_i32_0 = arith.constant 0 : i32
    %c0_i32_1 = arith.constant 0 : i32
    %c0_i32_2 = arith.constant 0 : i32
    return %c0_i32, %c0_i32_0, %c0_i32_1 : i32, i32, i32
  }
  func.func @transform_5(%arg0: i32) -> (i32, i32) {
    %c0_i32 = arith.constant 0 : i32
    %c0_i32_0 = arith.constant 0 : i32
    %c0_i32_1 = arith.constant 0 : i32
    return %c0_i32, %c0_i32_0 : i32, i32
  }
  func.func @transform_6(%arg0: i32) -> (i32, i32, i32) {
    %c0_i32 = arith.constant 0 : i32
    %c0_i32_0 = arith.constant 0 : i32
    %c0_i32_1 = arith.constant 0 : i32
    %c0_i32_2 = arith.constant 0 : i32
    return %c0_i32, %c0_i32_0, %c0_i32_1 : i32, i32, i32
  }
  func.func @transform_7(%arg0: i32) -> (i32, i32, i32) {
    %c0_i32 = arith.constant 0 : i32
    %c0_i32_0 = arith.constant 0 : i32
    %c0_i32_1 = arith.constant 0 : i32
    %c0_i32_2 = arith.constant 0 : i32
    return %c0_i32, %c0_i32_0, %c0_i32_1 : i32, i32, i32
  }
  func.func @transform_8(%arg0: i32) -> (i32, i32) {
    %c0_i32 = arith.constant 0 : i32
    %c0_i32_0 = arith.constant 0 : i32
    %c0_i32_1 = arith.constant 0 : i32
    return %c0_i32, %c0_i32_0 : i32, i32
  }
  func.func @transform_9(%arg0: i32) -> (i32, i32) {
    %c0_i32 = arith.constant 0 : i32
    %c0_i32_0 = arith.constant 0 : i32
    %c0_i32_1 = arith.constant 0 : i32
    return %c0_i32, %c0_i32_0 : i32, i32
  }
}

</mosaic_0001>

<bundles_post_ra>
// kernel: t5_encoder_forward.1
= control target key start
LH: loop header
LB: loop body
LE: loop exit
PB: predicated region body
PF: predicated region fallthrough
CT: control target
= control target key end

     0   :  { %vm48_vm0 = vcmask 261120   ;;  %s5127_s0 = inlined_call_operand.vmem [shape: f32[16,32], index: 0, kind: input, shape index: {}]   ;;  %s5128_s1 = inlined_call_operand.vmem [shape: f32[8,8,8], index: 1, kind: input, shape index: {}]   ;;  %s5129_s2 = inlined_call_operand.vmem [shape: f32[2,32], index: 2, kind: input, shape index: {}]   ;;  %s5130_s3 = inlined_call_operand.vmem [shape: bf16[2,32,96], index: 3, kind: input, shape index: {}]   ;;  %s5131_s4 = inlined_call_operand.vmem [shape: bf16[2,32,32], index: 4, kind: input, shape index: {}]   ;;  %s5132_s5 = inlined_call_operand.vmem [shape: f32[2,32], index: 5, kind: input, shape index: {}]   ;;  %s5133_s6 = inlined_call_operand.vmem [shape: bf16[2,32,128], index: 6, kind: input, shape index: {}]   ;;  %s5134_s7 = inlined_call_operand.vmem [shape: bf16[2,64,32], index: 7, kind: input, shape index: {}]   ;;  %s5135_s8 = inlined_call_operand.vmem [shape: f32[1,32], index: 8, kind: input, shape index: {}]   ;;  %s5136_s9 = inlined_call_operand.hbm [shape: f32[16,32], index: 9, kind: output, shape index: {}]  }
   0x1   :  { %v34_v0 = vld [vmem:[%s5127_s0] sm:$0xff] }
   0x2   :  { %v46_v1 = vmul.f32 %v34_v0, %v34_v0 }
   0x3   :  { %14 = vsyncpa [#allocation3], 0  ;;  %v35_v2 = vld [vmem:[%s5127_s0 + $0x8] sm:$0xff]  ;;  %v3860_v6 = vmov 32.0   ;;  %v3584_v14 = vld [vmem:[%s5130_s3] sm:$0xff]  ;;  %s3861_s19 = smov 104  }
   0x4   :  { %v49_v3 = vsel %vm48_vm0, %v46_v1, 0.0  ;;  %v47_v4 = vmul.f32 %v35_v2, %v35_v2  ;;  %3728 = vrcp.f32 %v3860_v6  ;;  %v3585_v12 = vld [vmem:[%s5130_s3 + $0x8] sm:$0xff]  ;;  %v44_v33 = vld [vmem:[%s5129_s2] sm:$0x3]  ;;  %s3862_s20 = smov 120   ;;  %s3863_s21 = smov 112  }
   0x5   :  { %50 = vadd.xlane.f32.xlu0 %v49_v3  ;;  %117 = vmatpush.bf16.msra.mxu0 %v3585_v12  ;;  %v88_v36 = vperm.slane %v44_v33, 0  ;;  %vm146_vm8 = vcmask 1047556   ;;  %v3864_v46 = vmov 1983009808   ;;  %s3865_s22 = smov 96   ;;  %s3867_s23 = smov 64  }
   0x6   :  { %v52_v5 = vsel %vm48_vm0, %v47_v4, 0.0  ;;  %v151_v47 = vunpack.c.l.s4 %v3864_v46  ;;  %v3866_v54 = vmov 1934713408   ;;  %vm878_vm9 = vcmask 64512   ;;  %s3868_s24 = smov 16   ;;  %s3869_s25 = smov 24  }
   0x7   :  { %v175_v55 = vunpack.c.l.s4 %v3866_v54  ;;  %vm1130_vm10 = vcmask 1043456   ;;  %s3870_s26 = smov 8   ;;  %vm1526_vm11 = vcmask 130048   ;;  %vm1529_vm12 = vcmask 195584   ;;  %s3432_s10 = sshll.u32 %s5136_s9, 4  ;;  %s3433_s10 = int_to_ptr.hbm [resolvable:$true] %s3432_s10 }
   0x8   :  { %v3959_v53 = vunpack.c.0.s8 %v151_v47  ;;  %s3871_s11 = smov [#allocation2]   ;;  %s3872_s12 = smov 128  }
   0x9   :  { %118 = vmatpush.bf16.msra.mxu0 %v3584_v14  ;;  %v3965_v61 = vunpack.c.0.s8 %v175_v55 }
   0xa   :  { %v3729_v7 = vpop.eup %3728 }
   0xb   :  { %v56_v8 = vmul.f32 32.0, %v3729_v7  ;;  %vm60_vm1 = vweird.f32 %v3729_v7 }
   0xd   :  { %53 = vadd.xlane.f32.xlu0 %v52_v5  ;;  %v57_v9 = vsub.f32 1.0, %v56_v8 }
   0xf   :  { %v58_v10 = vmul.f32 %v3729_v7, %v57_v9 }
  0x11   :  { %v59_v11 = vadd.f32 %v3729_v7, %v58_v10 }
  0x13   :  { %v3934_v13 = vsel %vm60_vm1, %v3729_v7, %v59_v11 }
  0x78   :  { %v51_v15 = vpop.xlane.xlu0 %50 }
  0x79   :  { %v62_v16 = vmul.f32 %v3934_v13, %v51_v15 }
  0x7b   :  { %v64_v17 = vadd.f32 1e-06, %v62_v16 }
  0x7d   :  { %3730 = vrsqrt.f32 %v64_v17  ;;  %vm72_vm3 = vweird.f32 %v64_v17 }
  0x80   :  { %v54_v18 = vpop.xlane.xlu0 %53 }
  0x81   :  { %v63_v19 = vmul.f32 %v3934_v13, %v54_v18 }
  0x83   :  { %v3731_v20 = vpop.eup %3730  ;;  %v65_v21 = vadd.f32 1e-06, %v63_v19 }
  0x84   :  { %v67_v22 = vmul.f32 %v3731_v20, %v64_v17  ;;  %vm73_vm2 = vweird.f32 %v3731_v20 }
  0x85   :  { %3732 = vrsqrt.f32 %v65_v21  ;;  %vm74_vm4 = vmor %vm72_vm3, %vm73_vm2  ;;  %vm82_vm6 = vweird.f32 %v65_v21 }
  0x86   :  { %v68_v23 = vmul.f32 %v3731_v20, %v67_v22 }
  0x88   :  { %v69_v24 = vmul.f32 0.5, %v68_v23 }
  0x8a   :  { %v70_v25 = vsub.f32 1.5, %v69_v24 }
  0x8b   :  { %v3733_v26 = vpop.eup %3732 }
  0x8c   :  { %v77_v27 = vmul.f32 %v3733_v26, %v65_v21  ;;  %v71_v28 = vmul.f32 %v3731_v20, %v70_v25  ;;  %vm83_vm5 = vweird.f32 %v3733_v26 }
  0x8d   :  { %vm84_vm7 = vmor %vm82_vm6, %vm83_vm5 }
  0x8e   :  { %v78_v29 = vmul.f32 %v3733_v26, %v77_v27  ;;  %v75_v31 = vsel %vm74_vm4, %v3731_v20, %v71_v28  ;;  %vm1700_vm4 = vcmask 523264  }
  0x8f   :  { %v86_v35 = vmul.f32 %v75_v31, %v34_v0 }
  0x90   :  { %v79_v30 = vmul.f32 0.5, %v78_v29 }
  0x91   :  { %v89_v39 = vmul.f32 %v88_v36, %v86_v35 }
  0x92   :  { %v80_v32 = vsub.f32 1.5, %v79_v30 }
  0x94   :  { %v81_v34 = vmul.f32 %v3733_v26, %v80_v32 }
  0x96   :  { %v85_v37 = vsel %vm84_vm7, %v3733_v26, %v81_v34 }
  0x97   :  { %v87_v38 = vmul.f32 %v85_v37, %v35_v2 }
  0x99   :  { %v90_v40 = vmul.f32 %v88_v36, %v87_v38 }
  0x9b   :  { %v91_v41 = vpack.c.bf16 %v90_v40, %v89_v39 }
  0x9d   :  { %3452 = vmatmul.msk.bf16.vlgmr.msra.gmra.mxu0 %vm48_vm0, %v91_v41 }
 0x11a   :  { %v120_v42 = vpop.f32.mrf.mxu0 }
 0x11b   :  { %139 = vrot.lane.b32.xlu2 %v120_v42, %s3861_s19  ;;  %127 = vrot.lane.b32.xlu1 %v120_v42, %s3862_s20  ;;  %v148_v58 = vrot.slane %v120_v42, 4 }
 0x122   :  { %v3947_v43 = vpop.f32.mrf.mxu0 }
 0x123   :  { %133 = vrot.lane.b32.xlu1 %v120_v42, %s3863_s21  ;;  %135 = vrot.lane.b32.xlu0 %v3947_v43, %s3863_s21 }
 0x124   :  { %129 = vrot.lane.b32.xlu2 %v3947_v43, %s3862_s20 }
 0x12b   :  { %141 = vrot.lane.b32.xlu1 %v3947_v43, %s3861_s19 }
 0x175   :  { %v140_v44 = vpop.permute.xlu2 %139 }
 0x176   :  { %v158_v45 = vrot.slane %v140_v44, 4 }
 0x17e   :  { %v3961_v56 = vpop.permute.xlu2 %129 }
 0x17f   :  { %v3970_v0 = vpack.i.bf16 %v3961_v56, %v3947_v43 }
 0x18d   :  { %v128_v48 = vpop.permute.xlu1 %127 }
 0x18e   :  { %v159_v49 = vsel %vm146_vm8, %v158_v45, %v128_v48  ;;  %v160_v50 = vrot.slane %v128_v48, 4  ;;  %v3617_v51 = vpack.i.bf16 %v128_v48, %v120_v42 }
 0x18f   :  { %v165_v59 = vperm.slane %v159_v49, %v3959_v53 }
 0x190   :  { %v161_v52 = vsel %vm146_vm8, %v140_v44, %v160_v50  ;;  %3618 = vrot.lane.b32.xlu2 %v3617_v51, %s3865_s22 }
 0x191   :  { %v169_v57 = vperm.slane %v161_v52, %v3959_v53  ;;  %v170_v5 = vrot.slane %v165_v59, 4 }
 0x193   :  { %v182_v1 = vrot.slane %v169_v57, 4 }
 0x195   :  { %v134_v60 = vpop.permute.xlu1 %133  ;;  %v136_v21 = vpop.permute.xlu0 %135 }
 0x196   :  { %v145_v62 = vrot.slane %v134_v60, 4  ;;  %v149_v63 = vsel %vm146_vm8, %v134_v60, %v148_v58  ;;  %v3973_v3 = vpack.i.bf16 %v140_v44, %v134_v60 }
 0x197   :  { %v157_v2 = vperm.slane %v149_v63, %v3959_v53  ;;  %v202_v63 = vrot.slane %v136_v21, 4 }
 0x198   :  { %v147_v4 = vsel %vm146_vm8, %v145_v62, %v120_v42  ;;  %3628 = vrot.lane.b32.xlu2 %v3970_v0, %s3865_s22  ;;  %3623 = vrot.lane.b32.xlu1 %v3973_v3, %s3865_s22 }
 0x199   :  { %v153_v6 = vperm.slane %v147_v4, %v3959_v53  ;;  %v183_v7 = vsel %vm146_vm8, %v182_v1, %v157_v2  ;;  %v184_v8 = vrot.slane %v157_v2, 4  ;;  %v204_v1 = vrot.slane %v3947_v43, 4 }
 0x19a   :  { %v189_v9 = vperm.slane %v183_v7, %v3965_v61  ;;  %v216_v4 = vrot.slane %v3961_v56, 4 }
 0x19b   :  { %v171_v10 = vsel %vm146_vm8, %v170_v5, %v153_v6  ;;  %v172_v11 = vrot.slane %v153_v6, 4  ;;  %v185_v12 = vsel %vm146_vm8, %v169_v57, %v184_v8  ;;  %v205_v5 = vsel %vm146_vm8, %v136_v21, %v204_v1 }
 0x19c   :  { %v177_v14 = vperm.slane %v171_v10, %v3965_v61  ;;  %v193_v15 = vperm.slane %v185_v12, %v3965_v61  ;;  %v198_v19 = vrot.slane %v189_v9, 4  ;;  %v203_v6 = vsel %vm146_vm8, %v202_v63, %v3947_v43 }
 0x19d   :  { %v173_v16 = vsel %vm146_vm8, %v165_v59, %v172_v11  ;;  %v142_v17 = vpop.permute.xlu1 %141  ;;  %v213_v8 = vperm.slane %v205_v5, %v3959_v53  ;;  %v209_v10 = vperm.slane %v203_v6, %v3959_v53 }
 0x19e   :  { %v181_v18 = vperm.slane %v173_v16, %v3965_v61  ;;  %v200_v20 = vrot.slane %v193_v15, 4  ;;  %v3989_v22 = vpack.i.bf16 %v142_v17, %v136_v21  ;;  %v194_v23 = vrot.slane %v177_v14, 4 }
 0x19f   :  { %v199_v28 = vsel %vm146_vm8, 0.0, %v198_v19  ;;  %v214_v2 = vrot.slane %v142_v17, 4  ;;  %v217_v7 = vsel %vm146_vm8, %v142_v17, %v216_v4  ;;  %v228_v15 = vrot.slane %v209_v10, 4 }
 0x1a0   :  { %v196_v24 = vrot.slane %v181_v18, 4  ;;  %v201_v25 = vsel %vm146_vm8, 0.0, %v200_v20  ;;  %v269_v26 = vsel %vm146_vm8, %v200_v20, %v189_v9  ;;  %3638 = vrot.lane.b32.xlu2 %v3617_v51, %s3867_s23  ;;  %3633 = vrot.lane.b32.xlu1 %v3989_v22, %s3865_s22  ;;  %v195_v34 = vsel %vm146_vm8, 0.0, %v194_v23 }
 0x1a1   :  { %v274_v27 = vrot.slane %v201_v25, 4  ;;  %v273_v33 = vperm.slane %v269_v26, %v3959_v53  ;;  %v215_v9 = vsel %vm146_vm8, %v214_v2, %v3961_v56  ;;  %v225_v11 = vperm.slane %v217_v7, %v3959_v53 }
 0x1a2   :  { %v197_v29 = vsel %vm146_vm8, 0.0, %v196_v24  ;;  %v258_v30 = vsel %vm146_vm8, %v196_v24, %v177_v14  ;;  %v221_v12 = vperm.slane %v215_v9, %v3959_v53  ;;  %v240_v14 = vrot.slane %v213_v8, 4 }
 0x1a3   :  { %v263_v31 = vrot.slane %v197_v29, 4  ;;  %v275_v32 = vsel %vm146_vm8, %v274_v27, %v199_v28  ;;  %v262_v35 = vperm.slane %v258_v30, %v3959_v53  ;;  %v294_v41 = vrot.slane %v273_v33, 4 }
 0x1a4   :  { %v279_v38 = vperm.slane %v275_v32, %v3959_v53  ;;  %v238_v16 = vrot.slane %v225_v11, 4  ;;  %v241_v18 = vsel %vm146_vm8, %v225_v11, %v240_v14  ;;  %v226_v19 = vrot.slane %v221_v12, 4 }
 0x1a5   :  { %v264_v36 = vsel %vm146_vm8, %v263_v31, %v195_v34  ;;  %v282_v39 = vrot.slane %v262_v35, 4  ;;  %v229_v43 = vsel %vm146_vm8, %v221_v12, %v228_v15  ;;  %v249_v17 = vperm.slane %v241_v18, %v3965_v61 }
 0x1a6   :  { %v268_v37 = vperm.slane %v264_v36, %v3959_v53  ;;  %v295_v44 = vsel %vm146_vm8, %v279_v38, %v294_v41  ;;  %v292_v47 = vrot.slane %v279_v38, 4  ;;  %v239_v20 = vsel %vm146_vm8, %v238_v16, %v213_v8 }
 0x1a7   :  { %v303_v45 = vperm.slane %v295_v44, %v3965_v61  ;;  %v227_v56 = vsel %vm146_vm8, %v226_v19, %v209_v10  ;;  %v237_v21 = vperm.slane %v229_v43, %v3965_v61  ;;  %v245_v23 = vperm.slane %v239_v20, %v3965_v61 }
 0x1a8   :  { %v283_v40 = vsel %vm146_vm8, %v268_v37, %v282_v39  ;;  %v280_v46 = vrot.slane %v268_v37, 4  ;;  %v293_v51 = vsel %vm146_vm8, %v292_v47, %v273_v33  ;;  %v256_v24 = vrot.slane %v249_v17, 4 }
 0x1a9   :  { %v291_v42 = vperm.slane %v283_v40, %v3965_v61  ;;  %v308_v49 = vrot.slane %v303_v45, 4  ;;  %v299_v54 = vperm.slane %v293_v51, %v3965_v61  ;;  %v233_v25 = vperm.slane %v227_v56, %v3965_v61 }
 0x1aa   :  { %v281_v50 = vsel %vm146_vm8, %v280_v46, %v262_v35  ;;  %v252_v27 = vrot.slane %v237_v21, 4  ;;  %v254_v28 = vrot.slane %v245_v23, 4  ;;  %v257_v29 = vsel %vm146_vm8, 0.0, %v256_v24 }
 0x1ab   :  { %v310_v48 = vrot.slane %v291_v42, 4  ;;  %v287_v52 = vperm.slane %v281_v50, %v3965_v61  ;;  %v4018_v57 = vsel %vm146_vm8, %v308_v49, %v291_v42  ;;  %v304_v58 = vrot.slane %v299_v54, 4 }
 0x1ac   :  { %v250_v30 = vrot.slane %v233_v25, 4  ;;  %v253_v31 = vsel %vm146_vm8, 0.0, %v252_v27  ;;  %v328_v34 = vrot.slane %v257_v29, 4  ;;  %v255_v35 = vsel %vm146_vm8, 0.0, %v254_v28 }
 0x1ad   :  { %v4015_v55 = vsel %vm146_vm8, %v303_v45, %v310_v48  ;;  %v306_v59 = vrot.slane %v287_v52, 4  ;;  %v4021_v60 = vsel %vm146_vm8, %v304_v58, %v287_v52  ;;  %v317_v36 = vrot.slane %v253_v31, 4 }
 0x1ae   :  { %v251_v38 = vsel %vm146_vm8, 0.0, %v250_v30  ;;  %v323_v44 = vsel %vm146_vm8, %v256_v24, %v245_v23  ;;  %v329_v45 = vsel %vm146_vm8, %v328_v34, %v255_v35 }
 0x1af   :  { %v4024_v62 = vsel %vm146_vm8, %v299_v54, %v306_v59  ;;  %v312_v54 = vsel %vm146_vm8, %v252_v27, %v233_v25  ;;  %v318_v58 = vsel %vm146_vm8, %v317_v36, %v251_v38  ;;  %v4063_v8 = vperm.slane %v323_v44, %v3959_v53 }
 0x1b0   :  { %v4066_v9 = vperm.slane %v312_v54, %v3959_v53  ;;  %v4069_v10 = vperm.slane %v318_v58, %v3959_v53  ;;  %v4072_v11 = vperm.slane %v329_v45, %v3959_v53 }
 0x1ea   :  { %v3619_v26 = vpop.permute.xlu2 %3618 }
 0x1eb   :  { %v3621_v32 = vunpack.i.h.bf16 %v3619_v26  ;;  %v3620_v33 = vunpack.i.l.bf16 %v3619_v26 }
 0x1ed   :  { %v412_v39 = vrot.slane %v3621_v32, 4  ;;  %v400_v40 = vrot.slane %v3620_v33, 4 }
 0x1f2   :  { %v3629_v46 = vpop.permute.xlu2 %3628 }
 0x1f3   :  { %v3631_v59 = vunpack.i.h.bf16 %v3629_v46  ;;  %v3630_v63 = vunpack.i.l.bf16 %v3629_v46 }
 0x1f5   :  { %v468_v56 = vrot.slane %v3631_v59, 4  ;;  %v456_v21 = vrot.slane %v3630_v63, 4 }
 0x20a   :  { %v3624_v37 = vpop.permute.xlu1 %3623 }
 0x20b   :  { %v3626_v41 = vunpack.i.h.bf16 %v3624_v37  ;;  %v3625_v42 = vunpack.i.l.bf16 %v3624_v37 }
 0x20d   :  { %v410_v47 = vrot.slane %v3626_v41, 4  ;;  %v398_v48 = vrot.slane %v3625_v42, 4  ;;  %v401_v49 = vsel %vm146_vm8, %v3625_v42, %v400_v40  ;;  %v413_v50 = vsel %vm146_vm8, %v3626_v41, %v412_v39 }
 0x20e   :  { %v409_v51 = vperm.slane %v401_v49, %v3959_v53  ;;  %v421_v52 = vperm.slane %v413_v50, %v3959_v53 }
 0x20f   :  { %v399_v1 = vsel %vm146_vm8, %v398_v48, %v3620_v33  ;;  %v411_v2 = vsel %vm146_vm8, %v410_v47, %v3621_v32 }
 0x210   :  { %v405_v4 = vperm.slane %v399_v1, %v3959_v53  ;;  %v417_v5 = vperm.slane %v411_v2, %v3959_v53  ;;  %v434_v6 = vrot.slane %v421_v52, 4  ;;  %v436_v7 = vrot.slane %v409_v51, 4 }
 0x212   :  { %v422_v12 = vrot.slane %v417_v5, 4  ;;  %v424_v14 = vrot.slane %v405_v4, 4  ;;  %v435_v15 = vsel %vm146_vm8, %v434_v6, %v409_v51  ;;  %v437_v16 = vsel %vm146_vm8, %v421_v52, %v436_v7  ;;  %v3634_v18 = vpop.permute.xlu1 %3633 }
 0x213   :  { %v441_v19 = vperm.slane %v435_v15, %v3965_v61  ;;  %v445_v43 = vperm.slane %v437_v16, %v3965_v61  ;;  %v3636_v17 = vunpack.i.h.bf16 %v3634_v18  ;;  %v3635_v20 = vunpack.i.l.bf16 %v3634_v18 }
 0x214   :  { %v423_v23 = vsel %vm146_vm8, %v422_v12, %v405_v4  ;;  %v425_v24 = vsel %vm146_vm8, %v417_v5, %v424_v14 }
 0x215   :  { %v429_v25 = vperm.slane %v423_v23, %v3965_v61  ;;  %v433_v26 = vperm.slane %v425_v24, %v3965_v61  ;;  %v450_v27 = vrot.slane %v441_v19, 4  ;;  %v452_v28 = vrot.slane %v445_v43, 4 }
 0x216   :  { %v466_v29 = vrot.slane %v3636_v17, 4  ;;  %v454_v30 = vrot.slane %v3635_v20, 4  ;;  %v457_v31 = vsel %vm146_vm8, %v3635_v20, %v456_v21  ;;  %v469_v32 = vsel %vm146_vm8, %v3636_v17, %v468_v56 }
 0x217   :  { %v446_v33 = vrot.slane %v429_v25, 4  ;;  %v448_v34 = vrot.slane %v433_v26, 4  ;;  %v451_v35 = vsel %vm146_vm8, 0.0, %v450_v27  ;;  %v453_v36 = vsel %vm146_vm8, 0.0, %v452_v28 }
 0x218   :  { %v526_v37 = vrot.slane %v453_v36, 4  ;;  %v455_v38 = vsel %vm146_vm8, %v454_v30, %v3630_v63  ;;  %v465_v39 = vperm.slane %v457_v31, %v3959_v53  ;;  %v467_v40 = vsel %vm146_vm8, %v466_v29, %v3631_v59 }
 0x219   :  { %v449_v41 = vsel %vm146_vm8, 0.0, %v448_v34  ;;  %v461_v42 = vperm.slane %v455_v38, %v3959_v53  ;;  %v473_v44 = vperm.slane %v467_v40, %v3959_v53  ;;  %v477_v45 = vperm.slane %v469_v32, %v3959_v53 }
 0x21a   :  { %v492_v46 = vrot.slane %v465_v39, 4  ;;  %v447_v47 = vsel %vm146_vm8, 0.0, %v446_v33  ;;  %v510_v48 = vsel %vm146_vm8, %v448_v34, %v429_v25  ;;  %v515_v49 = vrot.slane %v449_v41, 4 }
 0x21b   :  { %v478_v50 = vrot.slane %v473_v44, 4  ;;  %v480_v51 = vrot.slane %v461_v42, 4  ;;  %v490_v52 = vrot.slane %v477_v45, 4  ;;  %v514_v54 = vperm.slane %v510_v48, %v3959_v53 }
 0x21c   :  { %v493_v58 = vsel %vm146_vm8, %v477_v45, %v492_v46  ;;  %v516_v59 = vsel %vm146_vm8, %v515_v49, %v447_v47  ;;  %v521_v63 = vsel %vm146_vm8, %v452_v28, %v441_v19  ;;  %v527_v1 = vsel %vm146_vm8, %v526_v37, %v451_v35 }
 0x21d   :  { %v479_v2 = vsel %vm146_vm8, %v478_v50, %v461_v42  ;;  %v481_v4 = vsel %vm146_vm8, %v473_v44, %v480_v51  ;;  %v491_v5 = vsel %vm146_vm8, %v490_v52, %v465_v39  ;;  %v501_v6 = vperm.slane %v493_v58, %v3965_v61 }
 0x21e   :  { %v485_v7 = vperm.slane %v479_v2, %v3965_v61  ;;  %v489_v12 = vperm.slane %v481_v4, %v3965_v61  ;;  %v497_v14 = vperm.slane %v491_v5, %v3965_v61  ;;  %v520_v15 = vperm.slane %v516_v59, %v3959_v53 }
 0x21f   :  { %v508_v16 = vrot.slane %v501_v6, 4  ;;  %v525_v18 = vperm.slane %v521_v63, %v3959_v53  ;;  %v531_v19 = vperm.slane %v527_v1, %v3959_v53  ;;  %v534_v43 = vrot.slane %v514_v54, 4 }
 0x220   :  { %v502_v17 = vrot.slane %v485_v7, 4  ;;  %v504_v20 = vrot.slane %v489_v12, 4  ;;  %v506_v56 = vrot.slane %v497_v14, 4  ;;  %v532_v21 = vrot.slane %v520_v15, 4 }
 0x221   :  { %v509_v23 = vsel %vm146_vm8, 0.0, %v508_v16  ;;  %v575_v24 = vsel %vm146_vm8, %v508_v16, %v497_v14  ;;  %v535_v25 = vsel %vm146_vm8, %v520_v15, %v534_v43  ;;  %v546_v26 = vrot.slane %v525_v18, 4 }
 0x222   :  { %v505_v27 = vsel %vm146_vm8, 0.0, %v504_v20  ;;  %v507_v28 = vsel %vm146_vm8, 0.0, %v506_v56  ;;  %v580_v29 = vrot.slane %v509_v23, 4  ;;  %v543_v30 = vperm.slane %v535_v25, %v3965_v61 }
 0x223   :  { %v569_v31 = vrot.slane %v505_v27, 4  ;;  %v547_v32 = vsel %vm146_vm8, %v531_v19, %v546_v26  ;;  %v533_v33 = vsel %vm146_vm8, %v532_v21, %v514_v54  ;;  %v544_v34 = vrot.slane %v531_v19, 4 }
 0x224   :  { %v555_v35 = vperm.slane %v547_v32, %v3965_v61  ;;  %v539_v36 = vperm.slane %v533_v33, %v3965_v61  ;;  %v562_v37 = vrot.slane %v543_v30, 4  ;;  %v503_v38 = vsel %vm146_vm8, 0.0, %v502_v17 }
 0x225   :  { %v545_v39 = vsel %vm146_vm8, %v544_v34, %v525_v18  ;;  %v564_v40 = vsel %vm146_vm8, %v504_v20, %v485_v7  ;;  %v570_v41 = vsel %vm146_vm8, %v569_v31, %v503_v38  ;;  %v579_v42 = vperm.slane %v575_v24, %v3959_v53 }
 0x226   :  { %v560_v44 = vrot.slane %v555_v35, 4  ;;  %v551_v45 = vperm.slane %v545_v39, %v3965_v61  ;;  %v563_v46 = vsel %vm146_vm8, %v555_v35, %v562_v37  ;;  %v558_v47 = vrot.slane %v539_v36, 4 }
 0x227   :  { %v621_v48 = vpack.c.bf16 %v563_v46, %v563_v46  ;;  %v568_v49 = vperm.slane %v564_v40, %v3959_v53  ;;  %v574_v50 = vperm.slane %v570_v41, %v3959_v53  ;;  %v581_v51 = vsel %vm146_vm8, %v580_v29, %v507_v28 }
 0x228   :  { %v561_v52 = vsel %vm146_vm8, %v560_v44, %v543_v30  ;;  %v556_v54 = vrot.slane %v551_v45, 4  ;;  %v559_v58 = vsel %vm146_vm8, %v551_v45, %v558_v47  ;;  %v585_v59 = vperm.slane %v581_v51, %v3959_v53 }
 0x229   :  { %v620_v63 = vpack.c.bf16 %v561_v52, %v561_v52  ;;  %v940_v1 = vsel %vm878_vm9, %v621_v48, 0  ;;  %v619_v2 = vpack.c.bf16 %v559_v58, %v559_v58  ;;  %v588_v4 = vrot.slane %v568_v49, 4 }
 0x22a   :  { %v557_v5 = vsel %vm146_vm8, %v556_v54, %v539_v36  ;;  %949 = vmatpush.bf16.xpose.msrb.mxu0 %v940_v1  ;;  %v600_v6 = vrot.slane %v579_v42, 4  ;;  %v586_v7 = vrot.slane %v574_v50, 4  ;;  %v598_v12 = vrot.slane %v585_v59, 4 }
 0x22b   :  { %v921_v14 = vsel %vm878_vm9, %v620_v63, 0  ;;  %v618_v15 = vpack.c.bf16 %v557_v5, %v557_v5  ;;  %v902_v16 = vsel %vm878_vm9, %v619_v2, 0  ;;  %v589_v18 = vsel %vm146_vm8, %v574_v50, %v588_v4 }
 0x22c   :  { %930 = vmatpush.bf16.xpose.msra.mxu3 %v921_v14  ;;  %911 = vmatpush.bf16.xpose.msra.mxu2 %v902_v16  ;;  %v597_v19 = vperm.slane %v589_v18, %v3965_v61  ;;  %v601_v43 = vsel %vm146_vm8, %v585_v59, %v600_v6  ;;  %v587_v17 = vsel %vm146_vm8, %v586_v7, %v568_v49  ;;  %v336_v20 = vrot.slane %v4066_v9, 4  ;;  %v39_v7 = vld [vmem:[%s5128_s1 + $0x18] sm:$0xff] }
 0x22d   :  { %v883_v56 = vsel %vm878_vm9, %v618_v15, 0  ;;  %v609_v21 = vperm.slane %v601_v43, %v3965_v61  ;;  %v593_v23 = vperm.slane %v587_v17, %v3965_v61  ;;  %v599_v24 = vsel %vm146_vm8, %v598_v12, %v579_v42  ;;  %v36_v15 = vld [vmem:[%s5128_s1] sm:$0xff]  ;;  %v38_v43 = vld [vmem:[%s5128_s1 + $0x10] sm:$0xff]  ;;  %v37_v17 = vld [vmem:[%s5128_s1 + $0x8] sm:$0xff] }
 0x22e   :  { %892 = vmatpush.bf16.xpose.msra.mxu1 %v883_v56  ;;  %v616_v25 = vrot.slane %v597_v19, 4  ;;  %v369_v26 = vpack.c.bf16 %v4015_v55, %v4015_v55  ;;  %v605_v27 = vperm.slane %v599_v24, %v3965_v61  ;;  %v348_v28 = vrot.slane %v4063_v8, 4 }
 0x22f   :  { %v368_v29 = vpack.c.bf16 %v4018_v57, %v4018_v57  ;;  %v614_v30 = vrot.slane %v609_v21, 4  ;;  %v612_v31 = vrot.slane %v593_v23, 4  ;;  %v334_v32 = vrot.slane %v4069_v10, 4 }
 0x230   :  { %v610_v33 = vrot.slane %v605_v27, 4  ;;  %v617_v34 = vsel %vm146_vm8, %v609_v21, %v616_v25  ;;  %v337_v35 = vsel %vm146_vm8, %v4069_v10, %v336_v20  ;;  %v346_v36 = vrot.slane %v4072_v11, 4 }
 0x231   :  { %v615_v55 = vsel %vm146_vm8, %v614_v30, %v597_v19  ;;  %3456 = vmatmul.msk.bf16.vlgmr.msrb.gmra.mxu0 %vm878_vm9, %v369_v26  ;;  %v625_v37 = vpack.c.bf16 %v617_v34, %v617_v34  ;;  %v367_v57 = vpack.c.bf16 %v4024_v62, %v4024_v62  ;;  %v613_v38 = vsel %vm146_vm8, %v605_v27, %v612_v31 }
 0x232   :  { %v624_v39 = vpack.c.bf16 %v615_v55, %v615_v55  ;;  %v611_v40 = vsel %vm146_vm8, %v610_v33, %v593_v23  ;;  %v623_v41 = vpack.c.bf16 %v613_v38, %v613_v38  ;;  %v349_v42 = vsel %vm146_vm8, %v4072_v11, %v348_v28  ;;  %v40_v33 = vld [vmem:[%s5128_s1 + $0x20] sm:$0xff] }
 0x233   :  { %3455 = vmatmul.msk.bf16.vlgmr.msra.gmra.mxu3 %vm878_vm9, %v368_v29  ;;  %v366_v10 = vpack.c.bf16 %v4021_v60, %v4021_v60  ;;  %v622_v44 = vpack.c.bf16 %v611_v40, %v611_v40  ;;  %v1016_v45 = vsel %vm878_vm9, %v625_v37, 0  ;;  %3454 = vmatmul.msk.bf16.vlgmr.msra.gmra.mxu2 %vm878_vm9, %v367_v57  ;;  %v335_v62 = vsel %vm146_vm8, %v334_v32, %v4066_v9  ;;  %v43_v29 = vld [vmem:[%s5128_s1 + $0x38] sm:$0xff]  ;;  %v42_v37 = vld [vmem:[%s5128_s1 + $0x30] sm:$0xff]  ;;  %v41_v57 = vld [vmem:[%s5128_s1 + $0x28] sm:$0xff] }
 0x234   :  { %v997_v46 = vsel %vm878_vm9, %v624_v39, 0  ;;  %1025 = vmatpush.bf16.xpose.msra.mxu0 %v1016_v45  ;;  %v978_v47 = vsel %vm878_vm9, %v623_v41, 0  ;;  %v345_v11 = vperm.slane %v337_v35, %v3965_v61  ;;  %v347_v48 = vsel %vm146_vm8, %v346_v36, %v4063_v8 }
 0x235   :  { %1006 = vmatpush.bf16.xpose.msrb.mxu3 %v997_v46  ;;  %3453 = vmatmul.msk.bf16.vlgmr.msra.gmra.mxu1 %vm878_vm9, %v366_v10  ;;  %v959_v60 = vsel %vm878_vm9, %v622_v44, 0  ;;  %v357_v49 = vperm.slane %v349_v42, %v3965_v61  ;;  %v341_v9 = vperm.slane %v335_v62, %v3965_v61  ;;  %v353_v51 = vperm.slane %v347_v48, %v3965_v61 }
 0x236   :  { %968 = vmatpush.bf16.xpose.msrb.mxu1 %v959_v60  ;;  %987 = vmatpush.bf16.xpose.msrb.mxu2 %v978_v47  ;;  %v364_v50 = vrot.slane %v345_v11, 4 }
 0x237   :  { %v362_v52 = vrot.slane %v357_v49, 4  ;;  %v360_v54 = vrot.slane %v341_v9, 4  ;;  %v358_v58 = vrot.slane %v353_v51, 4 }
 0x238   :  { %v365_v59 = vsel %vm146_vm8, %v357_v49, %v364_v50 }
 0x239   :  { %v363_v63 = vsel %vm146_vm8, %v362_v52, %v345_v11  ;;  %v361_v1 = vsel %vm146_vm8, %v353_v51, %v360_v54  ;;  %v373_v2 = vpack.c.bf16 %v365_v59, %v365_v59  ;;  %v359_v8 = vsel %vm146_vm8, %v358_v58, %v341_v9  ;;  %v4234_v11 = vpop.permute.xlu2 %3638 }
 0x23a   :  { %v372_v4 = vpack.c.bf16 %v363_v63, %v363_v63  ;;  %v371_v5 = vpack.c.bf16 %v361_v1, %v361_v1  ;;  %v370_v6 = vpack.c.bf16 %v359_v8, %v359_v8 }
 0x241   :  { %3460 = vmatmul.msk.bf16.vlgmr.msra.gmra.mxu0 %vm878_vm9, %v373_v2 }
 0x243   :  { %3459 = vmatmul.msk.bf16.vlgmr.msrb.gmra.mxu3 %vm878_vm9, %v372_v4  ;;  %3458 = vmatmul.msk.bf16.vlgmr.msrb.gmra.mxu2 %vm878_vm9, %v371_v5 }
 0x245   :  { %3457 = vmatmul.msk.bf16.vlgmr.msrb.gmra.mxu1 %vm878_vm9, %v370_v6 }
 0x2ae   :  { %v951_v12 = vpop.f32.mrf.mxu0 }
 0x2af   :  { %v4193_v14 = vadd.f32 %v951_v12, %v39_v7 }
 0x2b1   :  { %v1040_v16 = vsel %vm878_vm9, %v4193_v14, -inf }
 0x2b2   :  { %v894_v18 = vpop.f32.mrf.mxu1  ;;  %1041 = vmax.xlane.f32.xlu2 %v1040_v16 }
 0x2b3   :  { %v895_v19 = vadd.f32 %v894_v18, %v36_v15 }
 0x2b5   :  { %v1031_v20 = vsel %vm878_vm9, %v895_v19, -inf }
 0x2b6   :  { %v932_v56 = vpop.f32.mrf.mxu3  ;;  %1032 = vmax.xlane.f32.xlu1 %v1031_v20  ;;  %v913_v21 = vpop.f32.mrf.mxu2 }
 0x2b7   :  { %v933_v23 = vadd.f32 %v932_v56, %v38_v43  ;;  %v914_v24 = vadd.f32 %v913_v21, %v37_v17  ;;  %v953_v25 = vpop.f32.mrf.mxu0 }
 0x2b9   :  { %v1037_v26 = vsel %vm878_vm9, %v933_v23, -inf  ;;  %v1034_v27 = vsel %vm878_vm9, %v914_v24, -inf }
 0x2ba   :  { %v896_v28 = vpop.f32.mrf.mxu1  ;;  %1038 = vmax.xlane.f32.xlu2 %v1037_v26  ;;  %1035 = vmax.xlane.f32.xlu0 %v1034_v27 }
 0x2be   :  { %v934_v30 = vpop.f32.mrf.mxu3  ;;  %v915_v31 = vpop.f32.mrf.mxu2 }
 0x2bf   :  { %v1027_v32 = vpop.f32.mrf.mxu0  ;;  %v3641_v30 = vunpack.i.h.bf16 %v4234_v11  ;;  %v3640_v31 = vunpack.i.l.bf16 %v4234_v11 }
 0x2c0   :  { %v4215_v34 = vadd.f32 %v1027_v32, %v43_v29 }
 0x2c2   :  { %v970_v35 = vpop.f32.mrf.mxu1  ;;  %v1052_v36 = vsel %vm878_vm9, %v4215_v34, -inf }
 0x2c3   :  { %v971_v55 = vadd.f32 %v970_v35, %v40_v33  ;;  %1053 = vmax.xlane.f32.xlu0 %v1052_v36  ;;  %v664_v35 = vrot.slane %v3641_v30, 4  ;;  %v652_v36 = vrot.slane %v3640_v31, 4 }
 0x2c5   :  { %v1043_v38 = vsel %vm878_vm9, %v971_v55, -inf }
 0x2c6   :  { %v1008_v39 = vpop.f32.mrf.mxu3  ;;  %1044 = vmax.xlane.f32.xlu1 %v1043_v38  ;;  %v989_v40 = vpop.f32.mrf.mxu2 }
 0x2c7   :  { %v1009_v41 = vadd.f32 %v1008_v39, %v42_v37  ;;  %v990_v42 = vadd.f32 %v989_v40, %v41_v57  ;;  %v1029_v10 = vpop.f32.mrf.mxu0 }
 0x2c9   :  { %v1046_v44 = vsel %vm878_vm9, %v990_v42, -inf  ;;  %v1049_v62 = vsel %vm878_vm9, %v1009_v41, -inf }
 0x2ca   :  { %v972_v45 = vpop.f32.mrf.mxu1  ;;  %1047 = vmax.xlane.f32.xlu2 %v1046_v44 }
 0x2cb   :  { %1050 = vmax.xlane.f32.xlu0 %v1049_v62 }
 0x2ce   :  { %v1010_v46 = vpop.f32.mrf.mxu3  ;;  %v991_v47 = vpop.f32.mrf.mxu2 }
 0x2df   :  { %3643 = vrot.lane.b32.xlu1 %v3973_v3, %s3867_s23  ;;  %3648 = vrot.lane.b32.xlu0 %v3970_v0, %s3867_s23 }
 0x2e2   :  { %3653 = vrot.lane.b32.xlu2 %v3989_v22, %s3867_s23 }
 0x325   :  { %v1042_v60 = vpop.xlane.xlu2 %1041 }
 0x326   :  { %v1058_v58 = vsub.f32 %v4193_v14, %v1042_v60 }
 0x328   :  { %v1069_v22 = vmul.f32 1.442695, %v1058_v58 }
 0x329   :  { %v1033_v48 = vpop.xlane.xlu1 %1032 }
 0x32a   :  { %v1055_v49 = vsub.f32 %v895_v19, %v1033_v48 }
 0x32c   :  { %v1063_v9 = vmul.f32 1.442695, %v1055_v49 }
 0x32d   :  { %v1039_v50 = vpop.xlane.xlu2 %1038  ;;  %v1036_v51 = vpop.xlane.xlu0 %1035 }
 0x32e   :  { %3734 = vpow2.f32 %v1063_v9  ;;  %v1057_v52 = vsub.f32 %v933_v23, %v1039_v50  ;;  %v1056_v54 = vsub.f32 %v914_v24, %v1036_v51 }
 0x330   :  { %v1067_v3 = vmul.f32 1.442695, %v1057_v52  ;;  %v1065_v59 = vmul.f32 1.442695, %v1056_v54 }
 0x332   :  { %3736 = vpow2.f32 %v1067_v3 }
 0x333   :  { %3738 = vpow2.f32 %v1065_v59 }
 0x334   :  { %v4237_v0 = vpop.eup %3734  ;;  %3740 = vpow2.f32 %v1069_v22 }
 0x335   :  { %v1079_v63 = vsel %vm878_vm9, %v4237_v0, 0.0 }
 0x336   :  { %1080 = vadd.xlane.f32.xlu2 %v1079_v63  ;;  %v1054_v1 = vpop.xlane.xlu0 %1053 }
 0x337   :  { %v1062_v43 = vsub.f32 %v4215_v34, %v1054_v1 }
 0x338   :  { %v4241_v2 = vpop.eup %3736 }
 0x339   :  { %v4243_v8 = vpop.eup %3738  ;;  %v1045_v4 = vpop.xlane.xlu1 %1044  ;;  %v1085_v5 = vsel %vm878_vm9, %v4241_v2, 0.0  ;;  %v1077_v21 = vmul.f32 1.442695, %v1062_v43 }
 0x33a   :  { %v1059_v6 = vsub.f32 %v971_v55, %v1045_v4  ;;  %1086 = vadd.xlane.f32.xlu0 %v1085_v5  ;;  %v1082_v7 = vsel %vm878_vm9, %v4243_v8, 0.0  ;;  %v4249_v15 = vpop.eup %3740 }
 0x33b   :  { %1083 = vadd.xlane.f32.xlu1 %v1082_v7  ;;  %v1088_v56 = vsel %vm878_vm9, %v4249_v15, 0.0 }
 0x33c   :  { %v1071_v12 = vmul.f32 1.442695, %v1059_v6 }
 0x33d   :  { %v1048_v14 = vpop.xlane.xlu2 %1047 }
 0x33e   :  { %v1051_v16 = vpop.xlane.xlu0 %1050  ;;  %v1060_v18 = vsub.f32 %v990_v42, %v1048_v14  ;;  %3742 = vpow2.f32 %v1071_v12 }
 0x33f   :  { %v1061_v19 = vsub.f32 %v1009_v41, %v1051_v16 }
 0x340   :  { %v1073_v17 = vmul.f32 1.442695, %v1060_v18 }
 0x341   :  { %v1075_v20 = vmul.f32 1.442695, %v1061_v19 }
 0x342   :  { %3744 = vpow2.f32 %v1073_v17  ;;  %1089 = vadd.xlane.f32.xlu0 %v1088_v56 }
 0x343   :  { %3746 = vpow2.f32 %v1075_v20 }
 0x344   :  { %v4254_v23 = vpop.eup %3742  ;;  %3748 = vpow2.f32 %v1077_v21 }
 0x345   :  { %v1091_v27 = vsel %vm878_vm9, %v4254_v23, 0.0  ;;  %v3654_v29 = vpop.permute.xlu2 %3653 }
 0x346   :  { %v3656_v33 = vunpack.i.h.bf16 %v3654_v29  ;;  %v3655_v34 = vunpack.i.l.bf16 %v3654_v29 }
 0x348   :  { %v4256_v24 = vpop.eup %3744  ;;  %v718_v42 = vrot.slane %v3656_v33, 4  ;;  %v706_v10 = vrot.slane %v3655_v34, 4 }
 0x349   :  { %v4258_v25 = vpop.eup %3746  ;;  %v1094_v26 = vsel %vm878_vm9, %v4256_v24, 0.0 }
 0x34a   :  { %1095 = vadd.xlane.f32.xlu2 %v1094_v26  ;;  %v1097_v28 = vsel %vm878_vm9, %v4258_v25, 0.0  ;;  %1092 = vadd.xlane.f32.xlu0 %v1091_v27  ;;  %v4268_v32 = vpop.eup %3748 }
 0x34b   :  { %1098 = vadd.xlane.f32.xlu1 %v1097_v28  ;;  %v1100_v57 = vsel %vm878_vm9, %v4268_v32, 0.0 }
 0x351   :  { %v3644_v55 = vpop.permute.xlu1 %3643  ;;  %v3649_v37 = vpop.permute.xlu0 %3648 }
 0x352   :  { %v3646_v38 = vunpack.i.h.bf16 %v3644_v55  ;;  %v3645_v39 = vunpack.i.l.bf16 %v3644_v55  ;;  %v3651_v40 = vunpack.i.h.bf16 %v3649_v37  ;;  %v3650_v41 = vunpack.i.l.bf16 %v3649_v37 }
 0x353   :  { %1101 = vadd.xlane.f32.xlu1 %v1100_v57 }
 0x354   :  { %v662_v44 = vrot.slane %v3646_v38, 4  ;;  %v665_v45 = vsel %vm146_vm8, %v3646_v38, %v664_v35  ;;  %v650_v62 = vrot.slane %v3645_v39, 4  ;;  %v653_v46 = vsel %vm146_vm8, %v3645_v39, %v652_v36 }
 0x355   :  { %v673_v47 = vperm.slane %v665_v45, %v3959_v53  ;;  %v661_v11 = vperm.slane %v653_v46, %v3959_v53  ;;  %v720_v60 = vrot.slane %v3651_v40, 4  ;;  %v707_v48 = vsel %vm146_vm8, %v706_v10, %v3650_v41 }
 0x356   :  { %v663_v49 = vsel %vm146_vm8, %v662_v44, %v3641_v30  ;;  %v651_v9 = vsel %vm146_vm8, %v650_v62, %v3640_v31  ;;  %v708_v50 = vrot.slane %v3650_v41, 4  ;;  %v713_v51 = vperm.slane %v707_v48, %v3959_v53 }
 0x357   :  { %v669_v52 = vperm.slane %v663_v49, %v3959_v53  ;;  %v686_v54 = vrot.slane %v673_v47, 4  ;;  %v657_v58 = vperm.slane %v651_v9, %v3959_v53  ;;  %v688_v3 = vrot.slane %v661_v11, 4 }
 0x358   :  { %v709_v59 = vsel %vm146_vm8, %v3655_v34, %v708_v50  ;;  %v719_v22 = vsel %vm146_vm8, %v718_v42, %v3651_v40  ;;  %v721_v63 = vsel %vm146_vm8, %v3656_v33, %v720_v60  ;;  %v732_v1 = vrot.slane %v713_v51, 4 }
 0x359   :  { %v674_v4 = vrot.slane %v669_v52, 4  ;;  %v676_v5 = vrot.slane %v657_v58, 4  ;;  %v687_v6 = vsel %vm146_vm8, %v686_v54, %v661_v11  ;;  %v689_v7 = vsel %vm146_vm8, %v673_v47, %v688_v3 }
 0x35a   :  { %v693_v12 = vperm.slane %v687_v6, %v3965_v61  ;;  %v697_v14 = vperm.slane %v689_v7, %v3965_v61  ;;  %v717_v16 = vperm.slane %v709_v59, %v3959_v53  ;;  %v725_v18 = vperm.slane %v719_v22, %v3959_v53 }
 0x35b   :  { %v675_v19 = vsel %vm146_vm8, %v674_v4, %v657_v58  ;;  %v677_v43 = vsel %vm146_vm8, %v669_v52, %v676_v5  ;;  %v729_v17 = vperm.slane %v721_v63, %v3959_v53 }
 0x35c   :  { %v681_v20 = vperm.slane %v675_v19, %v3965_v61  ;;  %v685_v56 = vperm.slane %v677_v43, %v3965_v61  ;;  %v702_v21 = vrot.slane %v693_v12, 4  ;;  %v704_v26 = vrot.slane %v697_v14, 4 }
 0x35d   :  { %v730_v27 = vrot.slane %v725_v18, 4  ;;  %v733_v28 = vsel %vm146_vm8, %v725_v18, %v732_v1  ;;  %v742_v29 = vrot.slane %v729_v17, 4  ;;  %v744_v30 = vrot.slane %v717_v16, 4 }
 0x35e   :  { %v698_v31 = vrot.slane %v681_v20, 4  ;;  %v700_v33 = vrot.slane %v685_v56, 4  ;;  %v703_v34 = vsel %vm146_vm8, 0.0, %v702_v21  ;;  %v705_v35 = vsel %vm146_vm8, 0.0, %v704_v26 }
 0x35f   :  { %v773_v36 = vsel %vm146_vm8, %v704_v26, %v693_v12  ;;  %v778_v55 = vrot.slane %v705_v35, 4  ;;  %v731_v37 = vsel %vm146_vm8, %v730_v27, %v713_v51  ;;  %v741_v57 = vperm.slane %v733_v28, %v3965_v61 }
 0x360   :  { %v699_v38 = vsel %vm146_vm8, 0.0, %v698_v31  ;;  %v701_v39 = vsel %vm146_vm8, 0.0, %v700_v33  ;;  %v777_v40 = vperm.slane %v773_v36, %v3959_v53  ;;  %v737_v41 = vperm.slane %v731_v37, %v3965_v61 }
 0x361   :  { %v767_v42 = vrot.slane %v701_v39, 4  ;;  %v743_v10 = vsel %vm146_vm8, %v742_v29, %v717_v16  ;;  %v745_v44 = vsel %vm146_vm8, %v729_v17, %v744_v30  ;;  %v756_v45 = vrot.slane %v741_v57, 4 }
 0x362   :  { %v749_v62 = vperm.slane %v743_v10, %v3965_v61  ;;  %v753_v46 = vperm.slane %v745_v44, %v3965_v61  ;;  %v754_v47 = vrot.slane %v737_v41, 4  ;;  %v762_v11 = vsel %vm146_vm8, %v700_v33, %v681_v20 }
 0x363   :  { %v757_v60 = vsel %vm146_vm8, 0.0, %v756_v45  ;;  %v816_v48 = vsel %vm146_vm8, %v756_v45, %v737_v41  ;;  %v766_v49 = vperm.slane %v762_v11, %v3959_v53  ;;  %v768_v9 = vsel %vm146_vm8, %v767_v42, %v699_v38 }
 0x364   :  { %v755_v50 = vsel %vm146_vm8, 0.0, %v754_v47  ;;  %v758_v51 = vrot.slane %v749_v62, 4  ;;  %v760_v52 = vrot.slane %v753_v46, 4  ;;  %v820_v54 = vperm.slane %v816_v48, %v3959_v53 }
 0x365   :  { %v821_v58 = vrot.slane %v757_v60, 4  ;;  %v772_v3 = vperm.slane %v768_v9, %v3959_v53  ;;  %v779_v59 = vsel %vm146_vm8, %v778_v55, %v703_v34  ;;  %v786_v22 = vrot.slane %v766_v49, 4 }
 0x366   :  { %v759_v63 = vsel %vm146_vm8, 0.0, %v758_v51  ;;  %v761_v1 = vsel %vm146_vm8, 0.0, %v760_v52  ;;  %v783_v4 = vperm.slane %v779_v59, %v3959_v53  ;;  %v798_v5 = vrot.slane %v777_v40, 4 }
 0x367   :  { %v832_v6 = vrot.slane %v761_v1, 4  ;;  %v787_v7 = vsel %vm146_vm8, %v772_v3, %v786_v22  ;;  %v784_v12 = vrot.slane %v772_v3, 4  ;;  %v822_v14 = vsel %vm146_vm8, %v821_v58, %v755_v50 }
 0x368   :  { %v795_v16 = vperm.slane %v787_v7, %v3965_v61  ;;  %v799_v18 = vsel %vm146_vm8, %v783_v4, %v798_v5  ;;  %v796_v19 = vrot.slane %v783_v4, 4  ;;  %v826_v43 = vperm.slane %v822_v14, %v3959_v53 }
 0x369   :  { %v807_v17 = vperm.slane %v799_v18, %v3965_v61  ;;  %v785_v20 = vsel %vm146_vm8, %v784_v12, %v766_v49  ;;  %v827_v56 = vsel %vm146_vm8, %v760_v52, %v749_v62  ;;  %v833_v21 = vsel %vm146_vm8, %v832_v6, %v759_v63 }
 0x36a   :  { %v791_v26 = vperm.slane %v785_v20, %v3965_v61  ;;  %v797_v27 = vsel %vm146_vm8, %v796_v19, %v777_v40  ;;  %v814_v28 = vrot.slane %v795_v16, 4  ;;  %v831_v29 = vperm.slane %v827_v56, %v3959_v53 }
 0x36b   :  { %v812_v30 = vrot.slane %v807_v17, 4  ;;  %v803_v31 = vperm.slane %v797_v27, %v3965_v61  ;;  %v837_v33 = vperm.slane %v833_v21, %v3959_v53  ;;  %v840_v34 = vrot.slane %v820_v54, 4 }
 0x36c   :  { %v815_v35 = vsel %vm146_vm8, %v807_v17, %v814_v28  ;;  %v852_v36 = vrot.slane %v831_v29, 4  ;;  %v810_v55 = vrot.slane %v791_v26, 4  ;;  %v838_v37 = vrot.slane %v826_v43, 4 }
 0x36d   :  { %v813_v57 = vsel %vm146_vm8, %v812_v30, %v795_v16  ;;  %v808_v38 = vrot.slane %v803_v31, 4  ;;  %v873_v39 = vpack.c.bf16 %v815_v35, %v815_v35  ;;  %v841_v40 = vsel %vm146_vm8, %v826_v43, %v840_v34 }
 0x36e   :  { %v872_v41 = vpack.c.bf16 %v813_v57, %v813_v57  ;;  %v849_v42 = vperm.slane %v841_v40, %v3965_v61  ;;  %v853_v10 = vsel %vm146_vm8, %v837_v33, %v852_v36  ;;  %v811_v44 = vsel %vm146_vm8, %v803_v31, %v810_v55 }
 0x36f   :  { %v809_v45 = vsel %vm146_vm8, %v808_v38, %v791_v26  ;;  %v1189_v62 = vsel %vm1130_vm10, %v873_v39, 0  ;;  %v861_v46 = vperm.slane %v853_v10, %v3965_v61  ;;  %v871_v47 = vpack.c.bf16 %v811_v44, %v811_v44 }
 0x370   :  { %v1170_v11 = vsel %vm1130_vm10, %v872_v41, 0  ;;  %v870_v60 = vpack.c.bf16 %v809_v45, %v809_v45  ;;  %1198 = vmatpush.bf16.msrb.mxu0 %v1189_v62  ;;  %v868_v48 = vrot.slane %v849_v42, 4  ;;  %v839_v49 = vsel %vm146_vm8, %v838_v37, %v820_v54 }
 0x371   :  { %1179 = vmatpush.bf16.msra.mxu3 %v1170_v11  ;;  %v1151_v9 = vsel %vm1130_vm10, %v871_v47, 0  ;;  %v845_v50 = vperm.slane %v839_v49, %v3965_v61  ;;  %v850_v51 = vrot.slane %v837_v33, 4  ;;  %v866_v52 = vrot.slane %v861_v46, 4 }
 0x372   :  { %v1132_v58 = vsel %vm1130_vm10, %v870_v60, 0  ;;  %v869_v3 = vsel %vm146_vm8, %v861_v46, %v868_v48  ;;  %1160 = vmatpush.bf16.msra.mxu2 %v1151_v9 }
 0x373   :  { %1141 = vmatpush.bf16.msra.mxu1 %v1132_v58  ;;  %v877_v59 = vpack.c.bf16 %v869_v3, %v869_v3  ;;  %v851_v22 = vsel %vm146_vm8, %v850_v51, %v831_v29  ;;  %v864_v63 = vrot.slane %v845_v50, 4  ;;  %v867_v1 = vsel %vm146_vm8, %v866_v52, %v849_v42 }
 0x374   :  { %v857_v54 = vperm.slane %v851_v22, %v3965_v61  ;;  %v876_v4 = vpack.c.bf16 %v867_v1, %v867_v1 }
 0x375   :  { %v1265_v5 = vsel %vm1130_vm10, %v877_v59, 0 }
 0x376   :  { %1274 = vmatpush.bf16.msra.mxu0 %v1265_v5  ;;  %v865_v6 = vsel %vm146_vm8, %v857_v54, %v864_v63  ;;  %v1246_v7 = vsel %vm1130_vm10, %v876_v4, 0  ;;  %v862_v12 = vrot.slane %v857_v54, 4 }
 0x377   :  { %v875_v14 = vpack.c.bf16 %v865_v6, %v865_v6  ;;  %1255 = vmatpush.bf16.msrb.mxu3 %v1246_v7 }
 0x378   :  { %v863_v16 = vsel %vm146_vm8, %v862_v12, %v845_v50 }
 0x379   :  { %v1227_v18 = vsel %vm1130_vm10, %v875_v14, 0  ;;  %v874_v19 = vpack.c.bf16 %v863_v16, %v863_v16 }
 0x37a   :  { %1236 = vmatpush.bf16.msrb.mxu2 %v1227_v18 }
 0x37b   :  { %v1208_v43 = vsel %vm1130_vm10, %v874_v19, 0 }
 0x37c   :  { %1217 = vmatpush.bf16.msrb.mxu1 %v1208_v43 }
 0x3a9   :  { %v1081_v17 = vpop.xlane.xlu2 %1080 }
 0x3aa   :  { %3750 = vrcp.f32 %v1081_v17 }
 0x3ad   :  { %v1087_v20 = vpop.xlane.xlu0 %1086 }
 0x3ae   :  { %3752 = vrcp.f32 %v1087_v20  ;;  %v1084_v56 = vpop.xlane.xlu1 %1083 }
 0x3af   :  { %3754 = vrcp.f32 %v1084_v56 }
 0x3b0   :  { %v3751_v21 = vpop.eup %3750 }
 0x3b1   :  { %v1111_v26 = vmul.f32 %v3751_v21, %v4237_v0 }
 0x3b3   :  { %v1119_v27 = vpack.c.bf16 %v1111_v26, %v1111_v26 }
 0x3b4   :  { %v3753_v28 = vpop.eup %3752 }
 0x3b5   :  { %v3755_v29 = vpop.eup %3754  ;;  %v1113_v30 = vmul.f32 %v3753_v28, %v4241_v2  ;;  %3461 = vmatmul.msk.bf16.vlgmr.msra.gmra.mxu1 %vm878_vm9, %v1119_v27  ;;  %v1090_v31 = vpop.xlane.xlu0 %1089 }
 0x3b6   :  { %v1112_v33 = vmul.f32 %v3755_v29, %v4243_v8  ;;  %3756 = vrcp.f32 %v1090_v31 }
 0x3b7   :  { %v1121_v34 = vpack.c.bf16 %v1113_v30, %v1113_v30 }
 0x3b8   :  { %v1120_v35 = vpack.c.bf16 %v1112_v33, %v1112_v33 }
 0x3b9   :  { %3463 = vmatmul.msk.bf16.vlgmr.msra.gmra.mxu3 %vm878_vm9, %v1121_v34 }
 0x3ba   :  { %3462 = vmatmul.msk.bf16.vlgmr.msra.gmra.mxu2 %vm878_vm9, %v1120_v35 }
 0x3bc   :  { %v3757_v36 = vpop.eup %3756 }
 0x3bd   :  { %v1114_v0 = vmul.f32 %v3757_v36, %v4249_v15  ;;  %v1096_v55 = vpop.xlane.xlu2 %1095  ;;  %v1093_v37 = vpop.xlane.xlu0 %1092 }
 0x3be   :  { %3758 = vrcp.f32 %v1096_v55  ;;  %v1099_v57 = vpop.xlane.xlu1 %1098 }
 0x3bf   :  { %v1122_v2 = vpack.c.bf16 %v1114_v0, %v1114_v0  ;;  %3760 = vrcp.f32 %v1093_v37 }
 0x3c0   :  { %3762 = vrcp.f32 %v1099_v57 }
 0x3c1   :  { %3464 = vmatmul.msk.bf16.vlgmr.msrb.gmra.mxu0 %vm878_vm9, %v1122_v2 }
 0x3c4   :  { %v3759_v8 = vpop.eup %3758 }
 0x3c5   :  { %v3761_v38 = vpop.eup %3760  ;;  %v1116_v39 = vmul.f32 %v3759_v8, %v4256_v24 }
 0x3c6   :  { %v3763_v40 = vpop.eup %3762  ;;  %v1115_v41 = vmul.f32 %v3761_v38, %v4254_v23  ;;  %v1102_v42 = vpop.xlane.xlu1 %1101 }
 0x3c7   :  { %v1124_v10 = vpack.c.bf16 %v1116_v39, %v1116_v39  ;;  %v1117_v15 = vmul.f32 %v3763_v40, %v4258_v25  ;;  %3764 = vrcp.f32 %v1102_v42 }
 0x3c8   :  { %v1123_v44 = vpack.c.bf16 %v1115_v41, %v1115_v41 }
 0x3c9   :  { %v1125_v45 = vpack.c.bf16 %v1117_v15, %v1117_v15 }
 0x3ca   :  { %3465 = vmatmul.msk.bf16.vlgmr.msrb.gmra.mxu1 %vm878_vm9, %v1123_v44  ;;  %3466 = vmatmul.msk.bf16.vlgmr.msrb.gmra.mxu2 %vm878_vm9, %v1124_v10 }
 0x3cb   :  { %3467 = vmatmul.msk.bf16.vlgmr.msrb.gmra.mxu3 %vm878_vm9, %v1125_v45 }
 0x3cd   :  { %v3765_v62 = vpop.eup %3764 }
 0x3ce   :  { %v1118_v46 = vmul.f32 %v3765_v62, %v4268_v32 }
 0x3d0   :  { %v1126_v24 = vpack.c.bf16 %v1118_v46, %v1118_v46 }
 0x3d2   :  { %3468 = vmatmul.msk.bf16.vlgmr.msra.gmra.mxu0 %vm878_vm9, %v1126_v24 }
 0x432   :  { %v1143_v23 = vpop.f32.mrf.mxu1 }
 0x433   :  { %v1282_v11 = vrot.slane %v1143_v23, 4 }
 0x43a   :  { %v1145_v47 = vpop.f32.mrf.mxu1 }
 0x43c   :  { %v1181_v60 = vpop.f32.mrf.mxu3 }
 0x43d   :  { %v1162_v25 = vpop.f32.mrf.mxu2  ;;  %v1280_v48 = vrot.slane %v1181_v60, 4  ;;  %v1283_v49 = vsel %vm146_vm8, %v1181_v60, %v1282_v11 }
 0x43e   :  { %v1294_v9 = vrot.slane %v1162_v25, 4  ;;  %v1291_v50 = vperm.slane %v1283_v49, %v3959_v53  ;;  %v1200_v51 = vpop.f32.mrf.mxu0 }
 0x43f   :  { %v1281_v52 = vsel %vm146_vm8, %v1280_v48, %v1143_v23  ;;  %v1292_v58 = vrot.slane %v1200_v51, 4 }
 0x440   :  { %v1287_v32 = vperm.slane %v1281_v52, %v3959_v53  ;;  %v1318_v3 = vrot.slane %v1291_v50, 4  ;;  %v1295_v59 = vsel %vm146_vm8, %v1200_v51, %v1294_v9 }
 0x441   :  { %v1293_v22 = vsel %vm146_vm8, %v1292_v58, %v1162_v25  ;;  %v1303_v63 = vperm.slane %v1295_v59, %v3959_v53 }
 0x442   :  { %v1306_v1 = vrot.slane %v1287_v32, 4  ;;  %v1299_v54 = vperm.slane %v1293_v22, %v3959_v53 }
 0x443   :  { %v1316_v4 = vrot.slane %v1303_v63, 4  ;;  %v1319_v5 = vsel %vm146_vm8, %v1303_v63, %v1318_v3 }
 0x444   :  { %v1304_v6 = vrot.slane %v1299_v54, 4  ;;  %v1307_v7 = vsel %vm146_vm8, %v1299_v54, %v1306_v1  ;;  %v1327_v12 = vperm.slane %v1319_v5, %v3965_v61  ;;  %v1183_v14 = vpop.f32.mrf.mxu3 }
 0x445   :  { %v1315_v16 = vperm.slane %v1307_v7, %v3965_v61  ;;  %v1317_v18 = vsel %vm146_vm8, %v1316_v4, %v1291_v50  ;;  %v1164_v19 = vpop.f32.mrf.mxu2 }
 0x446   :  { %v1305_v43 = vsel %vm146_vm8, %v1304_v6, %v1287_v32  ;;  %v1323_v17 = vperm.slane %v1317_v18, %v3965_v61  ;;  %v1334_v20 = vrot.slane %v1327_v12, 4  ;;  %v1202_v56 = vpop.f32.mrf.mxu0 }
 0x447   :  { %v1311_v21 = vperm.slane %v1305_v43, %v3965_v61  ;;  %v1330_v26 = vrot.slane %v1315_v16, 4  ;;  %v1219_v27 = vpop.f32.mrf.mxu1 }
 0x448   :  { %v1332_v28 = vrot.slane %v1323_v17, 4  ;;  %v1335_v29 = vsel %vm146_vm8, 0.0, %v1334_v20  ;;  %v1403_v30 = vsel %vm146_vm8, %v1334_v20, %v1323_v17  ;;  %v1338_v2 = vrot.slane %v1219_v27, 4 }
 0x449   :  { %v1328_v31 = vrot.slane %v1311_v21, 4  ;;  %v1331_v33 = vsel %vm146_vm8, 0.0, %v1330_v26  ;;  %v1408_v36 = vrot.slane %v1335_v29, 4  ;;  %v1407_v0 = vperm.slane %v1403_v30, %v3959_v53 }
 0x44a   :  { %v1333_v34 = vsel %vm146_vm8, 0.0, %v1332_v28  ;;  %v1397_v35 = vrot.slane %v1331_v33, 4  ;;  %v1392_v41 = vsel %vm146_vm8, %v1330_v26, %v1311_v21 }
 0x44b   :  { %v1329_v55 = vsel %vm146_vm8, 0.0, %v1328_v31  ;;  %v1409_v57 = vsel %vm146_vm8, %v1408_v36, %v1333_v34  ;;  %v1428_v42 = vrot.slane %v1407_v0, 4  ;;  %v1396_v9 = vperm.slane %v1392_v41, %v3959_v53 }
 0x44c   :  { %v1398_v37 = vsel %vm146_vm8, %v1397_v35, %v1329_v55  ;;  %v1413_v62 = vperm.slane %v1409_v57, %v3959_v53 }
 0x44d   :  { %v1238_v8 = vpop.f32.mrf.mxu2  ;;  %v1402_v38 = vperm.slane %v1398_v37, %v3959_v53  ;;  %v1416_v6 = vrot.slane %v1396_v9, 4 }
 0x44e   :  { %v1350_v39 = vrot.slane %v1238_v8, 4  ;;  %v1257_v40 = vpop.f32.mrf.mxu3  ;;  %v1429_v32 = vsel %vm146_vm8, %v1413_v62, %v1428_v42  ;;  %v1426_v7 = vrot.slane %v1413_v62, 4 }
 0x44f   :  { %v1336_v10 = vrot.slane %v1257_v40, 4  ;;  %v1339_v15 = vsel %vm146_vm8, %v1257_v40, %v1338_v2  ;;  %v1221_v44 = vpop.f32.mrf.mxu1  ;;  %v1276_v45 = vpop.f32.mrf.mxu0  ;;  %v1414_v60 = vrot.slane %v1402_v38, 4  ;;  %v1437_v19 = vperm.slane %v1429_v32, %v3965_v61 }
 0x450   :  { %v1347_v46 = vperm.slane %v1339_v15, %v3959_v53  ;;  %v1348_v24 = vrot.slane %v1276_v45, 4  ;;  %v1351_v23 = vsel %vm146_vm8, %v1276_v45, %v1350_v39  ;;  %v1427_v56 = vsel %vm146_vm8, %v1426_v7, %v1407_v0  ;;  %v3586_v7 = vld [vmem:[%s5131_s4] sm:$0xff] }
 0x451   :  { %v1337_v47 = vsel %vm146_vm8, %v1336_v10, %v1219_v27  ;;  %v1359_v11 = vperm.slane %v1351_v23, %v3959_v53  ;;  %v1415_v1 = vsel %vm146_vm8, %v1414_v60, %v1396_v9  ;;  %v1433_v28 = vperm.slane %v1427_v56, %v3965_v61 }
 0x452   :  { %v1343_v25 = vperm.slane %v1337_v47, %v3959_v53  ;;  %v1374_v48 = vrot.slane %v1347_v46, 4  ;;  %v1349_v49 = vsel %vm146_vm8, %v1348_v24, %v1238_v8  ;;  %v1421_v20 = vperm.slane %v1415_v1, %v3965_v61 }
 0x453   :  { %v1355_v50 = vperm.slane %v1349_v49, %v3959_v53  ;;  %v1372_v51 = vrot.slane %v1359_v11, 4  ;;  %v1417_v36 = vsel %vm146_vm8, %v1402_v38, %v1416_v6  ;;  %v1438_v0 = vrot.slane %v1433_v28, 4  ;;  %v3587_v6 = vld [vmem:[%s5131_s4 + $0x8] sm:$0xff] }
 0x454   :  { %v1362_v52 = vrot.slane %v1343_v25, 4  ;;  %v1375_v58 = vsel %vm146_vm8, %v1359_v11, %v1374_v48  ;;  %v1425_v41 = vperm.slane %v1417_v36, %v3965_v61  ;;  %v1442_v42 = vrot.slane %v1437_v19, 4  ;;  %1558 = vmatpush.bf16.msra.mxu1 %v3587_v6  ;;  %v3591_v6 = vld [vmem:[%s5134_s7 + $0x8] sm:$0xff] }
 0x455   :  { %v1360_v3 = vrot.slane %v1355_v50, 4  ;;  %v1373_v59 = vsel %vm146_vm8, %v1372_v51, %v1347_v46  ;;  %v1383_v22 = vperm.slane %v1375_v58, %v3965_v61  ;;  %v1240_v63 = vpop.f32.mrf.mxu2  ;;  %v1439_v40 = vsel %vm146_vm8, %v1438_v0, %v1421_v20 }
 0x456   :  { %v1363_v54 = vsel %vm146_vm8, %v1355_v50, %v1362_v52  ;;  %v1379_v4 = vperm.slane %v1373_v59, %v3965_v61  ;;  %v1259_v5 = vpop.f32.mrf.mxu3  ;;  %v1444_v60 = vrot.slane %v1425_v41, 4  ;;  %v1443_v48 = vsel %vm146_vm8, %v1442_v42, %v1425_v41  ;;  %v3589_v41 = vld [vmem:[%s5133_s6 + $0x8] sm:$0xff] }
 0x457   :  { %v1361_v12 = vsel %vm146_vm8, %v1360_v3, %v1343_v25  ;;  %v1371_v14 = vperm.slane %v1363_v54, %v3965_v61  ;;  %v1390_v16 = vrot.slane %v1383_v22, 4  ;;  %v1278_v18 = vpop.f32.mrf.mxu0  ;;  %v1440_v49 = vrot.slane %v1421_v20, 4  ;;  %1631 = vmatpush.bf16.msra.mxu2 %v3589_v41 }
 0x458   :  { %v1367_v43 = vperm.slane %v1361_v12, %v3965_v61  ;;  %v1388_v17 = vrot.slane %v1379_v4, 4  ;;  %v1445_v3 = vsel %vm146_vm8, %v1437_v19, %v1444_v60  ;;  %1559 = vmatpush.bf16.msra.mxu1 %v3586_v7 }
 0x459   :  { %v1386_v21 = vrot.slane %v1371_v14, 4  ;;  %v1391_v26 = vsel %vm146_vm8, 0.0, %v1390_v16  ;;  %v1457_v27 = vsel %vm146_vm8, %v1390_v16, %v1379_v4  ;;  %v1441_v54 = vsel %vm146_vm8, %v1433_v28, %v1440_v49  ;;  %v45_v49 = vld [vmem:[%s5132_s5] sm:$0x3] }
 0x45a   :  { %v1384_v29 = vrot.slane %v1367_v43, 4  ;;  %v1389_v30 = vsel %vm146_vm8, 0.0, %v1388_v17  ;;  %v1461_v31 = vperm.slane %v1457_v27, %v3959_v53  ;;  %v1462_v33 = vrot.slane %v1391_v26, 4 }
 0x45b   :  { %v1387_v34 = vsel %vm146_vm8, 0.0, %v1386_v21  ;;  %v1446_v35 = vsel %vm146_vm8, %v1386_v21, %v1367_v43 }
 0x45c   :  { %v1451_v55 = vrot.slane %v1387_v34, 4  ;;  %v1463_v37 = vsel %vm146_vm8, %v1462_v33, %v1389_v30  ;;  %v1482_v57 = vrot.slane %v1461_v31, 4  ;;  %v1385_v2 = vsel %vm146_vm8, 0.0, %v1384_v29  ;;  %v3822_v34 = vld [vmem:[%s5127_s0] sm:$0xff] }
 0x45d   :  { %v1467_v8 = vperm.slane %v1463_v37, %v3959_v53  ;;  %v1450_v39 = vperm.slane %v1446_v35, %v3959_v53  ;;  %v3823_v37 = vld [vmem:[%s5127_s0 + $0x8] sm:$0xff] }
 0x45e   :  { %v1452_v10 = vsel %vm146_vm8, %v1451_v55, %v1385_v2 }
 0x45f   :  { %v1456_v38 = vperm.slane %v1452_v10, %v3959_v53  ;;  %v1470_v15 = vrot.slane %v1450_v39, 4  ;;  %v1483_v44 = vsel %vm146_vm8, %v1467_v8, %v1482_v57  ;;  %v1480_v45 = vrot.slane %v1467_v8, 4  ;;  %v3588_v10 = vld [vmem:[%s5133_s6] sm:$0xff] }
 0x460   :  { %v1491_v62 = vperm.slane %v1483_v44, %v3965_v61  ;;  %1632 = vmatpush.bf16.msra.mxu2 %v3588_v10 }
 0x461   :  { %v1471_v46 = vsel %vm146_vm8, %v1456_v38, %v1470_v15  ;;  %v1468_v24 = vrot.slane %v1456_v38, 4  ;;  %v1481_v23 = vsel %vm146_vm8, %v1480_v45, %v1461_v31 }
 0x462   :  { %v1479_v47 = vperm.slane %v1471_v46, %v3965_v61  ;;  %v1496_v11 = vrot.slane %v1491_v62, 4  ;;  %v1487_v25 = vperm.slane %v1481_v23, %v3965_v61 }
 0x463   :  { %v1469_v9 = vsel %vm146_vm8, %v1468_v24, %v1450_v39 }
 0x464   :  { %v1497_v50 = vsel %vm146_vm8, %v1496_v11, %v1479_v47  ;;  %v1498_v51 = vrot.slane %v1479_v47, 4  ;;  %v1475_v52 = vperm.slane %v1469_v9, %v3965_v61  ;;  %v1492_v58 = vrot.slane %v1487_v25, 4 }
 0x465   :  { %v3662_v32 = vpack.i.bf16 %v1497_v50, %v1443_v48 }
 0x466   :  { %v1499_v59 = vsel %vm146_vm8, %v1491_v62, %v1498_v51  ;;  %v1494_v22 = vrot.slane %v1475_v52, 4  ;;  %v1493_v63 = vsel %vm146_vm8, %v1492_v58, %v1475_v52  ;;  %v1602_v52 = vperm.slane %v45_v49, 0 }
 0x467   :  { %3663 = vrot.lane.b32.xlu0 %v3662_v32, %s3868_s24  ;;  %v3667_v1 = vpack.i.bf16 %v1499_v59, %v1445_v3 }
 0x468   :  { %v1495_v4 = vsel %vm146_vm8, %v1487_v25, %v1494_v22 }
 0x469   :  { %3668 = vrot.lane.b32.xlu1 %v3667_v1, %s3869_s25  ;;  %v3657_v5 = vpack.i.bf16 %v1495_v4, %v1441_v54  ;;  %v3593_v1 = vld [vmem:[%s5134_s7 + $0x18] sm:$0xff] }
 0x46a   :  { %1708 = vmatpush.bf16.msra.mxu3 %v3593_v1 }
 0x46b   :  { %3658 = vrot.lane.b32.xlu2 %v3657_v5, %s3870_s26  ;;  %v3592_v5 = vld [vmem:[%s5134_s7 + $0x10] sm:$0xff] }
 0x46e   :  { %1709 = vmatpush.bf16.msra.mxu3 %v3592_v5 }
 0x472   :  { %1710 = vmatpush.bf16.msra.mxu3 %v3591_v6 }
 0x4c5   :  { %v3659_v12 = vpop.permute.xlu2 %3658 }
 0x4c6   :  { %v3661_v14 = vunpack.i.h.bf16 %v3659_v12  ;;  %v3660_v16 = vunpack.i.l.bf16 %v3659_v12 }
 0x4c8   :  { %v1524_v17 = vsel %vm878_vm9, %v1439_v40, %v3660_v16  ;;  %v1525_v20 = vsel %vm878_vm9, %v1493_v63, %v3661_v14 }
 0x4d9   :  { %v3664_v18 = vpop.permute.xlu0 %3663 }
 0x4da   :  { %v3666_v19 = vunpack.i.h.bf16 %v3664_v18  ;;  %v3665_v43 = vunpack.i.l.bf16 %v3664_v18  ;;  %v3590_v18 = vld [vmem:[%s5134_s7] sm:$0xff] }
 0x4db   :  { %v3669_v56 = vpop.permute.xlu1 %3668  ;;  %1711 = vmatpush.bf16.msra.mxu3 %v3590_v18 }
 0x4dc   :  { %v1527_v21 = vsel %vm1526_vm11, %v1524_v17, %v3665_v43  ;;  %v1528_v26 = vsel %vm1526_vm11, %v1525_v20, %v3666_v19  ;;  %v3671_v27 = vunpack.i.h.bf16 %v3669_v56  ;;  %v3670_v28 = vunpack.i.l.bf16 %v3669_v56 }
 0x4de   :  { %v1530_v29 = vsel %vm1529_vm12, %v1527_v21, %v3670_v28  ;;  %v1531_v30 = vsel %vm1529_vm12, %v1528_v26, %v3671_v27 }
 0x4df   :  { %v1532_v31 = vpack.c.bf16 %v1531_v30, %v1530_v29 }
 0x4e1   :  { %3477 = vmatmul.msk.bf16.vlgmr.msra.gmra.mxu1 %vm48_vm0, %v1532_v31 }
 0x55e   :  { %v1561_v33 = vpop.f32.mrf.mxu1 }
 0x55f   :  { %v4475_v35 = vadd.f32 %v3822_v34, %v1561_v33 }
 0x561   :  { %v1568_v36 = vmul.f32 %v4475_v35, %v4475_v35 }
 0x563   :  { %v1570_v0 = vsel %vm48_vm0, %v1568_v36, 0.0 }
 0x564   :  { %1571 = vadd.xlane.f32.xlu0 %v1570_v0 }
 0x566   :  { %v1563_v55 = vpop.f32.mrf.mxu1 }
 0x567   :  { %v4483_v57 = vadd.f32 %v3823_v37, %v1563_v55 }
 0x569   :  { %v1569_v2 = vmul.f32 %v4483_v57, %v4483_v57 }
 0x56b   :  { %v1573_v8 = vsel %vm48_vm0, %v1569_v2, 0.0 }
 0x56c   :  { %1574 = vadd.xlane.f32.xlu2 %v1573_v8 }
 0x5d7   :  { %v1572_v39 = vpop.xlane.xlu0 %1571 }
 0x5d8   :  { %v1576_v40 = vmul.f32 %v1572_v39, %v3934_v13 }
 0x5da   :  { %v1578_v42 = vadd.f32 1e-06, %v1576_v40 }
 0x5dc   :  { %3766 = vrsqrt.f32 %v1578_v42  ;;  %vm1586_vm14 = vweird.f32 %v1578_v42 }
 0x5df   :  { %v1575_v38 = vpop.xlane.xlu2 %1574 }
 0x5e0   :  { %v1577_v15 = vmul.f32 %v1575_v38, %v3934_v13 }
 0x5e2   :  { %v3767_v44 = vpop.eup %3766  ;;  %v1579_v45 = vadd.f32 1e-06, %v1577_v15 }
 0x5e3   :  { %v1581_v62 = vmul.f32 %v3767_v44, %v1578_v42  ;;  %vm1587_vm13 = vweird.f32 %v3767_v44 }
 0x5e4   :  { %3768 = vrsqrt.f32 %v1579_v45  ;;  %vm1588_vm15 = vmor %vm1586_vm14, %vm1587_vm13  ;;  %vm1596_vm2 = vweird.f32 %v1579_v45 }
 0x5e5   :  { %v1582_v46 = vmul.f32 %v3767_v44, %v1581_v62 }
 0x5e7   :  { %v1583_v24 = vmul.f32 0.5, %v1582_v46 }
 0x5e9   :  { %v1584_v23 = vsub.f32 1.5, %v1583_v24 }
 0x5ea   :  { %v3769_v47 = vpop.eup %3768 }
 0x5eb   :  { %v1591_v11 = vmul.f32 %v3769_v47, %v1579_v45  ;;  %v1585_v60 = vmul.f32 %v3767_v44, %v1584_v23  ;;  %vm1597_vm1 = vweird.f32 %v3769_v47  ;;  %v3595_v45 = vld [vmem:[%s5130_s3 + $0x18] sm:$0xff] }
 0x5ec   :  { %vm1598_vm3 = vmor %vm1596_vm2, %vm1597_vm1  ;;  %1784 = vmatpush.bf16.msrb.mxu0 %v3595_v45 }
 0x5ed   :  { %v1592_v25 = vmul.f32 %v3769_v47, %v1591_v11  ;;  %v1589_v9 = vsel %vm1588_vm15, %v3767_v44, %v1585_v60 }
 0x5ee   :  { %v1600_v58 = vmul.f32 %v1589_v9, %v4475_v35 }
 0x5ef   :  { %v1593_v48 = vmul.f32 0.5, %v1592_v25 }
 0x5f0   :  { %v1603_v59 = vmul.f32 %v1602_v52, %v1600_v58 }
 0x5f1   :  { %v1594_v50 = vsub.f32 1.5, %v1593_v48 }
 0x5f3   :  { %v1595_v51 = vmul.f32 %v3769_v47, %v1594_v50 }
 0x5f5   :  { %v1599_v32 = vsel %vm1598_vm3, %v3769_v47, %v1595_v51 }
 0x5f6   :  { %v1601_v3 = vmul.f32 %v1599_v32, %v4483_v57 }
 0x5f8   :  { %v1604_v22 = vmul.f32 %v1602_v52, %v1601_v3 }
 0x5fa   :  { %v1605_v63 = vpack.c.bf16 %v1604_v22, %v1603_v59  ;;  %v3824_v59 = vld [vmem:[%s5129_s2] sm:$0x3] }
 0x5fb   :  { %v1754_v22 = vperm.slane %v3824_v59, 1 }
 0x5fc   :  { %3486 = vmatmul.msk.bf16.vlgmr.msra.gmra.mxu2 %vm48_vm0, %v1605_v63 }
 0x67f   :  { %v1634_v54 = vpop.f32.mrf.mxu2 }
 0x680   :  { %1659 = vrot.lane.b32.xlu1 %v1634_v54, %s3867_s23  ;;  %v1641_v7 = vmul.f32 0.044715, %v1634_v54  ;;  %v1639_v31 = vmul.f32 0.5, %v1634_v54 }
 0x682   :  { %v1643_v14 = vmul.f32 %v1641_v7, %v1634_v54 }
 0x684   :  { %v1645_v19 = vmul.f32 %v1643_v14, %v1634_v54 }
 0x686   :  { %v1647_v17 = vadd.f32 %v1645_v19, %v1634_v54 }
 0x687   :  { %v1636_v4 = vpop.f32.mrf.mxu2 }
 0x688   :  { %1661 = vrot.lane.b32.xlu1 %v1636_v4, %s3867_s23  ;;  %v1642_v12 = vmul.f32 0.044715, %v1636_v4  ;;  %v1649_v56 = vmul.f32 0.7978846, %v1647_v17  ;;  %v1640_v33 = vmul.f32 0.5, %v1636_v4 }
 0x68a   :  { %v1644_v16 = vmul.f32 %v1642_v12, %v1636_v4  ;;  %3770 = vtanh.f32 %v1649_v56 }
 0x68c   :  { %v1646_v43 = vmul.f32 %v1644_v16, %v1636_v4 }
 0x68e   :  { %v1648_v20 = vadd.f32 %v1646_v43, %v1636_v4 }
 0x690   :  { %v1650_v21 = vmul.f32 0.7978846, %v1648_v20  ;;  %v3771_v26 = vpop.eup %3770 }
 0x691   :  { %v1653_v29 = vadd.f32 1.0, %v3771_v26 }
 0x692   :  { %3772 = vtanh.f32 %v1650_v21 }
 0x693   :  { %v1655_v34 = vmul.f32 %v1653_v29, %v1639_v31 }
 0x698   :  { %v3773_v27 = vpop.eup %3772 }
 0x699   :  { %v1654_v30 = vadd.f32 1.0, %v3773_v27 }
 0x69b   :  { %v1656_v36 = vmul.f32 %v1654_v30, %v1640_v33 }
 0x6f2   :  { %v1660_v28 = vpop.permute.xlu1 %1659 }
 0x6f3   :  { %v1665_v55 = vmul.f32 %v1660_v28, %v1655_v34 }
 0x6fa   :  { %v1662_v0 = vpop.permute.xlu1 %1661 }
 0x6fb   :  { %v1666_v37 = vmul.f32 %v1662_v0, %v1656_v36 }
 0x6fd   :  { %v1667_v2 = vpack.c.bf16 %v1666_v37, %v1665_v55 }
 0x6ff   :  { %3503 = vmatmul.msk.bf16.vlgmr.msra.gmra.mxu3 %vm1700_vm4, %v1667_v2 }
 0x782   :  { %v1713_v8 = vpop.f32.mrf.mxu3 }
 0x783   :  { %v4518_v39 = vadd.f32 %v1713_v8, %v4475_v35 }
 0x785   :  { %v1720_v40 = vmul.f32 %v4518_v39, %v4518_v39 }
 0x787   :  { %v1722_v41 = vsel %vm48_vm0, %v1720_v40, 0.0 }
 0x788   :  { %1723 = vadd.xlane.f32.xlu1 %v1722_v41 }
 0x78a   :  { %v1715_v42 = vpop.f32.mrf.mxu3 }
 0x78b   :  { %v4524_v10 = vadd.f32 %v1715_v42, %v4483_v57  ;;  %v3594_v57 = vld [vmem:[%s5130_s3 + $0x10] sm:$0xff] }
 0x78c   :  { %1785 = vmatpush.bf16.msrb.mxu0 %v3594_v57 }
 0x78d   :  { %v1721_v38 = vmul.f32 %v4524_v10, %v4524_v10 }
 0x78f   :  { %v1725_v15 = vsel %vm48_vm0, %v1721_v38, 0.0 }
 0x790   :  { %1726 = vadd.xlane.f32.xlu0 %v1725_v15 }
 0x7fb   :  { %v1724_v44 = vpop.xlane.xlu1 %1723 }
 0x7fc   :  { %v1728_v35 = vmul.f32 %v1724_v44, %v3934_v13 }
 0x7fe   :  { %v1730_v62 = vadd.f32 1e-06, %v1728_v35 }
 0x800   :  { %3774 = vrsqrt.f32 %v1730_v62  ;;  %vm1738_vm6 = vweird.f32 %v1730_v62 }
 0x803   :  { %v1727_v46 = vpop.xlane.xlu0 %1726 }
 0x804   :  { %v1729_v24 = vmul.f32 %v1727_v46, %v3934_v13 }
 0x806   :  { %v3775_v23 = vpop.eup %3774  ;;  %v1731_v47 = vadd.f32 1e-06, %v1729_v24 }
 0x807   :  { %v1733_v11 = vmul.f32 %v3775_v23, %v1730_v62  ;;  %vm1739_vm5 = vweird.f32 %v3775_v23 }
 0x808   :  { %3776 = vrsqrt.f32 %v1731_v47  ;;  %vm1740_vm7 = vmor %vm1738_vm6, %vm1739_vm5  ;;  %vm1748_vm14 = vweird.f32 %v1731_v47 }
 0x809   :  { %v1734_v60 = vmul.f32 %v3775_v23, %v1733_v11 }
 0x80b   :  { %v1735_v25 = vmul.f32 0.5, %v1734_v60 }
 0x80d   :  { %v1736_v48 = vsub.f32 1.5, %v1735_v25 }
 0x80e   :  { %v3777_v49 = vpop.eup %3776 }
 0x80f   :  { %v1743_v9 = vmul.f32 %v3777_v49, %v1731_v47  ;;  %v1737_v50 = vmul.f32 %v3775_v23, %v1736_v48  ;;  %vm1749_vm13 = vweird.f32 %v3777_v49 }
 0x810   :  { %vm1750_vm15 = vmor %vm1748_vm14, %vm1749_vm13 }
 0x811   :  { %v1744_v51 = vmul.f32 %v3777_v49, %v1743_v9  ;;  %v1741_v58 = vsel %vm1740_vm7, %v3775_v23, %v1737_v50 }
 0x812   :  { %v1752_v63 = vmul.f32 %v1741_v58, %v4518_v39 }
 0x813   :  { %v1745_v52 = vmul.f32 0.5, %v1744_v51 }
 0x814   :  { %v1755_v4 = vmul.f32 %v1754_v22, %v1752_v63 }
 0x815   :  { %v1746_v32 = vsub.f32 1.5, %v1745_v52 }
 0x817   :  { %v1747_v3 = vmul.f32 %v3777_v49, %v1746_v32 }
 0x819   :  { %v1751_v1 = vsel %vm1750_vm15, %v3777_v49, %v1747_v3 }
 0x81a   :  { %v1753_v54 = vmul.f32 %v1751_v1, %v4524_v10 }
 0x81c   :  { %v1756_v5 = vmul.f32 %v1754_v22, %v1753_v54 }
 0x81e   :  { %v1757_v6 = vpack.c.bf16 %v1756_v5, %v1755_v4 }
 0x820   :  { %3516 = vmatmul.msk.bf16.vlgmr.msrb.gmra.mxu0 %vm48_vm0, %v1757_v6 }
 0x89d   :  { %v1787_v7 = vpop.f32.mrf.mxu0 }
 0x89e   :  { %1806 = vrot.lane.b32.xlu1 %v1787_v7, %s3861_s19  ;;  %1800 = vrot.lane.b32.xlu0 %v1787_v7, %s3863_s21  ;;  %v1814_v17 = vrot.slane %v1787_v7, 4 }
 0x89f   :  { %1794 = vrot.lane.b32.xlu2 %v1787_v7, %s3862_s20 }
 0x8a5   :  { %v4546_v12 = vpop.f32.mrf.mxu0 }
 0x8a6   :  { %1802 = vrot.lane.b32.xlu0 %v4546_v12, %s3863_s21 }
 0x8a7   :  { %1796 = vrot.lane.b32.xlu2 %v4546_v12, %s3862_s20 }
 0x8af   :  { %1808 = vrot.lane.b32.xlu2 %v4546_v12, %s3861_s19 }
 0x8f9   :  { %v1795_v14 = vpop.permute.xlu2 %1794 }
 0x8fa   :  { %v4554_v16 = vpack.i.bf16 %v1795_v14, %v1787_v7  ;;  %v1826_v43 = vrot.slane %v1795_v14, 4 }
 0x8fc   :  { %3673 = vrot.lane.b32.xlu0 %v4554_v16, %s3865_s22 }
 0x901   :  { %v4558_v18 = vpop.permute.xlu2 %1796 }
 0x902   :  { %v4562_v19 = vpack.i.bf16 %v4558_v18, %v4546_v12 }
 0x904   :  { %3683 = vrot.lane.b32.xlu0 %v4562_v19, %s3865_s22 }
 0x909   :  { %v4586_v45 = vpop.permute.xlu2 %1808 }
 0x910   :  { %v1807_v20 = vpop.permute.xlu1 %1806  ;;  %v1801_v56 = vpop.permute.xlu0 %1800 }
 0x911   :  { %v1824_v21 = vrot.slane %v1807_v20, 4  ;;  %v1827_v26 = vsel %vm146_vm8, %v1807_v20, %v1826_v43  ;;  %v1812_v27 = vrot.slane %v1801_v56, 4  ;;  %v1815_v28 = vsel %vm146_vm8, %v1801_v56, %v1814_v17 }
 0x912   :  { %v1835_v29 = vperm.slane %v1827_v26, %v3959_v53  ;;  %v1823_v30 = vperm.slane %v1815_v28, %v3959_v53  ;;  %v4570_v31 = vpack.i.bf16 %v1807_v20, %v1801_v56 }
 0x913   :  { %v1825_v33 = vsel %vm146_vm8, %v1824_v21, %v1795_v14  ;;  %v1813_v34 = vsel %vm146_vm8, %v1812_v27, %v1787_v7 }
 0x914   :  { %v1831_v36 = vperm.slane %v1825_v33, %v3959_v53  ;;  %v1848_v0 = vrot.slane %v1835_v29, 4  ;;  %v1819_v55 = vperm.slane %v1813_v34, %v3959_v53  ;;  %v1850_v37 = vrot.slane %v1823_v30, 4  ;;  %3678 = vrot.lane.b32.xlu2 %v4570_v31, %s3865_s22 }
 0x916   :  { %v1836_v2 = vrot.slane %v1831_v36, 4  ;;  %v1838_v8 = vrot.slane %v1819_v55, 4  ;;  %v1849_v40 = vsel %vm146_vm8, %v1848_v0, %v1823_v30  ;;  %v1851_v41 = vsel %vm146_vm8, %v1835_v29, %v1850_v37 }
 0x917   :  { %v1855_v42 = vperm.slane %v1849_v40, %v3965_v61  ;;  %v1859_v38 = vperm.slane %v1851_v41, %v3965_v61  ;;  %v1870_v41 = vrot.slane %v4546_v12, 4 }
 0x918   :  { %v1837_v15 = vsel %vm146_vm8, %v1836_v2, %v1819_v55  ;;  %v1839_v44 = vsel %vm146_vm8, %v1831_v36, %v1838_v8  ;;  %v4584_v35 = vpop.permute.xlu0 %1802 }
 0x919   :  { %v1843_v62 = vperm.slane %v1837_v15, %v3965_v61  ;;  %v1847_v57 = vperm.slane %v1839_v44, %v3965_v61  ;;  %v1864_v46 = vrot.slane %v1855_v42, 4  ;;  %v1866_v24 = vrot.slane %v1859_v38, 4 }
 0x91a   :  { %v4592_v23 = vpack.i.bf16 %v4586_v45, %v4584_v35 }
 0x91b   :  { %v1860_v47 = vrot.slane %v1843_v62, 4  ;;  %v1862_v11 = vrot.slane %v1847_v57, 4  ;;  %v1867_v60 = vsel %vm146_vm8, 0.0, %v1866_v24  ;;  %v1935_v25 = vsel %vm146_vm8, %v1866_v24, %v1855_v42 }
 0x91c   :  { %v1940_v48 = vrot.slane %v1867_v60, 4  ;;  %3688 = vrot.lane.b32.xlu1 %v4592_v23, %s3865_s22  ;;  %v1865_v9 = vsel %vm146_vm8, 0.0, %v1864_v46  ;;  %v1939_v51 = vperm.slane %v1935_v25, %v3959_v53  ;;  %v1871_v57 = vsel %vm146_vm8, %v4584_v35, %v1870_v41 }
 0x91d   :  { %v1863_v49 = vsel %vm146_vm8, 0.0, %v1862_v11  ;;  %v1924_v50 = vsel %vm146_vm8, %v1862_v11, %v1843_v62  ;;  %v1861_v3 = vsel %vm146_vm8, 0.0, %v1860_v47  ;;  %v1868_v62 = vrot.slane %v4584_v35, 4 }
 0x91e   :  { %v1928_v52 = vperm.slane %v1924_v50, %v3959_v53  ;;  %v1929_v58 = vrot.slane %v1863_v49, 4  ;;  %v1941_v32 = vsel %vm146_vm8, %v1940_v48, %v1865_v9  ;;  %v1960_v22 = vrot.slane %v1939_v51, 4 }
 0x91f   :  { %v1945_v59 = vperm.slane %v1941_v32, %v3959_v53  ;;  %v1882_v9 = vrot.slane %v4558_v18, 4  ;;  %v1880_v35 = vrot.slane %v4586_v45, 4 }
 0x920   :  { %v1930_v63 = vsel %vm146_vm8, %v1929_v58, %v1861_v3  ;;  %v1948_v54 = vrot.slane %v1928_v52, 4  ;;  %v1869_v3 = vsel %vm146_vm8, %v1868_v62, %v4546_v12 }
 0x921   :  { %v1934_v1 = vperm.slane %v1930_v63, %v3959_v53  ;;  %v1961_v4 = vsel %vm146_vm8, %v1945_v59, %v1960_v22  ;;  %v1958_v14 = vrot.slane %v1945_v59, 4  ;;  %v1883_v32 = vsel %vm146_vm8, %v4586_v45, %v1882_v9 }
 0x922   :  { %v1969_v7 = vperm.slane %v1961_v4, %v3965_v61  ;;  %v1879_v59 = vperm.slane %v1871_v57, %v3959_v53  ;;  %v1881_v12 = vsel %vm146_vm8, %v1880_v35, %v4558_v18 }
 0x923   :  { %v1946_v5 = vrot.slane %v1934_v1, 4  ;;  %v1949_v6 = vsel %vm146_vm8, %v1934_v1, %v1948_v54  ;;  %v1959_v27 = vsel %vm146_vm8, %v1958_v14, %v1939_v51 }
 0x924   :  { %v1957_v43 = vperm.slane %v1949_v6, %v3965_v61  ;;  %v1974_v20 = vrot.slane %v1969_v7, 4  ;;  %v1965_v29 = vperm.slane %v1959_v27, %v3965_v61  ;;  %v1906_v27 = vrot.slane %v1879_v59, 4 }
 0x925   :  { %v1947_v17 = vsel %vm146_vm8, %v1946_v5, %v1928_v52 }
 0x926   :  { %v1953_v56 = vperm.slane %v1947_v17, %v3965_v61  ;;  %v4615_v21 = vsel %vm146_vm8, %v1974_v20, %v1957_v43  ;;  %v1976_v26 = vrot.slane %v1957_v43, 4  ;;  %v1970_v33 = vrot.slane %v1965_v29, 4 }
 0x927   :  { %v1891_v20 = vperm.slane %v1883_v32, %v3959_v53 }
 0x928   :  { %v4619_v28 = vsel %vm146_vm8, %v1969_v7, %v1976_v26  ;;  %v1972_v30 = vrot.slane %v1953_v56, 4  ;;  %v4626_v36 = vsel %vm146_vm8, %v1970_v33, %v1953_v56  ;;  %v1875_v56 = vperm.slane %v1869_v3, %v3959_v53 }
 0x929   :  { %v1887_v26 = vperm.slane %v1881_v12, %v3959_v53 }
 0x92a   :  { %v4623_v34 = vsel %vm146_vm8, %v1965_v29, %v1972_v30  ;;  %v1894_v41 = vrot.slane %v1875_v56, 4 }
 0x96e   :  { %v3674_v0 = vpop.permute.xlu0 %3673  ;;  %v3679_v55 = vpop.permute.xlu2 %3678 }
 0x96f   :  { %v3676_v37 = vunpack.i.h.bf16 %v3674_v0  ;;  %v3675_v2 = vunpack.i.l.bf16 %v3674_v0  ;;  %v3681_v8 = vunpack.i.h.bf16 %v3679_v55  ;;  %v3680_v40 = vunpack.i.l.bf16 %v3679_v55 }
 0x971   :  { %v2078_v42 = vrot.slane %v3676_v37, 4  ;;  %v2066_v38 = vrot.slane %v3675_v2, 4  ;;  %v2076_v15 = vrot.slane %v3681_v8, 4  ;;  %v2064_v44 = vrot.slane %v3680_v40, 4 }
 0x973   :  { %v2077_v46 = vsel %vm146_vm8, %v2076_v15, %v3676_v37  ;;  %v2079_v24 = vsel %vm146_vm8, %v3681_v8, %v2078_v42  ;;  %v2065_v47 = vsel %vm146_vm8, %v2064_v44, %v3675_v2  ;;  %v2067_v11 = vsel %vm146_vm8, %v3680_v40, %v2066_v38 }
 0x974   :  { %v2083_v60 = vperm.slane %v2077_v46, %v3959_v53  ;;  %v2087_v25 = vperm.slane %v2079_v24, %v3959_v53  ;;  %v2071_v48 = vperm.slane %v2065_v47, %v3959_v53  ;;  %v2075_v49 = vperm.slane %v2067_v11, %v3959_v53 }
 0x975   :  { %v1892_v46 = vrot.slane %v1887_v26, 4  ;;  %v1904_v24 = vrot.slane %v1891_v20, 4  ;;  %v1907_v47 = vsel %vm146_vm8, %v1891_v20, %v1906_v27 }
 0x976   :  { %v2088_v50 = vrot.slane %v2083_v60, 4  ;;  %v2100_v51 = vrot.slane %v2087_v25, 4  ;;  %v2090_v52 = vrot.slane %v2071_v48, 4  ;;  %v2102_v58 = vrot.slane %v2075_v49, 4 }
 0x977   :  { %v1905_v9 = vsel %vm146_vm8, %v1904_v24, %v1879_v59  ;;  %v2035_v24 = vpack.c.bf16 %v4619_v28, %v4619_v28  ;;  %v2032_v28 = vpack.c.bf16 %v4626_v36, %v4626_v36 }
 0x978   :  { %v2089_v22 = vsel %vm146_vm8, %v2088_v50, %v2071_v48  ;;  %v2091_v63 = vsel %vm146_vm8, %v2083_v60, %v2090_v52  ;;  %v2101_v1 = vsel %vm146_vm8, %v2100_v51, %v2075_v49  ;;  %v2103_v54 = vsel %vm146_vm8, %v2087_v25, %v2102_v58 }
 0x979   :  { %v2095_v4 = vperm.slane %v2089_v22, %v3965_v61  ;;  %v2099_v5 = vperm.slane %v2091_v63, %v3965_v61  ;;  %v2107_v6 = vperm.slane %v2101_v1, %v3965_v61  ;;  %v2111_v45 = vperm.slane %v2103_v54, %v3965_v61 }
 0x97a   :  { %v1895_v49 = vsel %vm146_vm8, %v1887_v26, %v1894_v41  ;;  %v1893_v51 = vsel %vm146_vm8, %v1892_v46, %v1875_v56  ;;  %v1915_v52 = vperm.slane %v1907_v47, %v3965_v61  ;;  %v1911_v54 = vperm.slane %v1905_v9, %v3965_v61 }
 0x97b   :  { %v2112_v7 = vrot.slane %v2095_v4, 4  ;;  %v2114_v14 = vrot.slane %v2099_v5, 4  ;;  %v2116_v43 = vrot.slane %v2107_v6, 4  ;;  %v2118_v17 = vrot.slane %v2111_v45, 4 }
 0x97c   :  { %v1903_v59 = vperm.slane %v1895_v49, %v3965_v61  ;;  %v2034_v46 = vpack.c.bf16 %v4615_v21, %v4615_v21 }
 0x97d   :  { %v2115_v29 = vsel %vm146_vm8, 0.0, %v2114_v14  ;;  %v2119_v30 = vsel %vm146_vm8, 0.0, %v2118_v17  ;;  %v2187_v0 = vsel %vm146_vm8, %v2118_v17, %v2107_v6  ;;  %v2176_v18 = vsel %vm146_vm8, %v2114_v14, %v2095_v4  ;;  %v3684_v4 = vpop.permute.xlu0 %3683 }
 0x97e   :  { %v2181_v33 = vrot.slane %v2115_v29, 4  ;;  %v2192_v55 = vrot.slane %v2119_v30, 4  ;;  %v2113_v37 = vsel %vm146_vm8, 0.0, %v2112_v7  ;;  %v2117_v2 = vsel %vm146_vm8, 0.0, %v2116_v43 }
 0x97f   :  { %v2191_v8 = vperm.slane %v2187_v0, %v3959_v53  ;;  %v2180_v40 = vperm.slane %v2176_v18, %v3959_v53  ;;  %v1899_v7 = vperm.slane %v1893_v51, %v3965_v61  ;;  %v1922_v14 = vrot.slane %v1915_v52, 4 }
 0x980   :  { %v2182_v42 = vsel %vm146_vm8, %v2181_v33, %v2113_v37  ;;  %v2193_v38 = vsel %vm146_vm8, %v2192_v55, %v2117_v2  ;;  %v3686_v20 = vunpack.i.h.bf16 %v3684_v4  ;;  %v3685_v56 = vunpack.i.l.bf16 %v3684_v4 }
 0x981   :  { %v2186_v15 = vperm.slane %v2182_v42, %v3959_v53  ;;  %v2197_v44 = vperm.slane %v2193_v38, %v3959_v53  ;;  %v2200_v62 = vrot.slane %v2180_v40, 4  ;;  %v2212_v57 = vrot.slane %v2191_v8, 4 }
 0x982   :  { %v1918_v55 = vrot.slane %v1903_v59, 4  ;;  %v1916_v2 = vrot.slane %v1899_v7, 4  ;;  %v2134_v42 = vrot.slane %v3686_v20, 4  ;;  %v2122_v38 = vrot.slane %v3685_v56, 4 }
 0x983   :  { %v2201_v11 = vsel %vm146_vm8, %v2186_v15, %v2200_v62  ;;  %v2213_v60 = vsel %vm146_vm8, %v2197_v44, %v2212_v57  ;;  %v2198_v25 = vrot.slane %v2186_v15, 4  ;;  %v2210_v48 = vrot.slane %v2197_v44, 4 }
 0x984   :  { %v2209_v35 = vperm.slane %v2201_v11, %v3965_v61  ;;  %v2221_v50 = vperm.slane %v2213_v60, %v3965_v61  ;;  %v1919_v62 = vsel %vm146_vm8, 0.0, %v1918_v55  ;;  %v1989_v57 = vsel %vm146_vm8, %v1922_v14, %v1911_v54 }
 0x985   :  { %v2199_v58 = vsel %vm146_vm8, %v2198_v25, %v2180_v40  ;;  %v2211_v32 = vsel %vm146_vm8, %v2210_v48, %v2191_v8  ;;  %v1920_v8 = vrot.slane %v1911_v54, 4  ;;  %v1923_v40 = vsel %vm146_vm8, 0.0, %v1922_v14 }
 0x986   :  { %v2226_v3 = vrot.slane %v2221_v50, 4  ;;  %v2228_v22 = vrot.slane %v2209_v35, 4  ;;  %v2205_v63 = vperm.slane %v2199_v58, %v3965_v61  ;;  %v2217_v1 = vperm.slane %v2211_v32, %v3965_v61 }
 0x987   :  { %v1994_v48 = vrot.slane %v1923_v40, 4  ;;  %v1993_v4 = vperm.slane %v1989_v57, %v3959_v53 }
 0x988   :  { %v2227_v5 = vsel %vm146_vm8, %v2226_v3, %v2209_v35  ;;  %v2229_v6 = vsel %vm146_vm8, %v2221_v50, %v2228_v22  ;;  %v2222_v45 = vrot.slane %v2217_v1, 4  ;;  %v2224_v12 = vrot.slane %v2205_v63, 4 }
 0x989   :  { %v2286_v43 = vpack.c.bf16 %v2227_v5, %v2227_v5  ;;  %v2287_v17 = vpack.c.bf16 %v2229_v6, %v2229_v6  ;;  %v2033_v35 = vpack.c.bf16 %v4623_v34, %v4623_v34  ;;  %v1983_v50 = vrot.slane %v1919_v62, 4 }
 0x98a   :  { %v2223_v26 = vsel %vm146_vm8, %v2222_v45, %v2205_v63  ;;  %v2225_v27 = vsel %vm146_vm8, %v2217_v1, %v2224_v12  ;;  %v1917_v34 = vsel %vm146_vm8, 0.0, %v1916_v2  ;;  %v1921_v22 = vsel %vm146_vm8, 0.0, %v1920_v8 }
 0x98b   :  { %v2586_v29 = vsel %vm878_vm9, %v2286_v43, 0  ;;  %v2605_v30 = vsel %vm878_vm9, %v2287_v17, 0  ;;  %v2284_v33 = vpack.c.bf16 %v2223_v26, %v2223_v26  ;;  %v2285_v0 = vpack.c.bf16 %v2225_v27, %v2225_v27 }
 0x98c   :  { %2595 = vmatpush.bf16.xpose.msrb.mxu3 %v2586_v29  ;;  %2614 = vmatpush.bf16.xpose.msra.mxu0 %v2605_v30  ;;  %v1978_v63 = vsel %vm146_vm8, %v1918_v55, %v1899_v7  ;;  %v1995_v5 = vsel %vm146_vm8, %v1994_v48, %v1921_v22  ;;  %v1984_v7 = vsel %vm146_vm8, %v1983_v50, %v1917_v34  ;;  %v2014_v29 = vrot.slane %v1993_v4, 4 }
 0x98d   :  { %v2548_v18 = vsel %vm878_vm9, %v2284_v33, 0  ;;  %v2567_v37 = vsel %vm878_vm9, %v2285_v0, 0  ;;  %v1982_v12 = vperm.slane %v1978_v63, %v3959_v53  ;;  %v1999_v27 = vperm.slane %v1995_v5, %v3959_v53 }
 0x98e   :  { %v3689_v41 = vpop.permute.xlu1 %3688  ;;  %2557 = vmatpush.bf16.xpose.msrb.mxu1 %v2548_v18  ;;  %2576 = vmatpush.bf16.xpose.msrb.mxu2 %v2567_v37  ;;  %v1988_v37 = vperm.slane %v1984_v7, %v3959_v53 }
 0x98f   :  { %v3691_v15 = vunpack.i.h.bf16 %v3689_v41  ;;  %v3690_v44 = vunpack.i.l.bf16 %v3689_v41  ;;  %v2002_v2 = vrot.slane %v1982_v12, 4 }
 0x991   :  { %v2132_v47 = vrot.slane %v3691_v15, 4  ;;  %v2135_v11 = vsel %vm146_vm8, %v3691_v15, %v2134_v42  ;;  %v2120_v60 = vrot.slane %v3690_v44, 4  ;;  %v2123_v25 = vsel %vm146_vm8, %v3690_v44, %v2122_v38 }
 0x992   :  { %v2143_v49 = vperm.slane %v2135_v11, %v3959_v53  ;;  %v2131_v9 = vperm.slane %v2123_v25, %v3959_v53  ;;  %v2012_v38 = vrot.slane %v1999_v27, 4  ;;  %v2003_v50 = vsel %vm146_vm8, %v1988_v37, %v2002_v2 }
 0x993   :  { %v2133_v21 = vsel %vm146_vm8, %v2132_v47, %v3686_v20  ;;  %v2121_v51 = vsel %vm146_vm8, %v2120_v60, %v3685_v56  ;;  %3519 = vmatmul.msk.bf16.vlgmr.msrb.gmra.mxu3 %vm878_vm9, %v2034_v46  ;;  %3520 = vmatmul.msk.bf16.vlgmr.msra.gmra.mxu0 %vm878_vm9, %v2035_v24  ;;  %v2015_v60 = vsel %vm146_vm8, %v1999_v27, %v2014_v29 }
 0x994   :  { %v2139_v52 = vperm.slane %v2133_v21, %v3959_v53  ;;  %v2156_v58 = vrot.slane %v2143_v49, 4  ;;  %v2127_v32 = vperm.slane %v2121_v51, %v3959_v53  ;;  %v2158_v3 = vrot.slane %v2131_v9, 4 }
 0x995   :  { %3517 = vmatmul.msk.bf16.vlgmr.msrb.gmra.mxu1 %vm878_vm9, %v2032_v28  ;;  %3518 = vmatmul.msk.bf16.vlgmr.msrb.gmra.mxu2 %vm878_vm9, %v2033_v35  ;;  %v2013_v21 = vsel %vm146_vm8, %v2012_v38, %v1993_v4  ;;  %v2011_v63 = vperm.slane %v2003_v50, %v3965_v61  ;;  %v3828_v50 = vld [vmem:[%s5128_s1 + $0x8] sm:$0xff] }
 0x996   :  { %v2144_v1 = vrot.slane %v2139_v52, 4  ;;  %v2146_v59 = vrot.slane %v2127_v32, 4  ;;  %v2157_v36 = vsel %vm146_vm8, %v2156_v58, %v2131_v9  ;;  %v2159_v54 = vsel %vm146_vm8, %v2143_v49, %v2158_v3 }
 0x997   :  { %v2163_v6 = vperm.slane %v2157_v36, %v3965_v61  ;;  %v2167_v45 = vperm.slane %v2159_v54, %v3965_v61  ;;  %v2000_v9 = vrot.slane %v1988_v37, 4  ;;  %v2023_v58 = vperm.slane %v2015_v60, %v3965_v61 }
 0x998   :  { %v2145_v14 = vsel %vm146_vm8, %v2144_v1, %v2127_v32  ;;  %v2147_v43 = vsel %vm146_vm8, %v2139_v52, %v2146_v59  ;;  %v2019_v59 = vperm.slane %v2013_v21, %v3965_v61  ;;  %v2030_v29 = vrot.slane %v2011_v63, 4 }
 0x999   :  { %v2151_v17 = vperm.slane %v2145_v14, %v3965_v61  ;;  %v2155_v20 = vperm.slane %v2147_v43, %v3965_v61  ;;  %v2172_v56 = vrot.slane %v2163_v6, 4  ;;  %v2174_v26 = vrot.slane %v2167_v45, 4 }
 0x99a   :  { %v2001_v1 = vsel %vm146_vm8, %v2000_v9, %v1982_v12  ;;  %v2028_v45 = vrot.slane %v2023_v58, 4  ;;  %v2024_v27 = vrot.slane %v2019_v59, 4 }
 0x99b   :  { %v2168_v30 = vrot.slane %v2151_v17, 4  ;;  %v2170_v33 = vrot.slane %v2155_v20, 4  ;;  %v2175_v0 = vsel %vm146_vm8, 0.0, %v2174_v26  ;;  %v2241_v55 = vsel %vm146_vm8, %v2174_v26, %v2163_v6 }
 0x99c   :  { %v2246_v18 = vrot.slane %v2175_v0, 4  ;;  %v2173_v40 = vsel %vm146_vm8, 0.0, %v2172_v56  ;;  %v2245_v41 = vperm.slane %v2241_v55, %v3959_v53  ;;  %v2029_v55 = vsel %vm146_vm8, %v2028_v45, %v2011_v63 }
 0x99d   :  { %v2171_v8 = vsel %vm146_vm8, 0.0, %v2170_v33  ;;  %v2230_v42 = vsel %vm146_vm8, %v2170_v33, %v2151_v17  ;;  %v2169_v57 = vsel %vm146_vm8, 0.0, %v2168_v30  ;;  %v2007_v17 = vperm.slane %v2001_v1, %v3965_v61  ;;  %v3830_v1 = vld [vmem:[%s5128_s1 + $0x38] sm:$0xff] }
 0x99e   :  { %v2235_v15 = vrot.slane %v2171_v8, 4  ;;  %v2234_v44 = vperm.slane %v2230_v42, %v3959_v53  ;;  %v2247_v62 = vsel %vm146_vm8, %v2246_v18, %v2173_v40  ;;  %v2266_v24 = vrot.slane %v2245_v41, 4 }
 0x99f   :  { %v2251_v46 = vperm.slane %v2247_v62, %v3959_v53  ;;  %v2026_v18 = vrot.slane %v2007_v17, 4  ;;  %v2025_v2 = vsel %vm146_vm8, %v2024_v27, %v2007_v17  ;;  %v2031_v8 = vsel %vm146_vm8, %v2023_v58, %v2030_v29  ;;  %v3825_v62 = vld [vmem:[%s5128_s1 + $0x18] sm:$0xff] }
 0x9a0   :  { %v2236_v47 = vsel %vm146_vm8, %v2235_v15, %v2169_v57  ;;  %v2254_v11 = vrot.slane %v2234_v44, 4  ;;  %v2038_v40 = vpack.c.bf16 %v2029_v55, %v2029_v55  ;;  %v2036_v42 = vpack.c.bf16 %v2025_v2, %v2025_v2 }
 0x9a1   :  { %v2240_v25 = vperm.slane %v2236_v47, %v3959_v53  ;;  %v2267_v48 = vsel %vm146_vm8, %v2251_v46, %v2266_v24  ;;  %v2264_v49 = vrot.slane %v2251_v46, 4  ;;  %v2039_v38 = vpack.c.bf16 %v2031_v8, %v2031_v8  ;;  %v3826_v24 = vld [vmem:[%s5128_s1] sm:$0xff] }
 0x9a2   :  { %v2275_v35 = vperm.slane %v2267_v48, %v3965_v61  ;;  %v3827_v48 = vld [vmem:[%s5128_s1 + $0x10] sm:$0xff] }
 0x9a3   :  { %v2255_v51 = vsel %vm146_vm8, %v2240_v25, %v2254_v11  ;;  %v2252_v28 = vrot.slane %v2240_v25, 4  ;;  %v2265_v52 = vsel %vm146_vm8, %v2264_v49, %v2245_v41  ;;  %v2027_v41 = vsel %vm146_vm8, %v2019_v59, %v2026_v18 }
 0x9a4   :  { %v2263_v32 = vperm.slane %v2255_v51, %v3965_v61  ;;  %v2280_v3 = vrot.slane %v2275_v35, 4  ;;  %v2271_v34 = vperm.slane %v2265_v52, %v3965_v61  ;;  %v2037_v15 = vpack.c.bf16 %v2027_v41, %v2027_v41 }
 0x9a5   :  { %v2253_v22 = vsel %vm146_vm8, %v2252_v28, %v2234_v44 }
 0x9a6   :  { %v2281_v36 = vsel %vm146_vm8, %v2280_v3, %v2263_v32  ;;  %v2259_v54 = vperm.slane %v2253_v22, %v3965_v61  ;;  %v2276_v4 = vrot.slane %v2271_v34, 4  ;;  %v2282_v5 = vrot.slane %v2263_v32, 4  ;;  %v3829_v22 = vld [vmem:[%s5128_s1 + $0x20] sm:$0xff] }
 0x9a7   :  { %v2290_v6 = vpack.c.bf16 %v2281_v36, %v2281_v36 }
 0x9a8   :  { %v2277_v7 = vsel %vm146_vm8, %v2276_v4, %v2259_v54  ;;  %v2283_v14 = vsel %vm146_vm8, %v2275_v35, %v2282_v5  ;;  %v2278_v43 = vrot.slane %v2259_v54, 4  ;;  %v3831_v5 = vld [vmem:[%s5128_s1 + $0x30] sm:$0xff] }
 0x9a9   :  { %v2662_v20 = vsel %vm878_vm9, %v2290_v6, 0  ;;  %v2288_v12 = vpack.c.bf16 %v2277_v7, %v2277_v7  ;;  %v2291_v56 = vpack.c.bf16 %v2283_v14, %v2283_v14  ;;  %v3832_v14 = vld [vmem:[%s5128_s1 + $0x28] sm:$0xff] }
 0x9aa   :  { %2671 = vmatpush.bf16.xpose.msra.mxu3 %v2662_v20  ;;  %v2279_v26 = vsel %vm146_vm8, %v2271_v34, %v2278_v43 }
 0x9ab   :  { %v2624_v30 = vsel %vm878_vm9, %v2288_v12, 0  ;;  %v2681_v33 = vsel %vm878_vm9, %v2291_v56, 0  ;;  %v2289_v0 = vpack.c.bf16 %v2279_v26, %v2279_v26 }
 0x9ac   :  { %2633 = vmatpush.bf16.xpose.msra.mxu1 %v2624_v30  ;;  %2690 = vmatpush.bf16.xpose.msrb.mxu0 %v2681_v33 }
 0x9ad   :  { %v2643_v37 = vsel %vm878_vm9, %v2289_v0, 0 }
 0x9ae   :  { %2652 = vmatpush.bf16.xpose.msra.mxu2 %v2643_v37 }
 0x9b1   :  { %3523 = vmatmul.msk.bf16.vlgmr.msra.gmra.mxu3 %vm878_vm9, %v2038_v40 }
 0x9b3   :  { %3521 = vmatmul.msk.bf16.vlgmr.msra.gmra.mxu1 %vm878_vm9, %v2036_v42  ;;  %3524 = vmatmul.msk.bf16.vlgmr.msrb.gmra.mxu0 %vm878_vm9, %v2039_v38 }
 0x9b5   :  { %3522 = vmatmul.msk.bf16.vlgmr.msra.gmra.mxu2 %vm878_vm9, %v2037_v15 }
 0xa10   :  { %v2616_v44 = vpop.f32.mrf.mxu0 }
 0xa11   :  { %v4783_v57 = vadd.f32 %v3825_v62, %v2616_v44 }
 0xa12   :  { %v2559_v46 = vpop.f32.mrf.mxu1 }
 0xa13   :  { %v2560_v47 = vadd.f32 %v3826_v24, %v2559_v46  ;;  %v2705_v11 = vsel %vm878_vm9, %v4783_v57, -inf }
 0xa14   :  { %2706 = vmax.xlane.f32.xlu2 %v2705_v11 }
 0xa15   :  { %v2696_v60 = vsel %vm878_vm9, %v2560_v47, -inf }
 0xa16   :  { %v2597_v25 = vpop.f32.mrf.mxu3  ;;  %2697 = vmax.xlane.f32.xlu1 %v2696_v60 }
 0xa17   :  { %v2598_v49 = vadd.f32 %v3827_v48, %v2597_v25 }
 0xa18   :  { %v2578_v9 = vpop.f32.mrf.mxu2  ;;  %v2618_v35 = vpop.f32.mrf.mxu0 }
 0xa19   :  { %v2579_v21 = vadd.f32 %v3828_v50, %v2578_v9  ;;  %v2702_v28 = vsel %vm878_vm9, %v2598_v49, -inf }
 0xa1a   :  { %v2561_v51 = vpop.f32.mrf.mxu1 }
 0xa1b   :  { %v2699_v52 = vsel %vm878_vm9, %v2579_v21, -inf }
 0xa1c   :  { %2703 = vmax.xlane.f32.xlu2 %v2702_v28  ;;  %2700 = vmax.xlane.f32.xlu0 %v2699_v52 }
 0xa1e   :  { %v2599_v58 = vpop.f32.mrf.mxu3 }
 0xa20   :  { %v2580_v32 = vpop.f32.mrf.mxu2 }
 0xa30   :  { %v2635_v3 = vpop.f32.mrf.mxu1  ;;  %v2692_v34 = vpop.f32.mrf.mxu0 }
 0xa31   :  { %v2636_v63 = vadd.f32 %v3829_v22, %v2635_v3  ;;  %v4805_v59 = vadd.f32 %v3830_v1, %v2692_v34 }
 0xa33   :  { %v2717_v36 = vsel %vm878_vm9, %v4805_v59, -inf  ;;  %v2708_v54 = vsel %vm878_vm9, %v2636_v63, -inf }
 0xa34   :  { %2718 = vmax.xlane.f32.xlu0 %v2717_v36  ;;  %v2673_v4 = vpop.f32.mrf.mxu3  ;;  %2709 = vmax.xlane.f32.xlu2 %v2708_v54 }
 0xa35   :  { %v2674_v6 = vadd.f32 %v3831_v5, %v2673_v4 }
 0xa37   :  { %v2714_v20 = vsel %vm878_vm9, %v2674_v6, -inf }
 0xa38   :  { %v2637_v45 = vpop.f32.mrf.mxu1  ;;  %v2654_v7 = vpop.f32.mrf.mxu2 }
 0xa39   :  { %v2655_v43 = vadd.f32 %v3832_v14, %v2654_v7  ;;  %v2694_v17 = vpop.f32.mrf.mxu0 }
 0xa3b   :  { %v2711_v12 = vsel %vm878_vm9, %v2655_v43, -inf }
 0xa3c   :  { %v2675_v56 = vpop.f32.mrf.mxu3  ;;  %2715 = vmax.xlane.f32.xlu0 %v2714_v20  ;;  %2712 = vmax.xlane.f32.xlu1 %v2711_v12 }
 0xa40   :  { %v2656_v26 = vpop.f32.mrf.mxu2 }
 0xa4c   :  { %3698 = vrot.lane.b32.xlu2 %v4570_v31, %s3867_s23 }
 0xa50   :  { %3703 = vrot.lane.b32.xlu0 %v4562_v19, %s3867_s23 }
 0xa55   :  { %3693 = vrot.lane.b32.xlu1 %v4554_v16, %s3867_s23 }
 0xa58   :  { %3708 = vrot.lane.b32.xlu0 %v4592_v23, %s3867_s23 }
 0xa87   :  { %v2707_v27 = vpop.xlane.xlu2 %2706 }
 0xa88   :  { %v2723_v8 = vsub.f32 %v4783_v57, %v2707_v27 }
 0xa89   :  { %v2698_v29 = vpop.xlane.xlu1 %2697 }
 0xa8a   :  { %v2720_v30 = vsub.f32 %v2560_v47, %v2698_v29  ;;  %v2734_v23 = vmul.f32 1.442695, %v2723_v8 }
 0xa8c   :  { %v2728_v33 = vmul.f32 1.442695, %v2720_v30 }
 0xa8e   :  { %3778 = vpow2.f32 %v2728_v33 }
 0xa8f   :  { %v2704_v0 = vpop.xlane.xlu2 %2703  ;;  %v2701_v55 = vpop.xlane.xlu0 %2700 }
 0xa90   :  { %v2722_v18 = vsub.f32 %v2598_v49, %v2704_v0  ;;  %v2721_v37 = vsub.f32 %v2579_v21, %v2701_v55 }
 0xa92   :  { %v2732_v2 = vmul.f32 1.442695, %v2722_v18  ;;  %v2730_v31 = vmul.f32 1.442695, %v2721_v37 }
 0xa94   :  { %v4827_v19 = vpop.eup %3778  ;;  %3780 = vpow2.f32 %v2732_v2 }
 0xa95   :  { %3782 = vpow2.f32 %v2730_v31  ;;  %v2744_v16 = vsel %vm878_vm9, %v4827_v19, 0.0 }
 0xa96   :  { %2745 = vadd.xlane.f32.xlu0 %v2744_v16  ;;  %3784 = vpow2.f32 %v2734_v23 }
 0xa9a   :  { %v4831_v40 = vpop.eup %3780 }
 0xa9b   :  { %v4833_v41 = vpop.eup %3782  ;;  %v2750_v42 = vsel %vm878_vm9, %v4831_v40, 0.0 }
 0xa9c   :  { %2751 = vadd.xlane.f32.xlu1 %v2750_v42  ;;  %v2747_v38 = vsel %vm878_vm9, %v4833_v41, 0.0  ;;  %v4839_v15 = vpop.eup %3784 }
 0xa9d   :  { %2748 = vadd.xlane.f32.xlu2 %v2747_v38  ;;  %v2753_v44 = vsel %vm878_vm9, %v4839_v15, 0.0 }
 0xaa5   :  { %2754 = vadd.xlane.f32.xlu2 %v2753_v44 }
 0xaa7   :  { %v2719_v62 = vpop.xlane.xlu0 %2718  ;;  %v2710_v57 = vpop.xlane.xlu2 %2709 }
 0xaa8   :  { %v2724_v46 = vsub.f32 %v2636_v63, %v2710_v57  ;;  %v2727_v48 = vsub.f32 %v4805_v59, %v2719_v62 }
 0xaaa   :  { %v2736_v24 = vmul.f32 1.442695, %v2724_v46  ;;  %v2742_v21 = vmul.f32 1.442695, %v2727_v48 }
 0xaac   :  { %3786 = vpow2.f32 %v2736_v24 }
 0xaaf   :  { %v2716_v47 = vpop.xlane.xlu0 %2715  ;;  %v2713_v11 = vpop.xlane.xlu1 %2712 }
 0xab0   :  { %v2726_v60 = vsub.f32 %v2674_v6, %v2716_v47  ;;  %v2725_v25 = vsub.f32 %v2655_v43, %v2713_v11  ;;  %v3699_v3 = vpop.permute.xlu2 %3698 }
 0xab1   :  { %v3701_v22 = vunpack.i.h.bf16 %v3699_v3  ;;  %v3700_v63 = vunpack.i.l.bf16 %v3699_v3 }
 0xab2   :  { %v2740_v49 = vmul.f32 1.442695, %v2726_v60  ;;  %v2738_v9 = vmul.f32 1.442695, %v2725_v25  ;;  %v4844_v35 = vpop.eup %3786 }
 0xab3   :  { %v2756_v50 = vsel %vm878_vm9, %v4844_v35, 0.0  ;;  %v2328_v59 = vrot.slane %v3701_v22, 4  ;;  %v2316_v36 = vrot.slane %v3700_v63, 4 }
 0xab4   :  { %3788 = vpow2.f32 %v2740_v49  ;;  %2757 = vadd.xlane.f32.xlu0 %v2756_v50 }
 0xab5   :  { %3790 = vpow2.f32 %v2738_v9 }
 0xab6   :  { %3792 = vpow2.f32 %v2742_v21 }
 0xaba   :  { %v4848_v51 = vpop.eup %3788 }
 0xabb   :  { %v4850_v28 = vpop.eup %3790  ;;  %v2762_v52 = vsel %vm878_vm9, %v4848_v51, 0.0 }
 0xabc   :  { %2763 = vadd.xlane.f32.xlu1 %v2762_v52  ;;  %v2759_v58 = vsel %vm878_vm9, %v4850_v28, 0.0  ;;  %v4856_v32 = vpop.eup %3792 }
 0xabd   :  { %2760 = vadd.xlane.f32.xlu2 %v2759_v58  ;;  %v2765_v1 = vsel %vm878_vm9, %v4856_v32, 0.0 }
 0xac2   :  { %v3704_v34 = vpop.permute.xlu0 %3703 }
 0xac3   :  { %v3706_v4 = vunpack.i.h.bf16 %v3704_v34  ;;  %v3705_v5 = vunpack.i.l.bf16 %v3704_v34 }
 0xac4   :  { %2766 = vadd.xlane.f32.xlu1 %v2765_v1 }
 0xac5   :  { %v2386_v29 = vrot.slane %v3706_v4, 4  ;;  %v2374_v30 = vrot.slane %v3705_v5, 4 }
 0xac7   :  { %v3694_v54 = vpop.permute.xlu1 %3693 }
 0xac8   :  { %v3696_v6 = vunpack.i.h.bf16 %v3694_v54  ;;  %v3695_v45 = vunpack.i.l.bf16 %v3694_v54 }
 0xaca   :  { %v2330_v7 = vrot.slane %v3696_v6, 4  ;;  %v2317_v14 = vsel %vm146_vm8, %v2316_v36, %v3695_v45  ;;  %v2318_v43 = vrot.slane %v3695_v45, 4  ;;  %v2329_v17 = vsel %vm146_vm8, %v2328_v59, %v3696_v6  ;;  %v3709_v20 = vpop.permute.xlu0 %3708 }
 0xacb   :  { %v2323_v12 = vperm.slane %v2317_v14, %v3959_v53  ;;  %v2335_v56 = vperm.slane %v2329_v17, %v3959_v53  ;;  %v3711_v26 = vunpack.i.h.bf16 %v3709_v20  ;;  %v3710_v27 = vunpack.i.l.bf16 %v3709_v20 }
 0xacc   :  { %v2319_v33 = vsel %vm146_vm8, %v3700_v63, %v2318_v43  ;;  %v2331_v0 = vsel %vm146_vm8, %v3701_v22, %v2330_v7 }
 0xacd   :  { %v2327_v55 = vperm.slane %v2319_v33, %v3959_v53  ;;  %v2339_v18 = vperm.slane %v2331_v0, %v3959_v53  ;;  %v2340_v37 = vrot.slane %v2335_v56, 4  ;;  %v2342_v2 = vrot.slane %v2323_v12, 4 }
 0xace   :  { %v2384_v31 = vrot.slane %v3711_v26, 4  ;;  %v2372_v8 = vrot.slane %v3710_v27, 4  ;;  %v2375_v16 = vsel %vm146_vm8, %v3710_v27, %v2374_v30  ;;  %v2387_v23 = vsel %vm146_vm8, %v3711_v26, %v2386_v29 }
 0xacf   :  { %v2341_v42 = vsel %vm146_vm8, %v2340_v37, %v2323_v12  ;;  %v2343_v38 = vsel %vm146_vm8, %v2335_v56, %v2342_v2  ;;  %v2352_v44 = vrot.slane %v2339_v18, 4  ;;  %v2354_v62 = vrot.slane %v2327_v55, 4 }
 0xad0   :  { %v2347_v57 = vperm.slane %v2341_v42, %v3965_v61  ;;  %v2351_v46 = vperm.slane %v2343_v38, %v3965_v61  ;;  %v2373_v24 = vsel %vm146_vm8, %v2372_v8, %v3705_v5  ;;  %v2383_v47 = vperm.slane %v2375_v16, %v3959_v53 }
 0xad1   :  { %v2353_v11 = vsel %vm146_vm8, %v2352_v44, %v2327_v55  ;;  %v2355_v60 = vsel %vm146_vm8, %v2339_v18, %v2354_v62  ;;  %v2379_v25 = vperm.slane %v2373_v24, %v3959_v53  ;;  %v2385_v48 = vsel %vm146_vm8, %v2384_v31, %v3706_v4 }
 0xad2   :  { %v2359_v49 = vperm.slane %v2353_v11, %v3965_v61  ;;  %v2363_v9 = vperm.slane %v2355_v60, %v3965_v61  ;;  %v2364_v50 = vrot.slane %v2347_v57, 4  ;;  %v2366_v21 = vrot.slane %v2351_v46, 4 }
 0xad3   :  { %v2391_v52 = vperm.slane %v2385_v48, %v3959_v53  ;;  %v2395_v58 = vperm.slane %v2387_v23, %v3959_v53  ;;  %v2398_v3 = vrot.slane %v2379_v25, 4  ;;  %v2410_v34 = vrot.slane %v2383_v47, 4 }
 0xad4   :  { %v2365_v22 = vsel %vm146_vm8, 0.0, %v2364_v50  ;;  %v2367_v63 = vsel %vm146_vm8, 0.0, %v2366_v21  ;;  %v2368_v1 = vrot.slane %v2359_v49, 4  ;;  %v2370_v59 = vrot.slane %v2363_v9, 4 }
 0xad5   :  { %v2428_v36 = vsel %vm146_vm8, %v2366_v21, %v2347_v57  ;;  %v2433_v54 = vrot.slane %v2367_v63, 4  ;;  %v2396_v4 = vrot.slane %v2391_v52, 4  ;;  %v2399_v5 = vsel %vm146_vm8, %v2391_v52, %v2398_v3 }
 0xad6   :  { %v2369_v6 = vsel %vm146_vm8, 0.0, %v2368_v1  ;;  %v2371_v45 = vsel %vm146_vm8, 0.0, %v2370_v59  ;;  %v2432_v7 = vperm.slane %v2428_v36, %v3959_v53  ;;  %v2407_v14 = vperm.slane %v2399_v5, %v3965_v61 }
 0xad7   :  { %v2444_v43 = vrot.slane %v2371_v45, 4  ;;  %v2397_v17 = vsel %vm146_vm8, %v2396_v4, %v2379_v25  ;;  %v2408_v20 = vrot.slane %v2395_v58, 4  ;;  %v2411_v12 = vsel %vm146_vm8, %v2395_v58, %v2410_v34 }
 0xad8   :  { %v2403_v56 = vperm.slane %v2397_v17, %v3965_v61  ;;  %v2419_v26 = vperm.slane %v2411_v12, %v3965_v61  ;;  %v2422_v27 = vrot.slane %v2407_v14, 4  ;;  %v2434_v29 = vsel %vm146_vm8, %v2433_v54, %v2365_v22 }
 0xad9   :  { %v2409_v30 = vsel %vm146_vm8, %v2408_v20, %v2383_v47  ;;  %v2438_v33 = vperm.slane %v2434_v29, %v3959_v53  ;;  %v2439_v0 = vsel %vm146_vm8, %v2370_v59, %v2359_v49  ;;  %v2445_v55 = vsel %vm146_vm8, %v2444_v43, %v2369_v6 }
 0xada   :  { %v2415_v18 = vperm.slane %v2409_v30, %v3965_v61  ;;  %v2420_v37 = vrot.slane %v2403_v56, 4  ;;  %v2423_v2 = vsel %vm146_vm8, 0.0, %v2422_v27  ;;  %v2426_v31 = vrot.slane %v2419_v26, 4 }
 0xadb   :  { %v2487_v8 = vrot.slane %v2423_v2, 4  ;;  %v2443_v16 = vperm.slane %v2439_v0, %v3959_v53  ;;  %v2449_v23 = vperm.slane %v2445_v55, %v3959_v53  ;;  %v2452_v42 = vrot.slane %v2432_v7, 4 }
 0xadc   :  { %v2421_v38 = vsel %vm146_vm8, 0.0, %v2420_v37  ;;  %v2424_v44 = vrot.slane %v2415_v18, 4  ;;  %v2427_v62 = vsel %vm146_vm8, 0.0, %v2426_v31  ;;  %v2493_v57 = vsel %vm146_vm8, %v2426_v31, %v2415_v18 }
 0xadd   :  { %v2497_v46 = vperm.slane %v2493_v57, %v3959_v53  ;;  %v2498_v24 = vrot.slane %v2427_v62, 4  ;;  %v2453_v47 = vsel %vm146_vm8, %v2438_v33, %v2452_v42  ;;  %v2464_v11 = vrot.slane %v2443_v16, 4 }
 0xade   :  { %v2425_v60 = vsel %vm146_vm8, 0.0, %v2424_v44  ;;  %v2461_v25 = vperm.slane %v2453_v47, %v3965_v61  ;;  %v2450_v48 = vrot.slane %v2438_v33, 4  ;;  %v2462_v49 = vrot.slane %v2449_v23, 4 }
 0xadf   :  { %v2465_v9 = vsel %vm146_vm8, %v2449_v23, %v2464_v11  ;;  %v2482_v50 = vsel %vm146_vm8, %v2422_v27, %v2403_v56  ;;  %v2488_v21 = vsel %vm146_vm8, %v2487_v8, %v2421_v38  ;;  %v2499_v52 = vsel %vm146_vm8, %v2498_v24, %v2425_v60 }
 0xae0   :  { %v2473_v58 = vperm.slane %v2465_v9, %v3965_v61  ;;  %v2480_v3 = vrot.slane %v2461_v25, 4  ;;  %v2451_v34 = vsel %vm146_vm8, %v2450_v48, %v2432_v7  ;;  %v2463_v22 = vsel %vm146_vm8, %v2462_v49, %v2443_v16 }
 0xae1   :  { %v2457_v63 = vperm.slane %v2451_v34, %v3965_v61  ;;  %v2469_v1 = vperm.slane %v2463_v22, %v3965_v61  ;;  %v2486_v59 = vperm.slane %v2482_v50, %v3959_v53  ;;  %v2492_v36 = vperm.slane %v2488_v21, %v3959_v53 }
 0xae2   :  { %v2481_v54 = vsel %vm146_vm8, %v2473_v58, %v2480_v3  ;;  %v2478_v4 = vrot.slane %v2473_v58, 4  ;;  %v2503_v5 = vperm.slane %v2499_v52, %v3959_v53  ;;  %v2518_v6 = vrot.slane %v2497_v46, 4 }
 0xae3   :  { %v2539_v45 = vpack.c.bf16 %v2481_v54, %v2481_v54  ;;  %v2476_v14 = vrot.slane %v2457_v63, 4  ;;  %v2506_v43 = vrot.slane %v2486_v59, 4  ;;  %v2474_v7 = vrot.slane %v2469_v1, 4 }
 0xae4   :  { %v2479_v17 = vsel %vm146_vm8, %v2478_v4, %v2461_v25  ;;  %v2519_v20 = vsel %vm146_vm8, %v2503_v5, %v2518_v6  ;;  %v2504_v12 = vrot.slane %v2492_v36, 4  ;;  %v2516_v56 = vrot.slane %v2503_v5, 4 }
 0xae5   :  { %v2853_v26 = vsel %vm1130_vm10, %v2539_v45, 0  ;;  %v2477_v27 = vsel %vm146_vm8, %v2469_v1, %v2476_v14  ;;  %v2538_v29 = vpack.c.bf16 %v2479_v17, %v2479_v17  ;;  %v2507_v30 = vsel %vm146_vm8, %v2492_v36, %v2506_v43 }
 0xae6   :  { %2862 = vmatpush.bf16.msra.mxu0 %v2853_v26  ;;  %v2537_v33 = vpack.c.bf16 %v2477_v27, %v2477_v27  ;;  %v2515_v0 = vperm.slane %v2507_v30, %v3965_v61  ;;  %v2527_v55 = vperm.slane %v2519_v20, %v3965_v61  ;;  %v2475_v18 = vsel %vm146_vm8, %v2474_v7, %v2457_v63 }
 0xae7   :  { %v2834_v37 = vsel %vm1130_vm10, %v2538_v29, 0  ;;  %v2536_v2 = vpack.c.bf16 %v2475_v18, %v2475_v18  ;;  %v2505_v31 = vsel %vm146_vm8, %v2504_v12, %v2486_v59  ;;  %v2517_v8 = vsel %vm146_vm8, %v2516_v56, %v2497_v46 }
 0xae8   :  { %v2815_v16 = vsel %vm1130_vm10, %v2537_v33, 0  ;;  %2843 = vmatpush.bf16.msrb.mxu3 %v2834_v37  ;;  %v2532_v23 = vrot.slane %v2527_v55, 4  ;;  %v2511_v42 = vperm.slane %v2505_v31, %v3965_v61  ;;  %v2523_v38 = vperm.slane %v2517_v8, %v3965_v61 }
 0xae9   :  { %2824 = vmatpush.bf16.msrb.mxu2 %v2815_v16  ;;  %v2796_v44 = vsel %vm1130_vm10, %v2536_v2, 0  ;;  %v2534_v62 = vrot.slane %v2515_v0, 4 }
 0xaea   :  { %v2533_v57 = vsel %vm146_vm8, %v2532_v23, %v2515_v0  ;;  %2805 = vmatpush.bf16.msrb.mxu1 %v2796_v44  ;;  %v2528_v24 = vrot.slane %v2523_v38, 4  ;;  %v2530_v47 = vrot.slane %v2511_v42, 4 }
 0xaeb   :  { %v2542_v11 = vpack.c.bf16 %v2533_v57, %v2533_v57  ;;  %v2535_v46 = vsel %vm146_vm8, %v2527_v55, %v2534_v62 }
 0xaec   :  { %v2529_v60 = vsel %vm146_vm8, %v2528_v24, %v2511_v42  ;;  %v2543_v25 = vpack.c.bf16 %v2535_v46, %v2535_v46  ;;  %v2531_v48 = vsel %vm146_vm8, %v2523_v38, %v2530_v47 }
 0xaed   :  { %v2910_v49 = vsel %vm1130_vm10, %v2542_v11, 0  ;;  %v2540_v9 = vpack.c.bf16 %v2529_v60, %v2529_v60  ;;  %v2541_v50 = vpack.c.bf16 %v2531_v48, %v2531_v48 }
 0xaee   :  { %2919 = vmatpush.bf16.msra.mxu3 %v2910_v49  ;;  %v2929_v21 = vsel %vm1130_vm10, %v2543_v25, 0 }
 0xaef   :  { %v2872_v52 = vsel %vm1130_vm10, %v2540_v9, 0  ;;  %2938 = vmatpush.bf16.msrb.mxu0 %v2929_v21  ;;  %v2891_v58 = vsel %vm1130_vm10, %v2541_v50, 0 }
 0xaf0   :  { %2881 = vmatpush.bf16.msra.mxu1 %v2872_v52  ;;  %2900 = vmatpush.bf16.msra.mxu2 %v2891_v58 }
 0xb09   :  { %v2746_v3 = vpop.xlane.xlu0 %2745 }
 0xb0a   :  { %3794 = vrcp.f32 %v2746_v3 }
 0xb0f   :  { %v2752_v34 = vpop.xlane.xlu1 %2751 }
 0xb10   :  { %v3795_v22 = vpop.eup %3794  ;;  %3796 = vrcp.f32 %v2752_v34  ;;  %v2749_v63 = vpop.xlane.xlu2 %2748 }
 0xb11   :  { %v2776_v1 = vmul.f32 %v3795_v22, %v4827_v19  ;;  %3798 = vrcp.f32 %v2749_v63 }
 0xb13   :  { %v2784_v59 = vpack.c.bf16 %v2776_v1, %v2776_v1 }
 0xb15   :  { %3525 = vmatmul.msk.bf16.vlgmr.msrb.gmra.mxu1 %vm878_vm9, %v2784_v59 }
 0xb16   :  { %v3797_v36 = vpop.eup %3796 }
 0xb17   :  { %v3799_v54 = vpop.eup %3798  ;;  %v2778_v4 = vmul.f32 %v3797_v36, %v4831_v40 }
 0xb18   :  { %v2777_v5 = vmul.f32 %v3799_v54, %v4833_v41  ;;  %v2755_v6 = vpop.xlane.xlu2 %2754 }
 0xb19   :  { %v2786_v45 = vpack.c.bf16 %v2778_v4, %v2778_v4  ;;  %3800 = vrcp.f32 %v2755_v6 }
 0xb1a   :  { %v2785_v14 = vpack.c.bf16 %v2777_v5, %v2777_v5 }
 0xb1b   :  { %3527 = vmatmul.msk.bf16.vlgmr.msrb.gmra.mxu3 %vm878_vm9, %v2786_v45 }
 0xb1c   :  { %3526 = vmatmul.msk.bf16.vlgmr.msrb.gmra.mxu2 %vm878_vm9, %v2785_v14 }
 0xb1f   :  { %v3801_v43 = vpop.eup %3800 }
 0xb20   :  { %v2779_v19 = vmul.f32 %v3801_v43, %v4839_v15 }
 0xb22   :  { %v2787_v7 = vpack.c.bf16 %v2779_v19, %v2779_v19 }
 0xb24   :  { %3528 = vmatmul.msk.bf16.vlgmr.msra.gmra.mxu0 %vm878_vm9, %v2787_v7 }
 0xb27   :  { %v2758_v17 = vpop.xlane.xlu0 %2757 }
 0xb28   :  { %3802 = vrcp.f32 %v2758_v17 }
 0xb2e   :  { %v3803_v20 = vpop.eup %3802 }
 0xb2f   :  { %v2764_v40 = vpop.xlane.xlu1 %2763  ;;  %v2780_v41 = vmul.f32 %v3803_v20, %v4844_v35 }
 0xb30   :  { %3804 = vrcp.f32 %v2764_v40  ;;  %v2761_v12 = vpop.xlane.xlu2 %2760 }
 0xb31   :  { %3806 = vrcp.f32 %v2761_v12  ;;  %v2788_v56 = vpack.c.bf16 %v2780_v41, %v2780_v41 }
 0xb33   :  { %3529 = vmatmul.msk.bf16.vlgmr.msra.gmra.mxu1 %vm878_vm9, %v2788_v56 }
 0xb36   :  { %v3805_v26 = vpop.eup %3804 }
 0xb37   :  { %v3807_v27 = vpop.eup %3806  ;;  %v2782_v29 = vmul.f32 %v3805_v26, %v4848_v51  ;;  %v2767_v15 = vpop.xlane.xlu1 %2766 }
 0xb38   :  { %v2781_v30 = vmul.f32 %v3807_v27, %v4850_v28  ;;  %3808 = vrcp.f32 %v2767_v15 }
 0xb39   :  { %v2790_v33 = vpack.c.bf16 %v2782_v29, %v2782_v29 }
 0xb3a   :  { %v2789_v0 = vpack.c.bf16 %v2781_v30, %v2781_v30 }
 0xb3b   :  { %3531 = vmatmul.msk.bf16.vlgmr.msra.gmra.mxu3 %vm878_vm9, %v2790_v33 }
 0xb3c   :  { %3530 = vmatmul.msk.bf16.vlgmr.msra.gmra.mxu2 %vm878_vm9, %v2789_v0 }
 0xb3e   :  { %v3809_v35 = vpop.eup %3808 }
 0xb3f   :  { %v2783_v55 = vmul.f32 %v3809_v35, %v4856_v32 }
 0xb41   :  { %v2791_v18 = vpack.c.bf16 %v2783_v55, %v2783_v55 }
 0xb43   :  { %3532 = vmatmul.msk.bf16.vlgmr.msrb.gmra.mxu0 %vm878_vm9, %v2791_v18 }
 0xb92   :  { %v2807_v37 = vpop.f32.mrf.mxu1 }
 0xb93   :  { %v2946_v31 = vrot.slane %v2807_v37, 4 }
 0xb9a   :  { %v2809_v2 = vpop.f32.mrf.mxu1 }
 0xb9e   :  { %v2845_v51 = vpop.f32.mrf.mxu3 }
 0xb9f   :  { %v2826_v8 = vpop.f32.mrf.mxu2  ;;  %v2944_v16 = vrot.slane %v2845_v51, 4  ;;  %v2947_v28 = vsel %vm146_vm8, %v2845_v51, %v2946_v31 }
 0xba0   :  { %v2958_v23 = vrot.slane %v2826_v8, 4  ;;  %v2955_v42 = vperm.slane %v2947_v28, %v3959_v53 }
 0xba1   :  { %v2945_v38 = vsel %vm146_vm8, %v2944_v16, %v2807_v37  ;;  %v2864_v44 = vpop.f32.mrf.mxu0 }
 0xba2   :  { %v2951_v62 = vperm.slane %v2945_v38, %v3959_v53  ;;  %v2982_v32 = vrot.slane %v2955_v42, 4  ;;  %v2956_v57 = vrot.slane %v2864_v44, 4  ;;  %v2959_v24 = vsel %vm146_vm8, %v2864_v44, %v2958_v23 }
 0xba3   :  { %v2967_v47 = vperm.slane %v2959_v24, %v3959_v53 }
 0xba4   :  { %v2970_v11 = vrot.slane %v2951_v62, 4  ;;  %v2957_v46 = vsel %vm146_vm8, %v2956_v57, %v2826_v8 }
 0xba5   :  { %v2963_v60 = vperm.slane %v2957_v46, %v3959_v53  ;;  %v2980_v25 = vrot.slane %v2967_v47, 4  ;;  %v2983_v48 = vsel %vm146_vm8, %v2967_v47, %v2982_v32 }
 0xba6   :  { %v2991_v49 = vperm.slane %v2983_v48, %v3965_v61  ;;  %v2847_v9 = vpop.f32.mrf.mxu3 }
 0xba7   :  { %v2968_v50 = vrot.slane %v2963_v60, 4  ;;  %v2971_v21 = vsel %vm146_vm8, %v2963_v60, %v2970_v11  ;;  %v2981_v52 = vsel %vm146_vm8, %v2980_v25, %v2955_v42  ;;  %v2828_v58 = vpop.f32.mrf.mxu2 }
 0xba8   :  { %v2979_v3 = vperm.slane %v2971_v21, %v3965_v61  ;;  %v2987_v34 = vperm.slane %v2981_v52, %v3965_v61  ;;  %v2998_v22 = vrot.slane %v2991_v49, 4 }
 0xba9   :  { %v2969_v63 = vsel %vm146_vm8, %v2968_v50, %v2951_v62  ;;  %v2866_v1 = vpop.f32.mrf.mxu0 }
 0xbaa   :  { %v2975_v59 = vperm.slane %v2969_v63, %v3965_v61  ;;  %v2994_v36 = vrot.slane %v2979_v3, 4  ;;  %v2996_v54 = vrot.slane %v2987_v34, 4  ;;  %v2999_v4 = vsel %vm146_vm8, 0.0, %v2998_v22 }
 0xbab   :  { %v3072_v5 = vrot.slane %v2999_v4, 4  ;;  %v3067_v7 = vsel %vm146_vm8, %v2998_v22, %v2987_v34 }
 0xbac   :  { %v2992_v6 = vrot.slane %v2975_v59, 4  ;;  %v2995_v45 = vsel %vm146_vm8, 0.0, %v2994_v36  ;;  %v2997_v14 = vsel %vm146_vm8, 0.0, %v2996_v54  ;;  %v3056_v40 = vsel %vm146_vm8, %v2994_v36, %v2975_v59 }
 0xbad   :  { %v3061_v43 = vrot.slane %v2995_v45, 4  ;;  %v3073_v19 = vsel %vm146_vm8, %v3072_v5, %v2997_v14  ;;  %v3071_v26 = vperm.slane %v3067_v7, %v3959_v53  ;;  %v3060_v29 = vperm.slane %v3056_v40, %v3959_v53 }
 0xbae   :  { %v3077_v17 = vperm.slane %v3073_v19, %v3959_v53  ;;  %v2993_v20 = vsel %vm146_vm8, 0.0, %v2992_v6 }
 0xbaf   :  { %v3062_v41 = vsel %vm146_vm8, %v3061_v43, %v2993_v20  ;;  %v3092_v62 = vrot.slane %v3071_v26, 4  ;;  %v3080_v46 = vrot.slane %v3060_v29, 4 }
 0xbb0   :  { %v3066_v12 = vperm.slane %v3062_v41, %v3959_v53  ;;  %v3090_v56 = vrot.slane %v3077_v17, 4  ;;  %v2883_v27 = vpop.f32.mrf.mxu1 }
 0xbb1   :  { %v3002_v2 = vrot.slane %v2883_v27, 4  ;;  %v3093_v58 = vsel %vm146_vm8, %v3077_v17, %v3092_v62 }
 0xbb2   :  { %v3078_v15 = vrot.slane %v3066_v12, 4  ;;  %v3091_v30 = vsel %vm146_vm8, %v3090_v56, %v3071_v26  ;;  %v3081_v63 = vsel %vm146_vm8, %v3066_v12, %v3080_v46  ;;  %v3101_v6 = vperm.slane %v3093_v58, %v3965_v61 }
 0xbb3   :  { %v4995_v0 = vperm.slane %v3091_v30, %v3965_v61  ;;  %v3089_v19 = vperm.slane %v3081_v63, %v3965_v61 }
 0xbb4   :  { %v3079_v33 = vsel %vm146_vm8, %v3078_v15, %v3060_v29 }
 0xbb5   :  { %v4998_v35 = vperm.slane %v3079_v33, %v3965_v61  ;;  %v3102_v55 = vrot.slane %v4995_v0, 4 }
 0xbb7   :  { %v5003_v18 = vsel %vm146_vm8, %v3102_v55, %v4998_v35 }
 0xbb8   :  { %v2885_v37 = vpop.f32.mrf.mxu1 }
 0xbbe   :  { %v2921_v31 = vpop.f32.mrf.mxu3 }
 0xbbf   :  { %v2902_v51 = vpop.f32.mrf.mxu2  ;;  %v3000_v8 = vrot.slane %v2921_v31, 4  ;;  %v3003_v16 = vsel %vm146_vm8, %v2921_v31, %v3002_v2  ;;  %v3106_v2 = vrot.slane %v3101_v6, 4  ;;  %v3108_v31 = vrot.slane %v3089_v19, 4 }
 0xbc0   :  { %v3014_v28 = vrot.slane %v2902_v51, 4  ;;  %v3011_v23 = vperm.slane %v3003_v16, %v3959_v53  ;;  %v2940_v42 = vpop.f32.mrf.mxu0 }
 0xbc1   :  { %v3001_v38 = vsel %vm146_vm8, %v3000_v8, %v2883_v27  ;;  %v3012_v44 = vrot.slane %v2940_v42, 4 }
 0xbc2   :  { %v3007_v32 = vperm.slane %v3001_v38, %v3959_v53  ;;  %v3038_v57 = vrot.slane %v3011_v23, 4  ;;  %v3015_v24 = vsel %vm146_vm8, %v2940_v42, %v3014_v28  ;;  %v3104_v38 = vrot.slane %v4998_v35, 4 }
 0xbc3   :  { %v3013_v47 = vsel %vm146_vm8, %v3012_v44, %v2902_v51  ;;  %v3023_v11 = vperm.slane %v3015_v24, %v3959_v53 }
 0xbc4   :  { %v3026_v60 = vrot.slane %v3007_v32, 4  ;;  %v3019_v25 = vperm.slane %v3013_v47, %v3959_v53  ;;  %v3107_v47 = vsel %vm146_vm8, %v3106_v2, %v3089_v19 }
 0xbc5   :  { %v3036_v48 = vrot.slane %v3023_v11, 4  ;;  %v3039_v49 = vsel %vm146_vm8, %v3023_v11, %v3038_v57  ;;  %v3109_v11 = vsel %vm146_vm8, %v3101_v6, %v3108_v31 }
 0xbc6   :  { %v3024_v9 = vrot.slane %v3019_v25, 4  ;;  %v3027_v50 = vsel %vm146_vm8, %v3019_v25, %v3026_v60  ;;  %v3047_v21 = vperm.slane %v3039_v49, %v3965_v61  ;;  %v2923_v52 = vpop.f32.mrf.mxu3 }
 0xbc7   :  { %v3035_v3 = vperm.slane %v3027_v50, %v3965_v61  ;;  %v3037_v34 = vsel %vm146_vm8, %v3036_v48, %v3011_v23  ;;  %v2904_v22 = vpop.f32.mrf.mxu2  ;;  %v3597_v52 = vld [vmem:[%s5131_s4 + $0x18] sm:$0xff] }
 0xbc8   :  { %v3025_v1 = vsel %vm146_vm8, %v3024_v9, %v3007_v32  ;;  %v3043_v59 = vperm.slane %v3037_v34, %v3965_v61  ;;  %v3054_v36 = vrot.slane %v3047_v21, 4  ;;  %v2942_v54 = vpop.f32.mrf.mxu0  ;;  %v3105_v9 = vsel %vm146_vm8, %v4995_v0, %v3104_v38  ;;  %3221 = vmatpush.bf16.msrb.mxu1 %v3597_v52  ;;  %v3596_v0 = vld [vmem:[%s5131_s4 + $0x10] sm:$0xff] }
 0xbc9   :  { %v3031_v4 = vperm.slane %v3025_v1, %v3965_v61  ;;  %v3050_v5 = vrot.slane %v3035_v3, 4 }
 0xbca   :  { %v3052_v45 = vrot.slane %v3043_v59, 4  ;;  %v3055_v14 = vsel %vm146_vm8, 0.0, %v3054_v36  ;;  %v3121_v43 = vsel %vm146_vm8, %v3054_v36, %v3043_v59 }
 0xbcb   :  { %v3048_v7 = vrot.slane %v3031_v4, 4  ;;  %v3051_v17 = vsel %vm146_vm8, 0.0, %v3050_v5  ;;  %v3110_v20 = vsel %vm146_vm8, %v3050_v5, %v3031_v4  ;;  %v3125_v40 = vperm.slane %v3121_v43, %v3959_v53 }
 0xbcc   :  { %v3053_v41 = vsel %vm146_vm8, 0.0, %v3052_v45  ;;  %v3115_v12 = vrot.slane %v3051_v17, 4  ;;  %v3126_v56 = vrot.slane %v3055_v14, 4  ;;  %v3114_v26 = vperm.slane %v3110_v20, %v3959_v53  ;;  %3222 = vmatpush.bf16.msrb.mxu1 %v3596_v0  ;;  %v3600_v0 = vld [vmem:[%s5134_s7 + $0x20] sm:$0xff] }
 0xbcd   :  { %v3146_v27 = vrot.slane %v3125_v40, 4  ;;  %v3049_v29 = vsel %vm146_vm8, 0.0, %v3048_v7 }
 0xbce   :  { %v3127_v15 = vsel %vm146_vm8, %v3126_v56, %v3053_v41  ;;  %v3116_v30 = vsel %vm146_vm8, %v3115_v12, %v3049_v29  ;;  %v3134_v33 = vrot.slane %v3114_v26, 4 }
 0xbcf   :  { %v3131_v55 = vperm.slane %v3127_v15, %v3959_v53  ;;  %v3120_v37 = vperm.slane %v3116_v30, %v3959_v53 }
 0xbd1   :  { %v3135_v51 = vsel %vm146_vm8, %v3120_v37, %v3134_v33  ;;  %v3147_v8 = vsel %vm146_vm8, %v3131_v55, %v3146_v27  ;;  %v3132_v16 = vrot.slane %v3120_v37, 4  ;;  %v3144_v28 = vrot.slane %v3131_v55, 4  ;;  %v3599_v27 = vld [vmem:[%s5133_s6 + $0x18] sm:$0xff] }
 0xbd2   :  { %v3143_v23 = vperm.slane %v3135_v51, %v3965_v61  ;;  %v3155_v42 = vperm.slane %v3147_v8, %v3965_v61  ;;  %3295 = vmatpush.bf16.msrb.mxu2 %v3599_v27 }
 0xbd3   :  { %v3133_v44 = vsel %vm146_vm8, %v3132_v16, %v3114_v26  ;;  %v3145_v62 = vsel %vm146_vm8, %v3144_v28, %v3125_v40 }
 0xbd4   :  { %v3160_v32 = vrot.slane %v3155_v42, 4  ;;  %v3162_v53 = vrot.slane %v3143_v23, 4  ;;  %v3139_v57 = vperm.slane %v3133_v44, %v3965_v61  ;;  %v3151_v24 = vperm.slane %v3145_v62, %v3965_v61 }
 0xbd6   :  { %v3161_v46 = vsel %vm146_vm8, %v3160_v32, %v3143_v23  ;;  %v3163_v60 = vsel %vm146_vm8, %v3155_v42, %v3162_v53  ;;  %v3156_v25 = vrot.slane %v3151_v24, 4  ;;  %v3158_v35 = vrot.slane %v3139_v57, 4  ;;  %v3833_v32 = vld [vmem:[%s5132_s5] sm:$0x3] }
 0xbd7   :  { %v3717_v48 = vpack.i.bf16 %v3161_v46, %v3107_v47  ;;  %v3722_v49 = vpack.i.bf16 %v3163_v60, %v3109_v11  ;;  %v3265_v53 = vperm.slane %v3833_v32, 1 }
 0xbd8   :  { %v3159_v50 = vsel %vm146_vm8, %v3151_v24, %v3158_v35  ;;  %v3157_v21 = vsel %vm146_vm8, %v3156_v25, %v3139_v57  ;;  %v3603_v25 = vld [vmem:[%s5134_s7 + $0x38] sm:$0xff] }
 0xbd9   :  { %3718 = vrot.lane.b32.xlu0 %v3717_v48, %s3868_s24  ;;  %3723 = vrot.lane.b32.xlu1 %v3722_v49, %s3869_s25  ;;  %v3712_v61 = vpack.i.bf16 %v3159_v50, %v3105_v9  ;;  %v3602_v49 = vld [vmem:[%s5134_s7 + $0x30] sm:$0xff]  ;;  %v3601_v9 = vld [vmem:[%s5134_s7 + $0x28] sm:$0xff] }
 0xbda   :  { %3372 = vmatpush.bf16.msrb.mxu3 %v3603_v25 }
 0xbdb   :  { %3713 = vrot.lane.b32.xlu2 %v3712_v61, %s3870_s26 }
 0xbde   :  { %3373 = vmatpush.bf16.msrb.mxu3 %v3602_v49 }
 0xbe2   :  { %3374 = vmatpush.bf16.msrb.mxu3 %v3601_v9 }
 0xbe6   :  { %3375 = vmatpush.bf16.msrb.mxu3 %v3600_v0 }
 0xc35   :  { %v3714_v58 = vpop.permute.xlu2 %3713 }
 0xc36   :  { %v3716_v3 = vunpack.i.h.bf16 %v3714_v58  ;;  %v3715_v34 = vunpack.i.l.bf16 %v3714_v58 }
 0xc38   :  { %v3188_v4 = vsel %vm878_vm9, %v5003_v18, %v3715_v34  ;;  %v3189_v5 = vsel %vm878_vm9, %v3157_v21, %v3716_v3 }
 0xc4b   :  { %v3719_v22 = vpop.permute.xlu0 %3718  ;;  %v3724_v63 = vpop.permute.xlu1 %3723 }
 0xc4c   :  { %v3721_v1 = vunpack.i.h.bf16 %v3719_v22  ;;  %v3720_v59 = vunpack.i.l.bf16 %v3719_v22  ;;  %v3726_v36 = vunpack.i.h.bf16 %v3724_v63  ;;  %v3725_v54 = vunpack.i.l.bf16 %v3724_v63 }
 0xc4e   :  { %v3190_v6 = vsel %vm1526_vm11, %v3188_v4, %v3720_v59  ;;  %v3191_v45 = vsel %vm1526_vm11, %v3189_v5, %v3721_v1 }
 0xc4f   :  { %v3192_v14 = vsel %vm1529_vm12, %v3190_v6, %v3725_v54  ;;  %v3193_v43 = vsel %vm1529_vm12, %v3191_v45, %v3726_v36 }
 0xc50   :  { %v3194_v19 = vpack.c.bf16 %v3193_v43, %v3192_v14 }
 0xc52   :  { %3545 = vmatmul.msk.bf16.vlgmr.msrb.gmra.mxu1 %vm48_vm0, %v3194_v19 }
 0xccf   :  { %v3224_v7 = vpop.f32.mrf.mxu1 }
 0xcd0   :  { %v5072_v17 = vadd.f32 %v3224_v7, %v4518_v39 }
 0xcd2   :  { %v3231_v18 = vmul.f32 %v5072_v17, %v5072_v17 }
 0xcd4   :  { %v3233_v20 = vsel %vm48_vm0, %v3231_v18, 0.0 }
 0xcd5   :  { %3234 = vadd.xlane.f32.xlu0 %v3233_v20 }
 0xcd7   :  { %v3226_v40 = vpop.f32.mrf.mxu1 }
 0xcd8   :  { %v5078_v41 = vadd.f32 %v3226_v40, %v4524_v10  ;;  %v3598_v10 = vld [vmem:[%s5133_s6 + $0x10] sm:$0xff] }
 0xcd9   :  { %3296 = vmatpush.bf16.msrb.mxu2 %v3598_v10 }
 0xcda   :  { %v3232_v12 = vmul.f32 %v5078_v41, %v5078_v41 }
 0xcdc   :  { %v3236_v56 = vsel %vm48_vm0, %v3232_v12, 0.0 }
 0xcdd   :  { %3237 = vadd.xlane.f32.xlu2 %v3236_v56 }
 0xd48   :  { %v3235_v26 = vpop.xlane.xlu0 %3234 }
 0xd49   :  { %v3239_v39 = vmul.f32 %v3235_v26, %v3934_v13 }
 0xd4b   :  { %v3241_v29 = vadd.f32 1e-06, %v3239_v39 }
 0xd4d   :  { %3810 = vrsqrt.f32 %v3241_v29  ;;  %vm3249_vm9 = vweird.f32 %v3241_v29 }
 0xd50   :  { %v3238_v15 = vpop.xlane.xlu2 %3237 }
 0xd51   :  { %v3240_v30 = vmul.f32 %v3238_v15, %v3934_v13 }
 0xd53   :  { %v3811_v33 = vpop.eup %3810  ;;  %v3242_v55 = vadd.f32 1e-06, %v3240_v30 }
 0xd54   :  { %v3244_v37 = vmul.f32 %v3811_v33, %v3241_v29  ;;  %vm3250_vm8 = vweird.f32 %v3811_v33 }
 0xd55   :  { %3812 = vrsqrt.f32 %v3242_v55  ;;  %vm3251_vm10 = vmor %vm3249_vm9, %vm3250_vm8  ;;  %vm3259_vm12 = vweird.f32 %v3242_v55 }
 0xd56   :  { %v3245_v2 = vmul.f32 %v3811_v33, %v3244_v37 }
 0xd58   :  { %v3246_v31 = vmul.f32 0.5, %v3245_v2 }
 0xd5a   :  { %v3247_v51 = vsub.f32 1.5, %v3246_v31 }
 0xd5b   :  { %v3813_v8 = vpop.eup %3812 }
 0xd5c   :  { %v3254_v16 = vmul.f32 %v3813_v8, %v3242_v55  ;;  %v3248_v28 = vmul.f32 %v3811_v33, %v3247_v51  ;;  %vm3260_vm11 = vweird.f32 %v3813_v8 }
 0xd5d   :  { %vm3261_vm1 = vmor %vm3259_vm12, %vm3260_vm11 }
 0xd5e   :  { %v3255_v23 = vmul.f32 %v3813_v8, %v3254_v16  ;;  %v3252_v38 = vsel %vm3251_vm10, %v3811_v33, %v3248_v28 }
 0xd5f   :  { %v3263_v57 = vmul.f32 %v3252_v38, %v5072_v17 }
 0xd60   :  { %v3256_v42 = vmul.f32 0.5, %v3255_v23 }
 0xd61   :  { %v3266_v11 = vmul.f32 %v3265_v53, %v3263_v57 }
 0xd62   :  { %v3257_v44 = vsub.f32 1.5, %v3256_v42  ;;  %v3727_v42 = vld [vmem:[%s5135_s8] ss:$0 sm:$0xff]  ;;  %s3430_s8 = sshll.u32 %s3871_s11, 4  ;;  %s3431_s8 = int_to_ptr.vmem [resolvable:$true] %s3430_s8 }
 0xd64   :  { %v3258_v62 = vmul.f32 %v3813_v8, %v3257_v44 }
 0xd66   :  { %v3262_v24 = vsel %vm3261_vm1, %v3813_v8, %v3258_v62 }
 0xd67   :  { %v3264_v47 = vmul.f32 %v3262_v24, %v5078_v41 }
 0xd69   :  { %v3267_v46 = vmul.f32 %v3265_v53, %v3264_v47 }
 0xd6b   :  { %v3268_v60 = vpack.c.bf16 %v3267_v46, %v3266_v11 }
 0xd6d   :  { %3558 = vmatmul.msk.bf16.vlgmr.msrb.gmra.mxu2 %vm48_vm0, %v3268_v60 }
 0xdf0   :  { %v3298_v35 = vpop.f32.mrf.mxu2 }
 0xdf1   :  { %3323 = vrot.lane.b32.xlu1 %v3298_v35, %s3867_s23  ;;  %v3305_v50 = vmul.f32 0.044715, %v3298_v35  ;;  %v3303_v6 = vmul.f32 0.5, %v3298_v35 }
 0xdf3   :  { %v3307_v61 = vmul.f32 %v3305_v50, %v3298_v35 }
 0xdf5   :  { %v3309_v58 = vmul.f32 %v3307_v61, %v3298_v35 }
 0xdf7   :  { %v3311_v34 = vadd.f32 %v3309_v58, %v3298_v35 }
 0xdf8   :  { %v3300_v48 = vpop.f32.mrf.mxu2 }
 0xdf9   :  { %3325 = vrot.lane.b32.xlu1 %v3300_v48, %s3867_s23  ;;  %v3306_v21 = vmul.f32 0.044715, %v3300_v48  ;;  %v3313_v63 = vmul.f32 0.7978846, %v3311_v34  ;;  %v3304_v45 = vmul.f32 0.5, %v3300_v48 }
 0xdfb   :  { %v3308_v52 = vmul.f32 %v3306_v21, %v3300_v48  ;;  %3814 = vtanh.f32 %v3313_v63 }
 0xdfd   :  { %v3310_v3 = vmul.f32 %v3308_v52, %v3300_v48 }
 0xdff   :  { %v3312_v22 = vadd.f32 %v3310_v3, %v3300_v48 }
 0xe01   :  { %v3314_v1 = vmul.f32 0.7978846, %v3312_v22  ;;  %v3815_v59 = vpop.eup %3814 }
 0xe02   :  { %v3317_v4 = vadd.f32 1.0, %v3815_v59 }
 0xe03   :  { %3816 = vtanh.f32 %v3314_v1 }
 0xe04   :  { %v3319_v14 = vmul.f32 %v3317_v4, %v3303_v6 }
 0xe09   :  { %v3817_v36 = vpop.eup %3816 }
 0xe0a   :  { %v3318_v5 = vadd.f32 1.0, %v3817_v36 }
 0xe0c   :  { %v3320_v43 = vmul.f32 %v3318_v5, %v3304_v45 }
 0xe63   :  { %v3324_v54 = vpop.permute.xlu1 %3323 }
 0xe64   :  { %v3329_v7 = vmul.f32 %v3324_v54, %v3319_v14 }
 0xe6b   :  { %v3326_v19 = vpop.permute.xlu1 %3325 }
 0xe6c   :  { %v3330_v18 = vmul.f32 %v3326_v19, %v3320_v43 }
 0xe6e   :  { %v3331_v20 = vpack.c.bf16 %v3330_v18, %v3329_v7 }
 0xe70   :  { %3583 = vmatmul.msk.bf16.vlgmr.msrb.gmra.mxu3 %vm1700_vm4, %v3331_v20 }
 0xef3   :  { %v3377_v40 = vpop.f32.mrf.mxu3 }
 0xef4   :  { %v3382_v12 = vadd.f32 %v3377_v40, %v5072_v17 }
 0xef6   :  { %v3385_v56 = vmul.f32 %v3382_v12, %v3382_v12 }
 0xef8   :  { %v3387_v26 = vsel %vm48_vm0, %v3385_v56, 0.0 }
 0xef9   :  { %3388 = vadd.xlane.f32.xlu1 %v3387_v26 }
 0xefb   :  { %v3379_v39 = vpop.f32.mrf.mxu3 }
 0xefc   :  { %v3383_v27 = vadd.f32 %v3379_v39, %v5078_v41 }
 0xefe   :  { %v3386_v29 = vmul.f32 %v3383_v27, %v3383_v27 }
 0xf00   :  { %v3390_v10 = vsel %vm48_vm0, %v3386_v29, 0.0 }
 0xf01   :  { %3391 = vadd.xlane.f32.xlu0 %v3390_v10 }
 0xf6c   :  { %v3389_v15 = vpop.xlane.xlu1 %3388 }
 0xf6d   :  { %v3393_v30 = vmul.f32 %v3389_v15, %v3934_v13 }
 0xf6f   :  { %v3395_v33 = vadd.f32 1e-06, %v3393_v30 }
 0xf71   :  { %3818 = vrsqrt.f32 %v3395_v33  ;;  %vm3403_vm3 = vweird.f32 %v3395_v33 }
 0xf74   :  { %v3392_v55 = vpop.xlane.xlu0 %3391 }
 0xf75   :  { %v3394_v37 = vmul.f32 %v3392_v55, %v3934_v13 }
 0xf77   :  { %v3819_v17 = vpop.eup %3818  ;;  %v3396_v2 = vadd.f32 1e-06, %v3394_v37 }
 0xf78   :  { %v3398_v31 = vmul.f32 %v3819_v17, %v3395_v33  ;;  %vm3404_vm2 = vweird.f32 %v3819_v17 }
 0xf79   :  { %3820 = vrsqrt.f32 %v3396_v2  ;;  %vm3405_vm4 = vmor %vm3403_vm3, %vm3404_vm2  ;;  %vm3413_vm6 = vweird.f32 %v3396_v2 }
 0xf7a   :  { %v3399_v51 = vmul.f32 %v3819_v17, %v3398_v31 }
 0xf7c   :  { %v3400_v8 = vmul.f32 0.5, %v3399_v51 }
 0xf7e   :  { %v3401_v16 = vsub.f32 1.5, %v3400_v8 }
 0xf7f   :  { %v3821_v41 = vpop.eup %3820 }
 0xf80   :  { %v3402_v28 = vmul.f32 %v3819_v17, %v3401_v16  ;;  %v3408_v23 = vmul.f32 %v3821_v41, %v3396_v2  ;;  %vm3414_vm5 = vweird.f32 %v3821_v41 }
 0xf81   :  { %vm3415_vm7 = vmor %vm3413_vm6, %vm3414_vm5 }
 0xf82   :  { %v3406_v38 = vsel %vm3405_vm4, %v3819_v17, %v3402_v28  ;;  %v3409_v44 = vmul.f32 %v3821_v41, %v3408_v23 }
 0xf83   :  { %v3417_v13 = vmul.f32 %v3406_v38, %v3382_v12 }
 0xf84   :  { %v3410_v62 = vmul.f32 0.5, %v3409_v44 }
 0xf85   :  { %v3422_v32 = vmul.f32 %v3727_v42, %v3417_v13 }
 0xf86   :  { %v3411_v53 = vsub.f32 1.5, %v3410_v62 }
 0xf87   :  { %3424 = vst.msk [vmem:[#allocation2] sm:$0xff] %vm48_vm0, %v3422_v32 }
 0xf88   :  { %v3412_v57 = vmul.f32 %v3821_v41, %v3411_v53 }
 0xf8a   :  { %v3416_v24 = vsel %vm3415_vm7, %v3821_v41, %v3412_v57 }
 0xf8b   :  { %v3418_v47 = vmul.f32 %v3416_v24, %v3383_v27 }
 0xf8d   :  { %v3423_v11 = vmul.f32 %v3727_v42, %v3418_v47 }
 0xf8f   :  { %3425 = vst.msk [vmem:[#allocation2 + $0x8] sm:$0xff] %vm48_vm0, %v3423_v11 }
 0xf90   :  { %3438 = dma.vmem_to_hbm [thread:$0]  %s3431_s8, 256, %s3433_s10, [#allocation3], %s3872_s12, %s3872_s12, %s3870_s26  }
 0xf91   :  { %3858 = dma.done.wait [#allocation3], 256  }
 0xf92   :  { %3859 = vsyncadd [#allocation3], 4294967040 }
 0xf93   :  { %3443 = vsyncpa [#allocation3], 1 }

</bundles_post_ra>
